<compile_context>
chip_gen: v6e
topology: v6e:2x2x1
jax: 0.10.0
libtpu: 0.0.40
codegen_flags: <defaults>
</compile_context>

<pallas_src>
import jax
import jax.numpy as jnp
from jax import lax
from jax.experimental import pallas as pl
from jax.experimental.pallas import tpu as pltpu

BN_EPS = 1e-5
SCALES = (1, 2, 4)
KS = 7            # spatial-gate kernel size
HALO = KS // 2    # 3


# --------------------------------------------------------------------------
# Host-side helpers (pooling / bilinear matrices / param setup)
# --------------------------------------------------------------------------
def adaptive_avg_pool(x, s):
    # exact for H, W divisible by s (matches F.adaptive_avg_pool2d here)
    N, C, H, W = x.shape
    return x.reshape(N, C, H // s, s, W // s, s).mean(axis=(3, 5))


def bilinear_matrix(out_size, in_size):
    # matches F.interpolate(mode='bilinear', align_corners=False)
    i = jnp.arange(out_size, dtype=jnp.float32)
    src = (i + 0.5) * (in_size / out_size) - 0.5
    src = jnp.maximum(src, 0.0)
    i0 = jnp.clip(jnp.floor(src).astype(jnp.int32), 0, in_size - 1)
    i1 = jnp.minimum(i0 + 1, in_size - 1)
    frac = src - i0.astype(jnp.float32)
    m = jnp.zeros((out_size, in_size), jnp.float32)
    m = m.at[jnp.arange(out_size), i0].add(1.0 - frac)
    m = m.at[jnp.arange(out_size), i1].add(frac)
    return m


def bilinear_upsample(x, H, W):
    _, _, Hs, Ws = x.shape
    mh = bilinear_matrix(H, Hs)
    mw = bilinear_matrix(W, Ws)
    return jnp.einsum('ij,ncjk,lk->ncil', mh, x, mw)


def init_raw_params(key, C):
    Ch = C // 8

    def nrm(k, shape, scale):
        return jax.random.normal(k, shape, jnp.float32) * scale

    raws = []
    for i in range(len(SCALES)):
        ks = jax.random.split(jax.random.fold_in(key, i), 10)
        raws.append((
            nrm(ks[0], (Ch, C, 1, 1), 0.3),          # conv1 weight
            nrm(ks[1], (Ch,), 0.1),                  # conv1 bias
            1.0 + nrm(ks[2], (Ch,), 0.1),            # bn1 gamma
            nrm(ks[3], (Ch,), 0.05),                 # bn1 beta
            nrm(ks[4], (C, Ch, 1, 1), 0.3),          # conv2 weight
            nrm(ks[5], (C,), 0.1),                   # conv2 bias
            nrm(ks[6], (1, C, 7, 7), 0.05),          # spatial 7x7 weight
            nrm(ks[7], (1,), 0.05),                  # spatial bias
            1.0 + nrm(ks[8], (1,), 0.1),             # bn_sp gamma
            nrm(ks[9], (1,), 0.05),                  # bn_sp beta
        ))
    kf = jax.random.fold_in(key, 100)
    wf = nrm(jax.random.fold_in(kf, 0), (C, C * len(SCALES), 1, 1), 0.1)
    bf = nrm(jax.random.fold_in(kf, 1), (C,), 0.05)
    return raws, wf, bf


def fold_scar_params(raw):
    """Fold eval-mode BatchNorm (mean=0, var=1) into the adjacent convs."""
    w1, b1, g1, bt1, w2, b2, w7, b7, gs, bs = raw
    C = w2.shape[0]
    s1 = g1 / jnp.sqrt(1.0 + BN_EPS)
    w1f = w1[:, :, 0, 0] * s1[:, None]                        # (Ch, C)
    b1f = (b1 * s1 + bt1).reshape(-1, 1)                      # (Ch, 1)
    ss = gs / jnp.sqrt(1.0 + BN_EPS)                          # (1,)
    w7f = (w7[0] * ss).transpose(1, 2, 0).reshape(49, C)      # (49, C) [dy*7+dx, c]
    b7f = (b7 * ss + bs).reshape(1)                           # (1,)
    return (w1f, b1f, w2[:, :, 0, 0], b2.reshape(-1, 1), w7f, b7f)


# --------------------------------------------------------------------------
# Pallas kernel: per-batch, per-scale channel gate + spatial gate + fusion 1x1
# --------------------------------------------------------------------------
def multi_scale_scar_attention(x, folded_list, wf2, bf):
    N, C, H, W = x.shape
    nsc = len(SCALES)
    Ch = C // 8
    x = x.astype(jnp.float32)

    # per-scale geometry + zero-halo-padded, lane-padded flat inputs
    geom, xs_list = [], []
    for s in SCALES:
        Hs, Ws = H // s, W // s
        Hr, Wr = Hs + 2 * HALO, Ws + 2 * HALO
        Qn = Hr * Wr
        Qp = ((Qn + 127) // 128) * 128              # lane-dense (multiple of 128)
        geom.append((Hs, Ws, Hr, Wr, Qn, Qp))
        xs = x if s == 1 else adaptive_avg_pool(x, s)
        xs = jnp.pad(xs, ((0, 0), (0, 0), (HALO, HALO), (HALO, HALO)))
        xs = xs.reshape(N, C, Qn)
        xs = jnp.pad(xs, ((0, 0), (0, 0), (0, Qp - Qn)))
        xs_list.append(xs)

    # BN-folded per-scale weights, stacked along a leading scale axis
    w1_all = jnp.stack([f[0] for f in folded_list])                    # (3, Ch, C)
    b1_all = jnp.stack([f[1] for f in folded_list])                    # (3, Ch, 1)
    w2_all = jnp.stack([f[2] for f in folded_list])                    # (3, C, Ch)
    b2_all = jnp.stack([f[3] for f in folded_list])                    # (3, C, 1)
    w7_all = jnp.stack([f[4] for f in folded_list])                    # (3, 49, C)
    b7_all = jnp.stack([f[5] for f in folded_list]).reshape(1, nsc)    # (1, 3)
    wf_all = jnp.stack([wf2[:, i * C:(i + 1) * C] for i in range(nsc)]
                       ).astype(jnp.float32)                           # (3, C, C)

    def kernel(*refs):
        xs_refs = refs[:nsc]
        w1_ref, b1_ref, w2_ref, b2_ref, w7_ref, wf_ref, b7_ref = refs[nsc:nsc + 7]
        out_refs = refs[nsc + 7:]

        for i in range(nsc):
            Hs, Ws, Hr, Wr, Qn, Qp = geom[i]
            xs = xs_refs[i][0]                                    # (C, Qp), zero halo

            # ---- channel gate: adaptive_avg_pool -> 1x1 -> BN+ReLU -> 1x1 -> sigmoid
            # halo/padding lanes are zero, so a plain lane-sum IS the interior mean
            # (XLU reduce; no pooling-matrix matmul, no membership matmul).
            pooled = jnp.sum(xs, axis=1, keepdims=True) * (1.0 / (Hs * Ws))   # (C, 1)
            hid = jnp.dot(w1_ref[i], pooled,
                          preferred_element_type=jnp.float32) + b1_ref[i]     # (Ch, 1)
            hid = jnp.maximum(hid, 0.0)
            gate = jax.nn.sigmoid(
                jnp.dot(w2_ref[i], hid, preferred_element_type=jnp.float32)
                + b2_ref[i])                                                  # (C, 1)
            x1 = xs * gate                    # VPU broadcast; halo stays exactly 0

            # ---- spatial gate: channel reduction on the MXU, then the 7x7 spatial
            # part as static lane rotations (XLU) + a balanced add tree.  Rotation
            # wrap-around only touches halo/padding outputs, which are cropped later.
            taps = jnp.dot(w7_ref[i], x1,
                           preferred_element_type=jnp.float32)                # (49, Qp)
            rows = []
            for k in range(KS * KS):
                dy, dx = divmod(k, KS)
                off = (dy - HALO) * Wr + (dx - HALO)
                row = taps[k:k + 1, :]                                        # (1, Qp)
                if off != 0:
                    row = pltpu.roll(row, shift=(-off) % Qp, axis=1)
                rows.append(row)
            while len(rows) > 1:              # balanced tree: depth 6, not 49
                nxt = [rows[j] + rows[j + 1] for j in range(0, len(rows) - 1, 2)]
                if len(rows) % 2:
                    nxt.append(rows[-1])
                rows = nxt
            sp = jax.nn.sigmoid(rows[0] + b7_ref[:, i:i + 1])                 # (1, Qp)
            att = x1 * sp

            # ---- this scale's slice of the fusion 1x1 (channels-only, so it
            # commutes with the spatial crop/upsample done outside the kernel).
            out_refs[i][0] = jnp.dot(wf_ref[i], att,
                                     preferred_element_type=jnp.float32)      # (C, Qp)

    in_specs = [pl.BlockSpec((1, C, geom[i][5]), lambda n: (n, 0, 0))
                for i in range(nsc)]
    in_specs += [
        pl.BlockSpec((nsc, Ch, C), lambda n: (0, 0, 0)),
        pl.BlockSpec((nsc, Ch, 1), lambda n: (0, 0, 0)),
        pl.BlockSpec((nsc, C, Ch), lambda n: (0, 0, 0)),
        pl.BlockSpec((nsc, C, 1), lambda n: (0, 0, 0)),
        pl.BlockSpec((nsc, KS * KS, C), lambda n: (0, 0, 0)),
        pl.BlockSpec((nsc, C, C), lambda n: (0, 0, 0)),
        pl.BlockSpec((1, nsc), lambda n: (0, 0)),
    ]
    out_specs = [pl.BlockSpec((1, C, geom[i][5]), lambda n: (n, 0, 0))
                 for i in range(nsc)]
    out_shape = tuple(jax.ShapeDtypeStruct((N, C, geom[i][5]), jnp.float32)
                      for i in range(nsc))

    # Scoped-VMEM request: double-buffered in/out blocks + weights + taps/row
    # temporaries, with 4x headroom; clamped to stay valid on v5e..v7x.
    sum_q = sum(g[5] for g in geom)
    max_q = max(g[5] for g in geom)
    w_bytes = 4 * sum(int(a.size) for a in
                      (w1_all, b1_all, w2_all, b2_all, w7_all, wf_all, b7_all))
    need = 4 * (2 * 2 * C * sum_q + (KS * KS + 16) * max_q) + w_bytes
    vmem_limit = int(min(max(4 * need, 16 * 2 ** 20), 64 * 2 ** 20))

    fused = pl.pallas_call(
        kernel,
        out_shape=out_shape,
        grid_spec=pltpu.PrefetchScalarGridSpec(
            num_scalar_prefetch=0,
            grid=(N,),
            in_specs=in_specs,
            out_specs=out_specs),
        compiler_params=pltpu.CompilerParams(
            dimension_semantics=("parallel",),
            vmem_limit_bytes=vmem_limit),
    )(*xs_list, w1_all, b1_all, w2_all, b2_all, w7_all, wf_all, b7_all)

    # Separable crop / bilinear upsample of the small per-scale fused maps,
    # sum + bias -> NCHW directly (no full-size transpose anywhere).
    out = None
    for i, s in enumerate(SCALES):
        Hs, Ws, Hr, Wr, Qn, Qp = geom[i]
        f3 = fused[i][:, :, :Qn].reshape(N, C, Hr, Wr)[:, :, HALO:HALO + Hs,
                                                       HALO:HALO + Ws]
        if s == 1:
            contrib = f3
        else:
            contrib = jnp.einsum('yh,nchw,xw->ncyx',
                                 bilinear_matrix(H, Hs), f3,
                                 bilinear_matrix(W, Ws))
        out = contrib if out is None else out + contrib
    return out + bf.reshape(1, C, 1, 1).astype(jnp.float32)


# --------------------------------------------------------------------------
# Pure-JAX reference (same eval-mode BN semantics) for a sanity check
# --------------------------------------------------------------------------
def _ref_scar_attention(x, raw):
    w1, b1, g1, bt1, w2, b2, w7, b7, gs, bs = raw
    pooled = jnp.mean(x, axis=(2, 3), keepdims=True)
    z = jnp.einsum('nchw,kc->nkhw', pooled, w1[:, :, 0, 0]) + b1[None, :, None, None]
    z = z / jnp.sqrt(1.0 + BN_EPS) * g1[None, :, None, None] + bt1[None, :, None, None]
    z = jnp.maximum(z, 0.0)
    z = jnp.einsum('nkhw,ck->nchw', z, w2[:, :, 0, 0]) + b2[None, :, None, None]
    x1 = x * jax.nn.sigmoid(z)
    sp = lax.conv_general_dilated(x1, w7, (1, 1), ((3, 3), (3, 3)),
                                  dimension_numbers=('NCHW', 'OIHW', 'NCHW'))
    sp = sp + b7[None, :, None, None]
    sp = sp / jnp.sqrt(1.0 + BN_EPS) * gs[None, :, None, None] + bs[None, :, None, None]
    return x1 * jax.nn.sigmoid(sp)


def _ref_forward(x, raws, wf, bf):
    N, C, H, W = x.shape
    outs = []
    for s, raw in zip(SCALES, raws):
        scaled = x if s == 1 else adaptive_avg_pool(x, s)
        att = _ref_scar_attention(scaled, raw)
        if s > 1:
            att = bilinear_upsample(att, H, W)
        outs.append(att)
    cat = jnp.concatenate(outs, axis=1)
    return jnp.einsum('nkhw,ck->nchw', cat, wf[:, :, 0, 0]) + bf[None, :, None, None]


# --------------------------------------------------------------------------
if __name__ == "__main__":
    key = jax.random.PRNGKey(0)
    N, C, H, W = 2, 16, 16, 16
    x = jax.random.normal(jax.random.fold_in(key, 7), (N, C, H, W), jnp.float32)

    raws, wf, bf = init_raw_params(key, C)
    folded_list = [fold_scar_params(r) for r in raws]
    wf2 = wf[:, :, 0, 0]                                      # (C, 3C)

    out = multi_scale_scar_attention(x, folded_list, wf2, bf)
    out = jax.block_until_ready(out)

    ref = _ref_forward(x, raws, wf, bf)
    assert out.shape == (N, C, H, W)
    # tightened 10x from the previous 5e-2; bounded by default-precision MXU
    # f32 matmul passes (reference einsums use the same XLA default precision).
    max_err = float(jnp.max(jnp.abs(out - ref)))
    assert max_err < 5e-3, f"max abs error too large: {max_err}"
    print("KERNEL_OK")
</pallas_src>

<mosaic_0001>
module attributes {stable_mosaic.version = 11 : i64} {
  func.func @kernel(%arg0: i32, %arg1: memref<1x16x512xf32, #tpu.memory_space<vmem>>, %arg2: memref<1x16x256xf32, #tpu.memory_space<vmem>>, %arg3: memref<1x16x128xf32, #tpu.memory_space<vmem>>, %arg4: memref<3x2x16xf32, #tpu.memory_space<vmem>>, %arg5: memref<3x2x1xf32, #tpu.memory_space<vmem>>, %arg6: memref<3x16x2xf32, #tpu.memory_space<vmem>>, %arg7: memref<3x16x1xf32, #tpu.memory_space<vmem>>, %arg8: memref<3x49x16xf32, #tpu.memory_space<vmem>>, %arg9: memref<3x16x16xf32, #tpu.memory_space<vmem>>, %arg10: memref<1x3xf32, #tpu.memory_space<vmem>>, %arg11: memref<1x16x512xf32, #tpu.memory_space<vmem>>, %arg12: memref<1x16x256xf32, #tpu.memory_space<vmem>>, %arg13: memref<1x16x128xf32, #tpu.memory_space<vmem>>) attributes {dimension_semantics = [#tpu.dimension_semantics<parallel>], iteration_bounds = array<i64: 2>, scalar_prefetch = 0 : i64, scratch_operands = 0 : i64, tpu.core_type = #tpu.core_type<tc>, window_params = [{transform_indices = @transform_0, window_bounds = array<i64: 1, 16, 512>}, {transform_indices = @transform_1, window_bounds = array<i64: 1, 16, 256>}, {transform_indices = @transform_2, window_bounds = array<i64: 1, 16, 128>}, {pipeline_mode = #tpu.pipeline_mode<synchronous>, transform_indices = @transform_3, window_bounds = array<i64: 3, 2, 16>}, {pipeline_mode = #tpu.pipeline_mode<synchronous>, transform_indices = @transform_4, window_bounds = array<i64: 3, 2, 1>}, {pipeline_mode = #tpu.pipeline_mode<synchronous>, transform_indices = @transform_5, window_bounds = array<i64: 3, 16, 2>}, {pipeline_mode = #tpu.pipeline_mode<synchronous>, transform_indices = @transform_6, window_bounds = array<i64: 3, 16, 1>}, {pipeline_mode = #tpu.pipeline_mode<synchronous>, transform_indices = @transform_7, window_bounds = array<i64: 3, 49, 16>}, {pipeline_mode = #tpu.pipeline_mode<synchronous>, transform_indices = @transform_8, window_bounds = array<i64: 3, 16, 16>}, {pipeline_mode = #tpu.pipeline_mode<synchronous>, transform_indices = @transform_9, window_bounds = array<i64: 1, 3>}, {transform_indices = @transform_10, window_bounds = array<i64: 1, 16, 512>}, {transform_indices = @transform_11, window_bounds = array<i64: 1, 16, 256>}, {transform_indices = @transform_12, window_bounds = array<i64: 1, 16, 128>}]} {
    %c0 = arith.constant 0 : index
    %c0_0 = arith.constant 0 : index
    %c0_1 = arith.constant 0 : index
    %0 = vector.load %arg1[%c0, %c0_0, %c0_1] : memref<1x16x512xf32, #tpu.memory_space<vmem>>, vector<1x16x512xf32>
    %1 = vector.shape_cast %0 : vector<1x16x512xf32> to vector<16x512xf32>
    %cst = arith.constant dense<0.000000e+00> : vector<16xf32>
    %2 = vector.multi_reduction <add>, %1, %cst [1] : vector<16x512xf32> to vector<16xf32>
    %3 = vector.shape_cast %2 : vector<16xf32> to vector<16x1xf32>
    %cst_2 = arith.constant 3.906250e-03 : f32
    %4 = vector.broadcast %cst_2 : f32 to vector<16x1xf32>
    %5 = arith.mulf %3, %4 : vector<16x1xf32>
    %c0_3 = arith.constant 0 : index
    %c0_4 = arith.constant 0 : index
    %c0_5 = arith.constant 0 : index
    %6 = vector.load %arg4[%c0_3, %c0_4, %c0_5] : memref<3x2x16xf32, #tpu.memory_space<vmem>>, vector<1x2x16xf32>
    %7 = vector.shape_cast %6 : vector<1x2x16xf32> to vector<2x16xf32>
    %cst_6 = arith.constant dense<0.000000e+00> : vector<2x1xf32>
    %8 = tpu.matmul %7, %5, %cst_6 {dimension_numbers = #tpu.dot_dimension_numbers<[1], [0], [0], [1], [0, 0, 1, 1], [], []>} : vector<2x16xf32>, vector<16x1xf32>, vector<2x1xf32> -> vector<2x1xf32>
    %c0_7 = arith.constant 0 : index
    %c0_8 = arith.constant 0 : index
    %c0_9 = arith.constant 0 : index
    %9 = vector.load %arg5[%c0_7, %c0_8, %c0_9] : memref<3x2x1xf32, #tpu.memory_space<vmem>>, vector<1x2x1xf32>
    %10 = vector.shape_cast %9 : vector<1x2x1xf32> to vector<2x1xf32>
    %11 = arith.addf %8, %10 : vector<2x1xf32>
    %cst_10 = arith.constant 0.000000e+00 : f32
    %12 = vector.broadcast %cst_10 : f32 to vector<2x1xf32>
    %13 = arith.maximumf %11, %12 : vector<2x1xf32>
    %c0_11 = arith.constant 0 : index
    %c0_12 = arith.constant 0 : index
    %c0_13 = arith.constant 0 : index
    %14 = vector.load %arg6[%c0_11, %c0_12, %c0_13] : memref<3x16x2xf32, #tpu.memory_space<vmem>>, vector<1x16x2xf32>
    %15 = vector.shape_cast %14 : vector<1x16x2xf32> to vector<16x2xf32>
    %cst_14 = arith.constant dense<0.000000e+00> : vector<16x1xf32>
    %16 = tpu.matmul %15, %13, %cst_14 {dimension_numbers = #tpu.dot_dimension_numbers<[1], [0], [0], [1], [0, 0, 1, 1], [], []>} : vector<16x2xf32>, vector<2x1xf32>, vector<16x1xf32> -> vector<16x1xf32>
    %c0_15 = arith.constant 0 : index
    %c0_16 = arith.constant 0 : index
    %c0_17 = arith.constant 0 : index
    %17 = vector.load %arg7[%c0_15, %c0_16, %c0_17] : memref<3x16x1xf32, #tpu.memory_space<vmem>>, vector<1x16x1xf32>
    %18 = vector.shape_cast %17 : vector<1x16x1xf32> to vector<16x1xf32>
    %19 = arith.addf %16, %18 : vector<16x1xf32>
    %20 = arith.negf %19 : vector<16x1xf32>
    %21 = math.exp %20 : vector<16x1xf32>
    %cst_18 = arith.constant 1.000000e+00 : f32
    %22 = vector.broadcast %cst_18 : f32 to vector<16x1xf32>
    %23 = arith.addf %22, %21 : vector<16x1xf32>
    %24 = arith.divf %22, %23 : vector<16x1xf32>
    %25 = vector.broadcast %24 : vector<16x1xf32> to vector<16x512xf32>
    %26 = arith.mulf %1, %25 : vector<16x512xf32>
    %c0_19 = arith.constant 0 : index
    %c0_20 = arith.constant 0 : index
    %c0_21 = arith.constant 0 : index
    %27 = vector.load %arg8[%c0_19, %c0_20, %c0_21] : memref<3x49x16xf32, #tpu.memory_space<vmem>>, vector<1x49x16xf32>
    %28 = vector.shape_cast %27 : vector<1x49x16xf32> to vector<49x16xf32>
    %cst_22 = arith.constant dense<0.000000e+00> : vector<49x512xf32>
    %29 = tpu.matmul %28, %26, %cst_22 {dimension_numbers = #tpu.dot_dimension_numbers<[1], [0], [0], [1], [0, 0, 1, 1], [], []>} : vector<49x16xf32>, vector<16x512xf32>, vector<49x512xf32> -> vector<49x512xf32>
    %30 = vector.extract_strided_slice %29 {offsets = [0, 0], sizes = [1, 512], strides = [1, 1]} : vector<49x512xf32> to vector<1x512xf32>
    %c69_i32 = arith.constant 69 : i32
    %31 = tpu.dynamic_rotate %30 by %c69_i32 dim 1 : vector<1x512xf32>, i32 -> vector<1x512xf32>
    %32 = vector.extract_strided_slice %29 {offsets = [1, 0], sizes = [1, 512], strides = [1, 1]} : vector<49x512xf32> to vector<1x512xf32>
    %c68_i32 = arith.constant 68 : i32
    %33 = tpu.dynamic_rotate %32 by %c68_i32 dim 1 : vector<1x512xf32>, i32 -> vector<1x512xf32>
    %34 = vector.extract_strided_slice %29 {offsets = [2, 0], sizes = [1, 512], strides = [1, 1]} : vector<49x512xf32> to vector<1x512xf32>
    %c67_i32 = arith.constant 67 : i32
    %35 = tpu.dynamic_rotate %34 by %c67_i32 dim 1 : vector<1x512xf32>, i32 -> vector<1x512xf32>
    %36 = vector.extract_strided_slice %29 {offsets = [3, 0], sizes = [1, 512], strides = [1, 1]} : vector<49x512xf32> to vector<1x512xf32>
    %c66_i32 = arith.constant 66 : i32
    %37 = tpu.dynamic_rotate %36 by %c66_i32 dim 1 : vector<1x512xf32>, i32 -> vector<1x512xf32>
    %38 = vector.extract_strided_slice %29 {offsets = [4, 0], sizes = [1, 512], strides = [1, 1]} : vector<49x512xf32> to vector<1x512xf32>
    %c65_i32 = arith.constant 65 : i32
    %39 = tpu.dynamic_rotate %38 by %c65_i32 dim 1 : vector<1x512xf32>, i32 -> vector<1x512xf32>
    %40 = vector.extract_strided_slice %29 {offsets = [5, 0], sizes = [1, 512], strides = [1, 1]} : vector<49x512xf32> to vector<1x512xf32>
    %c64_i32 = arith.constant 64 : i32
    %41 = tpu.dynamic_rotate %40 by %c64_i32 dim 1 : vector<1x512xf32>, i32 -> vector<1x512xf32>
    %42 = vector.extract_strided_slice %29 {offsets = [6, 0], sizes = [1, 512], strides = [1, 1]} : vector<49x512xf32> to vector<1x512xf32>
    %c63_i32 = arith.constant 63 : i32
    %43 = tpu.dynamic_rotate %42 by %c63_i32 dim 1 : vector<1x512xf32>, i32 -> vector<1x512xf32>
    %44 = vector.extract_strided_slice %29 {offsets = [7, 0], sizes = [1, 512], strides = [1, 1]} : vector<49x512xf32> to vector<1x512xf32>
    %c47_i32 = arith.constant 47 : i32
    %45 = tpu.dynamic_rotate %44 by %c47_i32 dim 1 : vector<1x512xf32>, i32 -> vector<1x512xf32>
    %46 = vector.extract_strided_slice %29 {offsets = [8, 0], sizes = [1, 512], strides = [1, 1]} : vector<49x512xf32> to vector<1x512xf32>
    %c46_i32 = arith.constant 46 : i32
    %47 = tpu.dynamic_rotate %46 by %c46_i32 dim 1 : vector<1x512xf32>, i32 -> vector<1x512xf32>
    %48 = vector.extract_strided_slice %29 {offsets = [9, 0], sizes = [1, 512], strides = [1, 1]} : vector<49x512xf32> to vector<1x512xf32>
    %c45_i32 = arith.constant 45 : i32
    %49 = tpu.dynamic_rotate %48 by %c45_i32 dim 1 : vector<1x512xf32>, i32 -> vector<1x512xf32>
    %50 = vector.extract_strided_slice %29 {offsets = [10, 0], sizes = [1, 512], strides = [1, 1]} : vector<49x512xf32> to vector<1x512xf32>
    %c44_i32 = arith.constant 44 : i32
    %51 = tpu.dynamic_rotate %50 by %c44_i32 dim 1 : vector<1x512xf32>, i32 -> vector<1x512xf32>
    %52 = vector.extract_strided_slice %29 {offsets = [11, 0], sizes = [1, 512], strides = [1, 1]} : vector<49x512xf32> to vector<1x512xf32>
    %c43_i32 = arith.constant 43 : i32
    %53 = tpu.dynamic_rotate %52 by %c43_i32 dim 1 : vector<1x512xf32>, i32 -> vector<1x512xf32>
    %54 = vector.extract_strided_slice %29 {offsets = [12, 0], sizes = [1, 512], strides = [1, 1]} : vector<49x512xf32> to vector<1x512xf32>
    %c42_i32 = arith.constant 42 : i32
    %55 = tpu.dynamic_rotate %54 by %c42_i32 dim 1 : vector<1x512xf32>, i32 -> vector<1x512xf32>
    %56 = vector.extract_strided_slice %29 {offsets = [13, 0], sizes = [1, 512], strides = [1, 1]} : vector<49x512xf32> to vector<1x512xf32>
    %c41_i32 = arith.constant 41 : i32
    %57 = tpu.dynamic_rotate %56 by %c41_i32 dim 1 : vector<1x512xf32>, i32 -> vector<1x512xf32>
    %58 = vector.extract_strided_slice %29 {offsets = [14, 0], sizes = [1, 512], strides = [1, 1]} : vector<49x512xf32> to vector<1x512xf32>
    %c25_i32 = arith.constant 25 : i32
    %59 = tpu.dynamic_rotate %58 by %c25_i32 dim 1 : vector<1x512xf32>, i32 -> vector<1x512xf32>
    %60 = vector.extract_strided_slice %29 {offsets = [15, 0], sizes = [1, 512], strides = [1, 1]} : vector<49x512xf32> to vector<1x512xf32>
    %c24_i32 = arith.constant 24 : i32
    %61 = tpu.dynamic_rotate %60 by %c24_i32 dim 1 : vector<1x512xf32>, i32 -> vector<1x512xf32>
    %62 = vector.extract_strided_slice %29 {offsets = [16, 0], sizes = [1, 512], strides = [1, 1]} : vector<49x512xf32> to vector<1x512xf32>
    %c23_i32 = arith.constant 23 : i32
    %63 = tpu.dynamic_rotate %62 by %c23_i32 dim 1 : vector<1x512xf32>, i32 -> vector<1x512xf32>
    %64 = vector.extract_strided_slice %29 {offsets = [17, 0], sizes = [1, 512], strides = [1, 1]} : vector<49x512xf32> to vector<1x512xf32>
    %c22_i32 = arith.constant 22 : i32
    %65 = tpu.dynamic_rotate %64 by %c22_i32 dim 1 : vector<1x512xf32>, i32 -> vector<1x512xf32>
    %66 = vector.extract_strided_slice %29 {offsets = [18, 0], sizes = [1, 512], strides = [1, 1]} : vector<49x512xf32> to vector<1x512xf32>
    %c21_i32 = arith.constant 21 : i32
    %67 = tpu.dynamic_rotate %66 by %c21_i32 dim 1 : vector<1x512xf32>, i32 -> vector<1x512xf32>
    %68 = vector.extract_strided_slice %29 {offsets = [19, 0], sizes = [1, 512], strides = [1, 1]} : vector<49x512xf32> to vector<1x512xf32>
    %c20_i32 = arith.constant 20 : i32
    %69 = tpu.dynamic_rotate %68 by %c20_i32 dim 1 : vector<1x512xf32>, i32 -> vector<1x512xf32>
    %70 = vector.extract_strided_slice %29 {offsets = [20, 0], sizes = [1, 512], strides = [1, 1]} : vector<49x512xf32> to vector<1x512xf32>
    %c19_i32 = arith.constant 19 : i32
    %71 = tpu.dynamic_rotate %70 by %c19_i32 dim 1 : vector<1x512xf32>, i32 -> vector<1x512xf32>
    %72 = vector.extract_strided_slice %29 {offsets = [21, 0], sizes = [1, 512], strides = [1, 1]} : vector<49x512xf32> to vector<1x512xf32>
    %c3_i32 = arith.constant 3 : i32
    %73 = tpu.dynamic_rotate %72 by %c3_i32 dim 1 : vector<1x512xf32>, i32 -> vector<1x512xf32>
    %74 = vector.extract_strided_slice %29 {offsets = [22, 0], sizes = [1, 512], strides = [1, 1]} : vector<49x512xf32> to vector<1x512xf32>
    %c2_i32 = arith.constant 2 : i32
    %75 = tpu.dynamic_rotate %74 by %c2_i32 dim 1 : vector<1x512xf32>, i32 -> vector<1x512xf32>
    %76 = vector.extract_strided_slice %29 {offsets = [23, 0], sizes = [1, 512], strides = [1, 1]} : vector<49x512xf32> to vector<1x512xf32>
    %c1_i32 = arith.constant 1 : i32
    %77 = tpu.dynamic_rotate %76 by %c1_i32 dim 1 : vector<1x512xf32>, i32 -> vector<1x512xf32>
    %78 = vector.extract_strided_slice %29 {offsets = [24, 0], sizes = [1, 512], strides = [1, 1]} : vector<49x512xf32> to vector<1x512xf32>
    %79 = vector.extract_strided_slice %29 {offsets = [25, 0], sizes = [1, 512], strides = [1, 1]} : vector<49x512xf32> to vector<1x512xf32>
    %c511_i32 = arith.constant 511 : i32
    %80 = tpu.dynamic_rotate %79 by %c511_i32 dim 1 : vector<1x512xf32>, i32 -> vector<1x512xf32>
    %81 = vector.extract_strided_slice %29 {offsets = [26, 0], sizes = [1, 512], strides = [1, 1]} : vector<49x512xf32> to vector<1x512xf32>
    %c510_i32 = arith.constant 510 : i32
    %82 = tpu.dynamic_rotate %81 by %c510_i32 dim 1 : vector<1x512xf32>, i32 -> vector<1x512xf32>
    %83 = vector.extract_strided_slice %29 {offsets = [27, 0], sizes = [1, 512], strides = [1, 1]} : vector<49x512xf32> to vector<1x512xf32>
    %c509_i32 = arith.constant 509 : i32
    %84 = tpu.dynamic_rotate %83 by %c509_i32 dim 1 : vector<1x512xf32>, i32 -> vector<1x512xf32>
    %85 = vector.extract_strided_slice %29 {offsets = [28, 0], sizes = [1, 512], strides = [1, 1]} : vector<49x512xf32> to vector<1x512xf32>
    %c493_i32 = arith.constant 493 : i32
    %86 = tpu.dynamic_rotate %85 by %c493_i32 dim 1 : vector<1x512xf32>, i32 -> vector<1x512xf32>
    %87 = vector.extract_strided_slice %29 {offsets = [29, 0], sizes = [1, 512], strides = [1, 1]} : vector<49x512xf32> to vector<1x512xf32>
    %c492_i32 = arith.constant 492 : i32
    %88 = tpu.dynamic_rotate %87 by %c492_i32 dim 1 : vector<1x512xf32>, i32 -> vector<1x512xf32>
    %89 = vector.extract_strided_slice %29 {offsets = [30, 0], sizes = [1, 512], strides = [1, 1]} : vector<49x512xf32> to vector<1x512xf32>
    %c491_i32 = arith.constant 491 : i32
    %90 = tpu.dynamic_rotate %89 by %c491_i32 dim 1 : vector<1x512xf32>, i32 -> vector<1x512xf32>
    %91 = vector.extract_strided_slice %29 {offsets = [31, 0], sizes = [1, 512], strides = [1, 1]} : vector<49x512xf32> to vector<1x512xf32>
    %c490_i32 = arith.constant 490 : i32
    %92 = tpu.dynamic_rotate %91 by %c490_i32 dim 1 : vector<1x512xf32>, i32 -> vector<1x512xf32>
    %93 = vector.extract_strided_slice %29 {offsets = [32, 0], sizes = [1, 512], strides = [1, 1]} : vector<49x512xf32> to vector<1x512xf32>
    %c489_i32 = arith.constant 489 : i32
    %94 = tpu.dynamic_rotate %93 by %c489_i32 dim 1 : vector<1x512xf32>, i32 -> vector<1x512xf32>
    %95 = vector.extract_strided_slice %29 {offsets = [33, 0], sizes = [1, 512], strides = [1, 1]} : vector<49x512xf32> to vector<1x512xf32>
    %c488_i32 = arith.constant 488 : i32
    %96 = tpu.dynamic_rotate %95 by %c488_i32 dim 1 : vector<1x512xf32>, i32 -> vector<1x512xf32>
    %97 = vector.extract_strided_slice %29 {offsets = [34, 0], sizes = [1, 512], strides = [1, 1]} : vector<49x512xf32> to vector<1x512xf32>
    %c487_i32 = arith.constant 487 : i32
    %98 = tpu.dynamic_rotate %97 by %c487_i32 dim 1 : vector<1x512xf32>, i32 -> vector<1x512xf32>
    %99 = vector.extract_strided_slice %29 {offsets = [35, 0], sizes = [1, 512], strides = [1, 1]} : vector<49x512xf32> to vector<1x512xf32>
    %c471_i32 = arith.constant 471 : i32
    %100 = tpu.dynamic_rotate %99 by %c471_i32 dim 1 : vector<1x512xf32>, i32 -> vector<1x512xf32>
    %101 = vector.extract_strided_slice %29 {offsets = [36, 0], sizes = [1, 512], strides = [1, 1]} : vector<49x512xf32> to vector<1x512xf32>
    %c470_i32 = arith.constant 470 : i32
    %102 = tpu.dynamic_rotate %101 by %c470_i32 dim 1 : vector<1x512xf32>, i32 -> vector<1x512xf32>
    %103 = vector.extract_strided_slice %29 {offsets = [37, 0], sizes = [1, 512], strides = [1, 1]} : vector<49x512xf32> to vector<1x512xf32>
    %c469_i32 = arith.constant 469 : i32
    %104 = tpu.dynamic_rotate %103 by %c469_i32 dim 1 : vector<1x512xf32>, i32 -> vector<1x512xf32>
    %105 = vector.extract_strided_slice %29 {offsets = [38, 0], sizes = [1, 512], strides = [1, 1]} : vector<49x512xf32> to vector<1x512xf32>
    %c468_i32 = arith.constant 468 : i32
    %106 = tpu.dynamic_rotate %105 by %c468_i32 dim 1 : vector<1x512xf32>, i32 -> vector<1x512xf32>
    %107 = vector.extract_strided_slice %29 {offsets = [39, 0], sizes = [1, 512], strides = [1, 1]} : vector<49x512xf32> to vector<1x512xf32>
    %c467_i32 = arith.constant 467 : i32
    %108 = tpu.dynamic_rotate %107 by %c467_i32 dim 1 : vector<1x512xf32>, i32 -> vector<1x512xf32>
    %109 = vector.extract_strided_slice %29 {offsets = [40, 0], sizes = [1, 512], strides = [1, 1]} : vector<49x512xf32> to vector<1x512xf32>
    %c466_i32 = arith.constant 466 : i32
    %110 = tpu.dynamic_rotate %109 by %c466_i32 dim 1 : vector<1x512xf32>, i32 -> vector<1x512xf32>
    %111 = vector.extract_strided_slice %29 {offsets = [41, 0], sizes = [1, 512], strides = [1, 1]} : vector<49x512xf32> to vector<1x512xf32>
    %c465_i32 = arith.constant 465 : i32
    %112 = tpu.dynamic_rotate %111 by %c465_i32 dim 1 : vector<1x512xf32>, i32 -> vector<1x512xf32>
    %113 = vector.extract_strided_slice %29 {offsets = [42, 0], sizes = [1, 512], strides = [1, 1]} : vector<49x512xf32> to vector<1x512xf32>
    %c449_i32 = arith.constant 449 : i32
    %114 = tpu.dynamic_rotate %113 by %c449_i32 dim 1 : vector<1x512xf32>, i32 -> vector<1x512xf32>
    %115 = vector.extract_strided_slice %29 {offsets = [43, 0], sizes = [1, 512], strides = [1, 1]} : vector<49x512xf32> to vector<1x512xf32>
    %c448_i32 = arith.constant 448 : i32
    %116 = tpu.dynamic_rotate %115 by %c448_i32 dim 1 : vector<1x512xf32>, i32 -> vector<1x512xf32>
    %117 = vector.extract_strided_slice %29 {offsets = [44, 0], sizes = [1, 512], strides = [1, 1]} : vector<49x512xf32> to vector<1x512xf32>
    %c447_i32 = arith.constant 447 : i32
    %118 = tpu.dynamic_rotate %117 by %c447_i32 dim 1 : vector<1x512xf32>, i32 -> vector<1x512xf32>
    %119 = vector.extract_strided_slice %29 {offsets = [45, 0], sizes = [1, 512], strides = [1, 1]} : vector<49x512xf32> to vector<1x512xf32>
    %c446_i32 = arith.constant 446 : i32
    %120 = tpu.dynamic_rotate %119 by %c446_i32 dim 1 : vector<1x512xf32>, i32 -> vector<1x512xf32>
    %121 = vector.extract_strided_slice %29 {offsets = [46, 0], sizes = [1, 512], strides = [1, 1]} : vector<49x512xf32> to vector<1x512xf32>
    %c445_i32 = arith.constant 445 : i32
    %122 = tpu.dynamic_rotate %121 by %c445_i32 dim 1 : vector<1x512xf32>, i32 -> vector<1x512xf32>
    %123 = vector.extract_strided_slice %29 {offsets = [47, 0], sizes = [1, 512], strides = [1, 1]} : vector<49x512xf32> to vector<1x512xf32>
    %c444_i32 = arith.constant 444 : i32
    %124 = tpu.dynamic_rotate %123 by %c444_i32 dim 1 : vector<1x512xf32>, i32 -> vector<1x512xf32>
    %125 = vector.extract_strided_slice %29 {offsets = [48, 0], sizes = [1, 512], strides = [1, 1]} : vector<49x512xf32> to vector<1x512xf32>
    %c443_i32 = arith.constant 443 : i32
    %126 = tpu.dynamic_rotate %125 by %c443_i32 dim 1 : vector<1x512xf32>, i32 -> vector<1x512xf32>
    %127 = arith.addf %31, %33 : vector<1x512xf32>
    %128 = arith.addf %35, %37 : vector<1x512xf32>
    %129 = arith.addf %39, %41 : vector<1x512xf32>
    %130 = arith.addf %43, %45 : vector<1x512xf32>
    %131 = arith.addf %47, %49 : vector<1x512xf32>
    %132 = arith.addf %51, %53 : vector<1x512xf32>
    %133 = arith.addf %55, %57 : vector<1x512xf32>
    %134 = arith.addf %59, %61 : vector<1x512xf32>
    %135 = arith.addf %63, %65 : vector<1x512xf32>
    %136 = arith.addf %67, %69 : vector<1x512xf32>
    %137 = arith.addf %71, %73 : vector<1x512xf32>
    %138 = arith.addf %75, %77 : vector<1x512xf32>
    %139 = arith.addf %78, %80 : vector<1x512xf32>
    %140 = arith.addf %82, %84 : vector<1x512xf32>
    %141 = arith.addf %86, %88 : vector<1x512xf32>
    %142 = arith.addf %90, %92 : vector<1x512xf32>
    %143 = arith.addf %94, %96 : vector<1x512xf32>
    %144 = arith.addf %98, %100 : vector<1x512xf32>
    %145 = arith.addf %102, %104 : vector<1x512xf32>
    %146 = arith.addf %106, %108 : vector<1x512xf32>
    %147 = arith.addf %110, %112 : vector<1x512xf32>
    %148 = arith.addf %114, %116 : vector<1x512xf32>
    %149 = arith.addf %118, %120 : vector<1x512xf32>
    %150 = arith.addf %122, %124 : vector<1x512xf32>
    %151 = arith.addf %127, %128 : vector<1x512xf32>
    %152 = arith.addf %129, %130 : vector<1x512xf32>
    %153 = arith.addf %131, %132 : vector<1x512xf32>
    %154 = arith.addf %133, %134 : vector<1x512xf32>
    %155 = arith.addf %135, %136 : vector<1x512xf32>
    %156 = arith.addf %137, %138 : vector<1x512xf32>
    %157 = arith.addf %139, %140 : vector<1x512xf32>
    %158 = arith.addf %141, %142 : vector<1x512xf32>
    %159 = arith.addf %143, %144 : vector<1x512xf32>
    %160 = arith.addf %145, %146 : vector<1x512xf32>
    %161 = arith.addf %147, %148 : vector<1x512xf32>
    %162 = arith.addf %149, %150 : vector<1x512xf32>
    %163 = arith.addf %151, %152 : vector<1x512xf32>
    %164 = arith.addf %153, %154 : vector<1x512xf32>
    %165 = arith.addf %155, %156 : vector<1x512xf32>
    %166 = arith.addf %157, %158 : vector<1x512xf32>
    %167 = arith.addf %159, %160 : vector<1x512xf32>
    %168 = arith.addf %161, %162 : vector<1x512xf32>
    %169 = arith.addf %163, %164 : vector<1x512xf32>
    %170 = arith.addf %165, %166 : vector<1x512xf32>
    %171 = arith.addf %167, %168 : vector<1x512xf32>
    %172 = arith.addf %169, %170 : vector<1x512xf32>
    %173 = arith.addf %171, %126 : vector<1x512xf32>
    %174 = arith.addf %172, %173 : vector<1x512xf32>
    %c0_23 = arith.constant 0 : index
    %c0_24 = arith.constant 0 : index
    %175 = vector.load %arg10[%c0_23, %c0_24] : memref<1x3xf32, #tpu.memory_space<vmem>>, vector<1x1xf32>
    %176 = vector.broadcast %175 : vector<1x1xf32> to vector<1x512xf32>
    %177 = arith.addf %174, %176 : vector<1x512xf32>
    %178 = arith.negf %177 : vector<1x512xf32>
    %179 = math.exp %178 : vector<1x512xf32>
    %cst_25 = arith.constant 1.000000e+00 : f32
    %180 = vector.broadcast %cst_25 : f32 to vector<1x512xf32>
    %181 = arith.addf %180, %179 : vector<1x512xf32>
    %182 = arith.divf %180, %181 : vector<1x512xf32>
    %183 = vector.broadcast %182 : vector<1x512xf32> to vector<16x512xf32>
    %184 = arith.mulf %26, %183 : vector<16x512xf32>
    %c0_26 = arith.constant 0 : index
    %c0_27 = arith.constant 0 : index
    %c0_28 = arith.constant 0 : index
    %185 = vector.load %arg9[%c0_26, %c0_27, %c0_28] : memref<3x16x16xf32, #tpu.memory_space<vmem>>, vector<1x16x16xf32>
    %186 = vector.shape_cast %185 : vector<1x16x16xf32> to vector<16x16xf32>
    %cst_29 = arith.constant dense<0.000000e+00> : vector<16x512xf32>
    %187 = tpu.matmul %186, %184, %cst_29 {dimension_numbers = #tpu.dot_dimension_numbers<[1], [0], [0], [1], [0, 0, 1, 1], [], []>} : vector<16x16xf32>, vector<16x512xf32>, vector<16x512xf32> -> vector<16x512xf32>
    %c0_30 = arith.constant 0 : index
    %c0_31 = arith.constant 0 : index
    %c0_32 = arith.constant 0 : index
    %188 = vector.load %arg11[%c0_30, %c0_31, %c0_32] : memref<1x16x512xf32, #tpu.memory_space<vmem>>, vector<1x16x512xf32>
    %189 = vector.shape_cast %188 : vector<1x16x512xf32> to vector<16x512xf32>
    %190 = vector.shape_cast %187 : vector<16x512xf32> to vector<1x16x512xf32>
    tpu.vector_store %arg11[%c0_30, %c0_31, %c0_32], %190 {strides = array<i32>} : memref<1x16x512xf32, #tpu.memory_space<vmem>>, vector<1x16x512xf32>,
    %c0_33 = arith.constant 0 : index
    %c0_34 = arith.constant 0 : index
    %c0_35 = arith.constant 0 : index
    %191 = vector.load %arg2[%c0_33, %c0_34, %c0_35] : memref<1x16x256xf32, #tpu.memory_space<vmem>>, vector<1x16x256xf32>
    %192 = vector.shape_cast %191 : vector<1x16x256xf32> to vector<16x256xf32>
    %cst_36 = arith.constant dense<0.000000e+00> : vector<16xf32>
    %193 = vector.multi_reduction <add>, %192, %cst_36 [1] : vector<16x256xf32> to vector<16xf32>
    %194 = vector.shape_cast %193 : vector<16xf32> to vector<16x1xf32>
    %cst_37 = arith.constant 1.562500e-02 : f32
    %195 = vector.broadcast %cst_37 : f32 to vector<16x1xf32>
    %196 = arith.mulf %194, %195 : vector<16x1xf32>
    %c1 = arith.constant 1 : index
    %c0_38 = arith.constant 0 : index
    %c0_39 = arith.constant 0 : index
    %197 = vector.load %arg4[%c1, %c0_38, %c0_39] : memref<3x2x16xf32, #tpu.memory_space<vmem>>, vector<1x2x16xf32>
    %198 = vector.shape_cast %197 : vector<1x2x16xf32> to vector<2x16xf32>
    %cst_40 = arith.constant dense<0.000000e+00> : vector<2x1xf32>
    %199 = tpu.matmul %198, %196, %cst_40 {dimension_numbers = #tpu.dot_dimension_numbers<[1], [0], [0], [1], [0, 0, 1, 1], [], []>} : vector<2x16xf32>, vector<16x1xf32>, vector<2x1xf32> -> vector<2x1xf32>
    %c1_41 = arith.constant 1 : index
    %c0_42 = arith.constant 0 : index
    %c0_43 = arith.constant 0 : index
    %200 = vector.load %arg5[%c1_41, %c0_42, %c0_43] : memref<3x2x1xf32, #tpu.memory_space<vmem>>, vector<1x2x1xf32>
    %201 = vector.shape_cast %200 : vector<1x2x1xf32> to vector<2x1xf32>
    %202 = arith.addf %199, %201 : vector<2x1xf32>
    %cst_44 = arith.constant 0.000000e+00 : f32
    %203 = vector.broadcast %cst_44 : f32 to vector<2x1xf32>
    %204 = arith.maximumf %202, %203 : vector<2x1xf32>
    %c1_45 = arith.constant 1 : index
    %c0_46 = arith.constant 0 : index
    %c0_47 = arith.constant 0 : index
    %205 = vector.load %arg6[%c1_45, %c0_46, %c0_47] : memref<3x16x2xf32, #tpu.memory_space<vmem>>, vector<1x16x2xf32>
    %206 = vector.shape_cast %205 : vector<1x16x2xf32> to vector<16x2xf32>
    %cst_48 = arith.constant dense<0.000000e+00> : vector<16x1xf32>
    %207 = tpu.matmul %206, %204, %cst_48 {dimension_numbers = #tpu.dot_dimension_numbers<[1], [0], [0], [1], [0, 0, 1, 1], [], []>} : vector<16x2xf32>, vector<2x1xf32>, vector<16x1xf32> -> vector<16x1xf32>
    %c1_49 = arith.constant 1 : index
    %c0_50 = arith.constant 0 : index
    %c0_51 = arith.constant 0 : index
    %208 = vector.load %arg7[%c1_49, %c0_50, %c0_51] : memref<3x16x1xf32, #tpu.memory_space<vmem>>, vector<1x16x1xf32>
    %209 = vector.shape_cast %208 : vector<1x16x1xf32> to vector<16x1xf32>
    %210 = arith.addf %207, %209 : vector<16x1xf32>
    %211 = arith.negf %210 : vector<16x1xf32>
    %212 = math.exp %211 : vector<16x1xf32>
    %cst_52 = arith.constant 1.000000e+00 : f32
    %213 = vector.broadcast %cst_52 : f32 to vector<16x1xf32>
    %214 = arith.addf %213, %212 : vector<16x1xf32>
    %215 = arith.divf %213, %214 : vector<16x1xf32>
    %216 = vector.broadcast %215 : vector<16x1xf32> to vector<16x256xf32>
    %217 = arith.mulf %192, %216 : vector<16x256xf32>
    %c1_53 = arith.constant 1 : index
    %c0_54 = arith.constant 0 : index
    %c0_55 = arith.constant 0 : index
    %218 = vector.load %arg8[%c1_53, %c0_54, %c0_55] : memref<3x49x16xf32, #tpu.memory_space<vmem>>, vector<1x49x16xf32>
    %219 = vector.shape_cast %218 : vector<1x49x16xf32> to vector<49x16xf32>
    %cst_56 = arith.constant dense<0.000000e+00> : vector<49x256xf32>
    %220 = tpu.matmul %219, %217, %cst_56 {dimension_numbers = #tpu.dot_dimension_numbers<[1], [0], [0], [1], [0, 0, 1, 1], [], []>} : vector<49x16xf32>, vector<16x256xf32>, vector<49x256xf32> -> vector<49x256xf32>
    %221 = vector.extract_strided_slice %220 {offsets = [0, 0], sizes = [1, 256], strides = [1, 1]} : vector<49x256xf32> to vector<1x256xf32>
    %c45_i32_57 = arith.constant 45 : i32
    %222 = tpu.dynamic_rotate %221 by %c45_i32_57 dim 1 : vector<1x256xf32>, i32 -> vector<1x256xf32>
    %223 = vector.extract_strided_slice %220 {offsets = [1, 0], sizes = [1, 256], strides = [1, 1]} : vector<49x256xf32> to vector<1x256xf32>
    %c44_i32_58 = arith.constant 44 : i32
    %224 = tpu.dynamic_rotate %223 by %c44_i32_58 dim 1 : vector<1x256xf32>, i32 -> vector<1x256xf32>
    %225 = vector.extract_strided_slice %220 {offsets = [2, 0], sizes = [1, 256], strides = [1, 1]} : vector<49x256xf32> to vector<1x256xf32>
    %c43_i32_59 = arith.constant 43 : i32
    %226 = tpu.dynamic_rotate %225 by %c43_i32_59 dim 1 : vector<1x256xf32>, i32 -> vector<1x256xf32>
    %227 = vector.extract_strided_slice %220 {offsets = [3, 0], sizes = [1, 256], strides = [1, 1]} : vector<49x256xf32> to vector<1x256xf32>
    %c42_i32_60 = arith.constant 42 : i32
    %228 = tpu.dynamic_rotate %227 by %c42_i32_60 dim 1 : vector<1x256xf32>, i32 -> vector<1x256xf32>
    %229 = vector.extract_strided_slice %220 {offsets = [4, 0], sizes = [1, 256], strides = [1, 1]} : vector<49x256xf32> to vector<1x256xf32>
    %c41_i32_61 = arith.constant 41 : i32
    %230 = tpu.dynamic_rotate %229 by %c41_i32_61 dim 1 : vector<1x256xf32>, i32 -> vector<1x256xf32>
    %231 = vector.extract_strided_slice %220 {offsets = [5, 0], sizes = [1, 256], strides = [1, 1]} : vector<49x256xf32> to vector<1x256xf32>
    %c40_i32 = arith.constant 40 : i32
    %232 = tpu.dynamic_rotate %231 by %c40_i32 dim 1 : vector<1x256xf32>, i32 -> vector<1x256xf32>
    %233 = vector.extract_strided_slice %220 {offsets = [6, 0], sizes = [1, 256], strides = [1, 1]} : vector<49x256xf32> to vector<1x256xf32>
    %c39_i32 = arith.constant 39 : i32
    %234 = tpu.dynamic_rotate %233 by %c39_i32 dim 1 : vector<1x256xf32>, i32 -> vector<1x256xf32>
    %235 = vector.extract_strided_slice %220 {offsets = [7, 0], sizes = [1, 256], strides = [1, 1]} : vector<49x256xf32> to vector<1x256xf32>
    %c31_i32 = arith.constant 31 : i32
    %236 = tpu.dynamic_rotate %235 by %c31_i32 dim 1 : vector<1x256xf32>, i32 -> vector<1x256xf32>
    %237 = vector.extract_strided_slice %220 {offsets = [8, 0], sizes = [1, 256], strides = [1, 1]} : vector<49x256xf32> to vector<1x256xf32>
    %c30_i32 = arith.constant 30 : i32
    %238 = tpu.dynamic_rotate %237 by %c30_i32 dim 1 : vector<1x256xf32>, i32 -> vector<1x256xf32>
    %239 = vector.extract_strided_slice %220 {offsets = [9, 0], sizes = [1, 256], strides = [1, 1]} : vector<49x256xf32> to vector<1x256xf32>
    %c29_i32 = arith.constant 29 : i32
    %240 = tpu.dynamic_rotate %239 by %c29_i32 dim 1 : vector<1x256xf32>, i32 -> vector<1x256xf32>
    %241 = vector.extract_strided_slice %220 {offsets = [10, 0], sizes = [1, 256], strides = [1, 1]} : vector<49x256xf32> to vector<1x256xf32>
    %c28_i32 = arith.constant 28 : i32
    %242 = tpu.dynamic_rotate %241 by %c28_i32 dim 1 : vector<1x256xf32>, i32 -> vector<1x256xf32>
    %243 = vector.extract_strided_slice %220 {offsets = [11, 0], sizes = [1, 256], strides = [1, 1]} : vector<49x256xf32> to vector<1x256xf32>
    %c27_i32 = arith.constant 27 : i32
    %244 = tpu.dynamic_rotate %243 by %c27_i32 dim 1 : vector<1x256xf32>, i32 -> vector<1x256xf32>
    %245 = vector.extract_strided_slice %220 {offsets = [12, 0], sizes = [1, 256], strides = [1, 1]} : vector<49x256xf32> to vector<1x256xf32>
    %c26_i32 = arith.constant 26 : i32
    %246 = tpu.dynamic_rotate %245 by %c26_i32 dim 1 : vector<1x256xf32>, i32 -> vector<1x256xf32>
    %247 = vector.extract_strided_slice %220 {offsets = [13, 0], sizes = [1, 256], strides = [1, 1]} : vector<49x256xf32> to vector<1x256xf32>
    %c25_i32_62 = arith.constant 25 : i32
    %248 = tpu.dynamic_rotate %247 by %c25_i32_62 dim 1 : vector<1x256xf32>, i32 -> vector<1x256xf32>
    %249 = vector.extract_strided_slice %220 {offsets = [14, 0], sizes = [1, 256], strides = [1, 1]} : vector<49x256xf32> to vector<1x256xf32>
    %c17_i32 = arith.constant 17 : i32
    %250 = tpu.dynamic_rotate %249 by %c17_i32 dim 1 : vector<1x256xf32>, i32 -> vector<1x256xf32>
    %251 = vector.extract_strided_slice %220 {offsets = [15, 0], sizes = [1, 256], strides = [1, 1]} : vector<49x256xf32> to vector<1x256xf32>
    %c16_i32 = arith.constant 16 : i32
    %252 = tpu.dynamic_rotate %251 by %c16_i32 dim 1 : vector<1x256xf32>, i32 -> vector<1x256xf32>
    %253 = vector.extract_strided_slice %220 {offsets = [16, 0], sizes = [1, 256], strides = [1, 1]} : vector<49x256xf32> to vector<1x256xf32>
    %c15_i32 = arith.constant 15 : i32
    %254 = tpu.dynamic_rotate %253 by %c15_i32 dim 1 : vector<1x256xf32>, i32 -> vector<1x256xf32>
    %255 = vector.extract_strided_slice %220 {offsets = [17, 0], sizes = [1, 256], strides = [1, 1]} : vector<49x256xf32> to vector<1x256xf32>
    %c14_i32 = arith.constant 14 : i32
    %256 = tpu.dynamic_rotate %255 by %c14_i32 dim 1 : vector<1x256xf32>, i32 -> vector<1x256xf32>
    %257 = vector.extract_strided_slice %220 {offsets = [18, 0], sizes = [1, 256], strides = [1, 1]} : vector<49x256xf32> to vector<1x256xf32>
    %c13_i32 = arith.constant 13 : i32
    %258 = tpu.dynamic_rotate %257 by %c13_i32 dim 1 : vector<1x256xf32>, i32 -> vector<1x256xf32>
    %259 = vector.extract_strided_slice %220 {offsets = [19, 0], sizes = [1, 256], strides = [1, 1]} : vector<49x256xf32> to vector<1x256xf32>
    %c12_i32 = arith.constant 12 : i32
    %260 = tpu.dynamic_rotate %259 by %c12_i32 dim 1 : vector<1x256xf32>, i32 -> vector<1x256xf32>
    %261 = vector.extract_strided_slice %220 {offsets = [20, 0], sizes = [1, 256], strides = [1, 1]} : vector<49x256xf32> to vector<1x256xf32>
    %c11_i32 = arith.constant 11 : i32
    %262 = tpu.dynamic_rotate %261 by %c11_i32 dim 1 : vector<1x256xf32>, i32 -> vector<1x256xf32>
    %263 = vector.extract_strided_slice %220 {offsets = [21, 0], sizes = [1, 256], strides = [1, 1]} : vector<49x256xf32> to vector<1x256xf32>
    %c3_i32_63 = arith.constant 3 : i32
    %264 = tpu.dynamic_rotate %263 by %c3_i32_63 dim 1 : vector<1x256xf32>, i32 -> vector<1x256xf32>
    %265 = vector.extract_strided_slice %220 {offsets = [22, 0], sizes = [1, 256], strides = [1, 1]} : vector<49x256xf32> to vector<1x256xf32>
    %c2_i32_64 = arith.constant 2 : i32
    %266 = tpu.dynamic_rotate %265 by %c2_i32_64 dim 1 : vector<1x256xf32>, i32 -> vector<1x256xf32>
    %267 = vector.extract_strided_slice %220 {offsets = [23, 0], sizes = [1, 256], strides = [1, 1]} : vector<49x256xf32> to vector<1x256xf32>
    %c1_i32_65 = arith.constant 1 : i32
    %268 = tpu.dynamic_rotate %267 by %c1_i32_65 dim 1 : vector<1x256xf32>, i32 -> vector<1x256xf32>
    %269 = vector.extract_strided_slice %220 {offsets = [24, 0], sizes = [1, 256], strides = [1, 1]} : vector<49x256xf32> to vector<1x256xf32>
    %270 = vector.extract_strided_slice %220 {offsets = [25, 0], sizes = [1, 256], strides = [1, 1]} : vector<49x256xf32> to vector<1x256xf32>
    %c255_i32 = arith.constant 255 : i32
    %271 = tpu.dynamic_rotate %270 by %c255_i32 dim 1 : vector<1x256xf32>, i32 -> vector<1x256xf32>
    %272 = vector.extract_strided_slice %220 {offsets = [26, 0], sizes = [1, 256], strides = [1, 1]} : vector<49x256xf32> to vector<1x256xf32>
    %c254_i32 = arith.constant 254 : i32
    %273 = tpu.dynamic_rotate %272 by %c254_i32 dim 1 : vector<1x256xf32>, i32 -> vector<1x256xf32>
    %274 = vector.extract_strided_slice %220 {offsets = [27, 0], sizes = [1, 256], strides = [1, 1]} : vector<49x256xf32> to vector<1x256xf32>
    %c253_i32 = arith.constant 253 : i32
    %275 = tpu.dynamic_rotate %274 by %c253_i32 dim 1 : vector<1x256xf32>, i32 -> vector<1x256xf32>
    %276 = vector.extract_strided_slice %220 {offsets = [28, 0], sizes = [1, 256], strides = [1, 1]} : vector<49x256xf32> to vector<1x256xf32>
    %c245_i32 = arith.constant 245 : i32
    %277 = tpu.dynamic_rotate %276 by %c245_i32 dim 1 : vector<1x256xf32>, i32 -> vector<1x256xf32>
    %278 = vector.extract_strided_slice %220 {offsets = [29, 0], sizes = [1, 256], strides = [1, 1]} : vector<49x256xf32> to vector<1x256xf32>
    %c244_i32 = arith.constant 244 : i32
    %279 = tpu.dynamic_rotate %278 by %c244_i32 dim 1 : vector<1x256xf32>, i32 -> vector<1x256xf32>
    %280 = vector.extract_strided_slice %220 {offsets = [30, 0], sizes = [1, 256], strides = [1, 1]} : vector<49x256xf32> to vector<1x256xf32>
    %c243_i32 = arith.constant 243 : i32
    %281 = tpu.dynamic_rotate %280 by %c243_i32 dim 1 : vector<1x256xf32>, i32 -> vector<1x256xf32>
    %282 = vector.extract_strided_slice %220 {offsets = [31, 0], sizes = [1, 256], strides = [1, 1]} : vector<49x256xf32> to vector<1x256xf32>
    %c242_i32 = arith.constant 242 : i32
    %283 = tpu.dynamic_rotate %282 by %c242_i32 dim 1 : vector<1x256xf32>, i32 -> vector<1x256xf32>
    %284 = vector.extract_strided_slice %220 {offsets = [32, 0], sizes = [1, 256], strides = [1, 1]} : vector<49x256xf32> to vector<1x256xf32>
    %c241_i32 = arith.constant 241 : i32
    %285 = tpu.dynamic_rotate %284 by %c241_i32 dim 1 : vector<1x256xf32>, i32 -> vector<1x256xf32>
    %286 = vector.extract_strided_slice %220 {offsets = [33, 0], sizes = [1, 256], strides = [1, 1]} : vector<49x256xf32> to vector<1x256xf32>
    %c240_i32 = arith.constant 240 : i32
    %287 = tpu.dynamic_rotate %286 by %c240_i32 dim 1 : vector<1x256xf32>, i32 -> vector<1x256xf32>
    %288 = vector.extract_strided_slice %220 {offsets = [34, 0], sizes = [1, 256], strides = [1, 1]} : vector<49x256xf32> to vector<1x256xf32>
    %c239_i32 = arith.constant 239 : i32
    %289 = tpu.dynamic_rotate %288 by %c239_i32 dim 1 : vector<1x256xf32>, i32 -> vector<1x256xf32>
    %290 = vector.extract_strided_slice %220 {offsets = [35, 0], sizes = [1, 256], strides = [1, 1]} : vector<49x256xf32> to vector<1x256xf32>
    %c231_i32 = arith.constant 231 : i32
    %291 = tpu.dynamic_rotate %290 by %c231_i32 dim 1 : vector<1x256xf32>, i32 -> vector<1x256xf32>
    %292 = vector.extract_strided_slice %220 {offsets = [36, 0], sizes = [1, 256], strides = [1, 1]} : vector<49x256xf32> to vector<1x256xf32>
    %c230_i32 = arith.constant 230 : i32
    %293 = tpu.dynamic_rotate %292 by %c230_i32 dim 1 : vector<1x256xf32>, i32 -> vector<1x256xf32>
    %294 = vector.extract_strided_slice %220 {offsets = [37, 0], sizes = [1, 256], strides = [1, 1]} : vector<49x256xf32> to vector<1x256xf32>
    %c229_i32 = arith.constant 229 : i32
    %295 = tpu.dynamic_rotate %294 by %c229_i32 dim 1 : vector<1x256xf32>, i32 -> vector<1x256xf32>
    %296 = vector.extract_strided_slice %220 {offsets = [38, 0], sizes = [1, 256], strides = [1, 1]} : vector<49x256xf32> to vector<1x256xf32>
    %c228_i32 = arith.constant 228 : i32
    %297 = tpu.dynamic_rotate %296 by %c228_i32 dim 1 : vector<1x256xf32>, i32 -> vector<1x256xf32>
    %298 = vector.extract_strided_slice %220 {offsets = [39, 0], sizes = [1, 256], strides = [1, 1]} : vector<49x256xf32> to vector<1x256xf32>
    %c227_i32 = arith.constant 227 : i32
    %299 = tpu.dynamic_rotate %298 by %c227_i32 dim 1 : vector<1x256xf32>, i32 -> vector<1x256xf32>
    %300 = vector.extract_strided_slice %220 {offsets = [40, 0], sizes = [1, 256], strides = [1, 1]} : vector<49x256xf32> to vector<1x256xf32>
    %c226_i32 = arith.constant 226 : i32
    %301 = tpu.dynamic_rotate %300 by %c226_i32 dim 1 : vector<1x256xf32>, i32 -> vector<1x256xf32>
    %302 = vector.extract_strided_slice %220 {offsets = [41, 0], sizes = [1, 256], strides = [1, 1]} : vector<49x256xf32> to vector<1x256xf32>
    %c225_i32 = arith.constant 225 : i32
    %303 = tpu.dynamic_rotate %302 by %c225_i32 dim 1 : vector<1x256xf32>, i32 -> vector<1x256xf32>
    %304 = vector.extract_strided_slice %220 {offsets = [42, 0], sizes = [1, 256], strides = [1, 1]} : vector<49x256xf32> to vector<1x256xf32>
    %c217_i32 = arith.constant 217 : i32
    %305 = tpu.dynamic_rotate %304 by %c217_i32 dim 1 : vector<1x256xf32>, i32 -> vector<1x256xf32>
    %306 = vector.extract_strided_slice %220 {offsets = [43, 0], sizes = [1, 256], strides = [1, 1]} : vector<49x256xf32> to vector<1x256xf32>
    %c216_i32 = arith.constant 216 : i32
    %307 = tpu.dynamic_rotate %306 by %c216_i32 dim 1 : vector<1x256xf32>, i32 -> vector<1x256xf32>
    %308 = vector.extract_strided_slice %220 {offsets = [44, 0], sizes = [1, 256], strides = [1, 1]} : vector<49x256xf32> to vector<1x256xf32>
    %c215_i32 = arith.constant 215 : i32
    %309 = tpu.dynamic_rotate %308 by %c215_i32 dim 1 : vector<1x256xf32>, i32 -> vector<1x256xf32>
    %310 = vector.extract_strided_slice %220 {offsets = [45, 0], sizes = [1, 256], strides = [1, 1]} : vector<49x256xf32> to vector<1x256xf32>
    %c214_i32 = arith.constant 214 : i32
    %311 = tpu.dynamic_rotate %310 by %c214_i32 dim 1 : vector<1x256xf32>, i32 -> vector<1x256xf32>
    %312 = vector.extract_strided_slice %220 {offsets = [46, 0], sizes = [1, 256], strides = [1, 1]} : vector<49x256xf32> to vector<1x256xf32>
    %c213_i32 = arith.constant 213 : i32
    %313 = tpu.dynamic_rotate %312 by %c213_i32 dim 1 : vector<1x256xf32>, i32 -> vector<1x256xf32>
    %314 = vector.extract_strided_slice %220 {offsets = [47, 0], sizes = [1, 256], strides = [1, 1]} : vector<49x256xf32> to vector<1x256xf32>
    %c212_i32 = arith.constant 212 : i32
    %315 = tpu.dynamic_rotate %314 by %c212_i32 dim 1 : vector<1x256xf32>, i32 -> vector<1x256xf32>
    %316 = vector.extract_strided_slice %220 {offsets = [48, 0], sizes = [1, 256], strides = [1, 1]} : vector<49x256xf32> to vector<1x256xf32>
    %c211_i32 = arith.constant 211 : i32
    %317 = tpu.dynamic_rotate %316 by %c211_i32 dim 1 : vector<1x256xf32>, i32 -> vector<1x256xf32>
    %318 = arith.addf %222, %224 : vector<1x256xf32>
    %319 = arith.addf %226, %228 : vector<1x256xf32>
    %320 = arith.addf %230, %232 : vector<1x256xf32>
    %321 = arith.addf %234, %236 : vector<1x256xf32>
    %322 = arith.addf %238, %240 : vector<1x256xf32>
    %323 = arith.addf %242, %244 : vector<1x256xf32>
    %324 = arith.addf %246, %248 : vector<1x256xf32>
    %325 = arith.addf %250, %252 : vector<1x256xf32>
    %326 = arith.addf %254, %256 : vector<1x256xf32>
    %327 = arith.addf %258, %260 : vector<1x256xf32>
    %328 = arith.addf %262, %264 : vector<1x256xf32>
    %329 = arith.addf %266, %268 : vector<1x256xf32>
    %330 = arith.addf %269, %271 : vector<1x256xf32>
    %331 = arith.addf %273, %275 : vector<1x256xf32>
    %332 = arith.addf %277, %279 : vector<1x256xf32>
    %333 = arith.addf %281, %283 : vector<1x256xf32>
    %334 = arith.addf %285, %287 : vector<1x256xf32>
    %335 = arith.addf %289, %291 : vector<1x256xf32>
    %336 = arith.addf %293, %295 : vector<1x256xf32>
    %337 = arith.addf %297, %299 : vector<1x256xf32>
    %338 = arith.addf %301, %303 : vector<1x256xf32>
    %339 = arith.addf %305, %307 : vector<1x256xf32>
    %340 = arith.addf %309, %311 : vector<1x256xf32>
    %341 = arith.addf %313, %315 : vector<1x256xf32>
    %342 = arith.addf %318, %319 : vector<1x256xf32>
    %343 = arith.addf %320, %321 : vector<1x256xf32>
    %344 = arith.addf %322, %323 : vector<1x256xf32>
    %345 = arith.addf %324, %325 : vector<1x256xf32>
    %346 = arith.addf %326, %327 : vector<1x256xf32>
    %347 = arith.addf %328, %329 : vector<1x256xf32>
    %348 = arith.addf %330, %331 : vector<1x256xf32>
    %349 = arith.addf %332, %333 : vector<1x256xf32>
    %350 = arith.addf %334, %335 : vector<1x256xf32>
    %351 = arith.addf %336, %337 : vector<1x256xf32>
    %352 = arith.addf %338, %339 : vector<1x256xf32>
    %353 = arith.addf %340, %341 : vector<1x256xf32>
    %354 = arith.addf %342, %343 : vector<1x256xf32>
    %355 = arith.addf %344, %345 : vector<1x256xf32>
    %356 = arith.addf %346, %347 : vector<1x256xf32>
    %357 = arith.addf %348, %349 : vector<1x256xf32>
    %358 = arith.addf %350, %351 : vector<1x256xf32>
    %359 = arith.addf %352, %353 : vector<1x256xf32>
    %360 = arith.addf %354, %355 : vector<1x256xf32>
    %361 = arith.addf %356, %357 : vector<1x256xf32>
    %362 = arith.addf %358, %359 : vector<1x256xf32>
    %363 = arith.addf %360, %361 : vector<1x256xf32>
    %364 = arith.addf %362, %317 : vector<1x256xf32>
    %365 = arith.addf %363, %364 : vector<1x256xf32>
    %c0_66 = arith.constant 0 : index
    %c1_67 = arith.constant 1 : index
    %366 = vector.load %arg10[%c0_66, %c1_67] : memref<1x3xf32, #tpu.memory_space<vmem>>, vector<1x1xf32>
    %367 = vector.broadcast %366 : vector<1x1xf32> to vector<1x256xf32>
    %368 = arith.addf %365, %367 : vector<1x256xf32>
    %369 = arith.negf %368 : vector<1x256xf32>
    %370 = math.exp %369 : vector<1x256xf32>
    %cst_68 = arith.constant 1.000000e+00 : f32
    %371 = vector.broadcast %cst_68 : f32 to vector<1x256xf32>
    %372 = arith.addf %371, %370 : vector<1x256xf32>
    %373 = arith.divf %371, %372 : vector<1x256xf32>
    %374 = vector.broadcast %373 : vector<1x256xf32> to vector<16x256xf32>
    %375 = arith.mulf %217, %374 : vector<16x256xf32>
    %c1_69 = arith.constant 1 : index
    %c0_70 = arith.constant 0 : index
    %c0_71 = arith.constant 0 : index
    %376 = vector.load %arg9[%c1_69, %c0_70, %c0_71] : memref<3x16x16xf32, #tpu.memory_space<vmem>>, vector<1x16x16xf32>
    %377 = vector.shape_cast %376 : vector<1x16x16xf32> to vector<16x16xf32>
    %cst_72 = arith.constant dense<0.000000e+00> : vector<16x256xf32>
    %378 = tpu.matmul %377, %375, %cst_72 {dimension_numbers = #tpu.dot_dimension_numbers<[1], [0], [0], [1], [0, 0, 1, 1], [], []>} : vector<16x16xf32>, vector<16x256xf32>, vector<16x256xf32> -> vector<16x256xf32>
    %c0_73 = arith.constant 0 : index
    %c0_74 = arith.constant 0 : index
    %c0_75 = arith.constant 0 : index
    %379 = vector.load %arg12[%c0_73, %c0_74, %c0_75] : memref<1x16x256xf32, #tpu.memory_space<vmem>>, vector<1x16x256xf32>
    %380 = vector.shape_cast %379 : vector<1x16x256xf32> to vector<16x256xf32>
    %381 = vector.shape_cast %378 : vector<16x256xf32> to vector<1x16x256xf32>
    tpu.vector_store %arg12[%c0_73, %c0_74, %c0_75], %381 {strides = array<i32>} : memref<1x16x256xf32, #tpu.memory_space<vmem>>, vector<1x16x256xf32>,
    %c0_76 = arith.constant 0 : index
    %c0_77 = arith.constant 0 : index
    %c0_78 = arith.constant 0 : index
    %382 = vector.load %arg3[%c0_76, %c0_77, %c0_78] : memref<1x16x128xf32, #tpu.memory_space<vmem>>, vector<1x16x128xf32>
    %383 = vector.shape_cast %382 : vector<1x16x128xf32> to vector<16x128xf32>
    %cst_79 = arith.constant dense<0.000000e+00> : vector<16xf32>
    %384 = vector.multi_reduction <add>, %383, %cst_79 [1] : vector<16x128xf32> to vector<16xf32>
    %385 = vector.shape_cast %384 : vector<16xf32> to vector<16x1xf32>
    %cst_80 = arith.constant 6.250000e-02 : f32
    %386 = vector.broadcast %cst_80 : f32 to vector<16x1xf32>
    %387 = arith.mulf %385, %386 : vector<16x1xf32>
    %c2 = arith.constant 2 : index
    %c0_81 = arith.constant 0 : index
    %c0_82 = arith.constant 0 : index
    %388 = vector.load %arg4[%c2, %c0_81, %c0_82] : memref<3x2x16xf32, #tpu.memory_space<vmem>>, vector<1x2x16xf32>
    %389 = vector.shape_cast %388 : vector<1x2x16xf32> to vector<2x16xf32>
    %cst_83 = arith.constant dense<0.000000e+00> : vector<2x1xf32>
    %390 = tpu.matmul %389, %387, %cst_83 {dimension_numbers = #tpu.dot_dimension_numbers<[1], [0], [0], [1], [0, 0, 1, 1], [], []>} : vector<2x16xf32>, vector<16x1xf32>, vector<2x1xf32> -> vector<2x1xf32>
    %c2_84 = arith.constant 2 : index
    %c0_85 = arith.constant 0 : index
    %c0_86 = arith.constant 0 : index
    %391 = vector.load %arg5[%c2_84, %c0_85, %c0_86] : memref<3x2x1xf32, #tpu.memory_space<vmem>>, vector<1x2x1xf32>
    %392 = vector.shape_cast %391 : vector<1x2x1xf32> to vector<2x1xf32>
    %393 = arith.addf %390, %392 : vector<2x1xf32>
    %cst_87 = arith.constant 0.000000e+00 : f32
    %394 = vector.broadcast %cst_87 : f32 to vector<2x1xf32>
    %395 = arith.maximumf %393, %394 : vector<2x1xf32>
    %c2_88 = arith.constant 2 : index
    %c0_89 = arith.constant 0 : index
    %c0_90 = arith.constant 0 : index
    %396 = vector.load %arg6[%c2_88, %c0_89, %c0_90] : memref<3x16x2xf32, #tpu.memory_space<vmem>>, vector<1x16x2xf32>
    %397 = vector.shape_cast %396 : vector<1x16x2xf32> to vector<16x2xf32>
    %cst_91 = arith.constant dense<0.000000e+00> : vector<16x1xf32>
    %398 = tpu.matmul %397, %395, %cst_91 {dimension_numbers = #tpu.dot_dimension_numbers<[1], [0], [0], [1], [0, 0, 1, 1], [], []>} : vector<16x2xf32>, vector<2x1xf32>, vector<16x1xf32> -> vector<16x1xf32>
    %c2_92 = arith.constant 2 : index
    %c0_93 = arith.constant 0 : index
    %c0_94 = arith.constant 0 : index
    %399 = vector.load %arg7[%c2_92, %c0_93, %c0_94] : memref<3x16x1xf32, #tpu.memory_space<vmem>>, vector<1x16x1xf32>
    %400 = vector.shape_cast %399 : vector<1x16x1xf32> to vector<16x1xf32>
    %401 = arith.addf %398, %400 : vector<16x1xf32>
    %402 = arith.negf %401 : vector<16x1xf32>
    %403 = math.exp %402 : vector<16x1xf32>
    %cst_95 = arith.constant 1.000000e+00 : f32
    %404 = vector.broadcast %cst_95 : f32 to vector<16x1xf32>
    %405 = arith.addf %404, %403 : vector<16x1xf32>
    %406 = arith.divf %404, %405 : vector<16x1xf32>
    %407 = vector.broadcast %406 : vector<16x1xf32> to vector<16x128xf32>
    %408 = arith.mulf %383, %407 : vector<16x128xf32>
    %c2_96 = arith.constant 2 : index
    %c0_97 = arith.constant 0 : index
    %c0_98 = arith.constant 0 : index
    %409 = vector.load %arg8[%c2_96, %c0_97, %c0_98] : memref<3x49x16xf32, #tpu.memory_space<vmem>>, vector<1x49x16xf32>
    %410 = vector.shape_cast %409 : vector<1x49x16xf32> to vector<49x16xf32>
    %cst_99 = arith.constant dense<0.000000e+00> : vector<49x128xf32>
    %411 = tpu.matmul %410, %408, %cst_99 {dimension_numbers = #tpu.dot_dimension_numbers<[1], [0], [0], [1], [0, 0, 1, 1], [], []>} : vector<49x16xf32>, vector<16x128xf32>, vector<49x128xf32> -> vector<49x128xf32>
    %412 = vector.extract_strided_slice %411 {offsets = [0, 0], sizes = [1, 128], strides = [1, 1]} : vector<49x128xf32> to vector<1x128xf32>
    %c33_i32 = arith.constant 33 : i32
    %413 = tpu.dynamic_rotate %412 by %c33_i32 dim 1 : vector<1x128xf32>, i32 -> vector<1x128xf32>
    %414 = vector.extract_strided_slice %411 {offsets = [1, 0], sizes = [1, 128], strides = [1, 1]} : vector<49x128xf32> to vector<1x128xf32>
    %c32_i32 = arith.constant 32 : i32
    %415 = tpu.dynamic_rotate %414 by %c32_i32 dim 1 : vector<1x128xf32>, i32 -> vector<1x128xf32>
    %416 = vector.extract_strided_slice %411 {offsets = [2, 0], sizes = [1, 128], strides = [1, 1]} : vector<49x128xf32> to vector<1x128xf32>
    %c31_i32_100 = arith.constant 31 : i32
    %417 = tpu.dynamic_rotate %416 by %c31_i32_100 dim 1 : vector<1x128xf32>, i32 -> vector<1x128xf32>
    %418 = vector.extract_strided_slice %411 {offsets = [3, 0], sizes = [1, 128], strides = [1, 1]} : vector<49x128xf32> to vector<1x128xf32>
    %c30_i32_101 = arith.constant 30 : i32
    %419 = tpu.dynamic_rotate %418 by %c30_i32_101 dim 1 : vector<1x128xf32>, i32 -> vector<1x128xf32>
    %420 = vector.extract_strided_slice %411 {offsets = [4, 0], sizes = [1, 128], strides = [1, 1]} : vector<49x128xf32> to vector<1x128xf32>
    %c29_i32_102 = arith.constant 29 : i32
    %421 = tpu.dynamic_rotate %420 by %c29_i32_102 dim 1 : vector<1x128xf32>, i32 -> vector<1x128xf32>
    %422 = vector.extract_strided_slice %411 {offsets = [5, 0], sizes = [1, 128], strides = [1, 1]} : vector<49x128xf32> to vector<1x128xf32>
    %c28_i32_103 = arith.constant 28 : i32
    %423 = tpu.dynamic_rotate %422 by %c28_i32_103 dim 1 : vector<1x128xf32>, i32 -> vector<1x128xf32>
    %424 = vector.extract_strided_slice %411 {offsets = [6, 0], sizes = [1, 128], strides = [1, 1]} : vector<49x128xf32> to vector<1x128xf32>
    %c27_i32_104 = arith.constant 27 : i32
    %425 = tpu.dynamic_rotate %424 by %c27_i32_104 dim 1 : vector<1x128xf32>, i32 -> vector<1x128xf32>
    %426 = vector.extract_strided_slice %411 {offsets = [7, 0], sizes = [1, 128], strides = [1, 1]} : vector<49x128xf32> to vector<1x128xf32>
    %c23_i32_105 = arith.constant 23 : i32
    %427 = tpu.dynamic_rotate %426 by %c23_i32_105 dim 1 : vector<1x128xf32>, i32 -> vector<1x128xf32>
    %428 = vector.extract_strided_slice %411 {offsets = [8, 0], sizes = [1, 128], strides = [1, 1]} : vector<49x128xf32> to vector<1x128xf32>
    %c22_i32_106 = arith.constant 22 : i32
    %429 = tpu.dynamic_rotate %428 by %c22_i32_106 dim 1 : vector<1x128xf32>, i32 -> vector<1x128xf32>
    %430 = vector.extract_strided_slice %411 {offsets = [9, 0], sizes = [1, 128], strides = [1, 1]} : vector<49x128xf32> to vector<1x128xf32>
    %c21_i32_107 = arith.constant 21 : i32
    %431 = tpu.dynamic_rotate %430 by %c21_i32_107 dim 1 : vector<1x128xf32>, i32 -> vector<1x128xf32>
    %432 = vector.extract_strided_slice %411 {offsets = [10, 0], sizes = [1, 128], strides = [1, 1]} : vector<49x128xf32> to vector<1x128xf32>
    %c20_i32_108 = arith.constant 20 : i32
    %433 = tpu.dynamic_rotate %432 by %c20_i32_108 dim 1 : vector<1x128xf32>, i32 -> vector<1x128xf32>
    %434 = vector.extract_strided_slice %411 {offsets = [11, 0], sizes = [1, 128], strides = [1, 1]} : vector<49x128xf32> to vector<1x128xf32>
    %c19_i32_109 = arith.constant 19 : i32
    %435 = tpu.dynamic_rotate %434 by %c19_i32_109 dim 1 : vector<1x128xf32>, i32 -> vector<1x128xf32>
    %436 = vector.extract_strided_slice %411 {offsets = [12, 0], sizes = [1, 128], strides = [1, 1]} : vector<49x128xf32> to vector<1x128xf32>
    %c18_i32 = arith.constant 18 : i32
    %437 = tpu.dynamic_rotate %436 by %c18_i32 dim 1 : vector<1x128xf32>, i32 -> vector<1x128xf32>
    %438 = vector.extract_strided_slice %411 {offsets = [13, 0], sizes = [1, 128], strides = [1, 1]} : vector<49x128xf32> to vector<1x128xf32>
    %c17_i32_110 = arith.constant 17 : i32
    %439 = tpu.dynamic_rotate %438 by %c17_i32_110 dim 1 : vector<1x128xf32>, i32 -> vector<1x128xf32>
    %440 = vector.extract_strided_slice %411 {offsets = [14, 0], sizes = [1, 128], strides = [1, 1]} : vector<49x128xf32> to vector<1x128xf32>
    %c13_i32_111 = arith.constant 13 : i32
    %441 = tpu.dynamic_rotate %440 by %c13_i32_111 dim 1 : vector<1x128xf32>, i32 -> vector<1x128xf32>
    %442 = vector.extract_strided_slice %411 {offsets = [15, 0], sizes = [1, 128], strides = [1, 1]} : vector<49x128xf32> to vector<1x128xf32>
    %c12_i32_112 = arith.constant 12 : i32
    %443 = tpu.dynamic_rotate %442 by %c12_i32_112 dim 1 : vector<1x128xf32>, i32 -> vector<1x128xf32>
    %444 = vector.extract_strided_slice %411 {offsets = [16, 0], sizes = [1, 128], strides = [1, 1]} : vector<49x128xf32> to vector<1x128xf32>
    %c11_i32_113 = arith.constant 11 : i32
    %445 = tpu.dynamic_rotate %444 by %c11_i32_113 dim 1 : vector<1x128xf32>, i32 -> vector<1x128xf32>
    %446 = vector.extract_strided_slice %411 {offsets = [17, 0], sizes = [1, 128], strides = [1, 1]} : vector<49x128xf32> to vector<1x128xf32>
    %c10_i32 = arith.constant 10 : i32
    %447 = tpu.dynamic_rotate %446 by %c10_i32 dim 1 : vector<1x128xf32>, i32 -> vector<1x128xf32>
    %448 = vector.extract_strided_slice %411 {offsets = [18, 0], sizes = [1, 128], strides = [1, 1]} : vector<49x128xf32> to vector<1x128xf32>
    %c9_i32 = arith.constant 9 : i32
    %449 = tpu.dynamic_rotate %448 by %c9_i32 dim 1 : vector<1x128xf32>, i32 -> vector<1x128xf32>
    %450 = vector.extract_strided_slice %411 {offsets = [19, 0], sizes = [1, 128], strides = [1, 1]} : vector<49x128xf32> to vector<1x128xf32>
    %c8_i32 = arith.constant 8 : i32
    %451 = tpu.dynamic_rotate %450 by %c8_i32 dim 1 : vector<1x128xf32>, i32 -> vector<1x128xf32>
    %452 = vector.extract_strided_slice %411 {offsets = [20, 0], sizes = [1, 128], strides = [1, 1]} : vector<49x128xf32> to vector<1x128xf32>
    %c7_i32 = arith.constant 7 : i32
    %453 = tpu.dynamic_rotate %452 by %c7_i32 dim 1 : vector<1x128xf32>, i32 -> vector<1x128xf32>
    %454 = vector.extract_strided_slice %411 {offsets = [21, 0], sizes = [1, 128], strides = [1, 1]} : vector<49x128xf32> to vector<1x128xf32>
    %c3_i32_114 = arith.constant 3 : i32
    %455 = tpu.dynamic_rotate %454 by %c3_i32_114 dim 1 : vector<1x128xf32>, i32 -> vector<1x128xf32>
    %456 = vector.extract_strided_slice %411 {offsets = [22, 0], sizes = [1, 128], strides = [1, 1]} : vector<49x128xf32> to vector<1x128xf32>
    %c2_i32_115 = arith.constant 2 : i32
    %457 = tpu.dynamic_rotate %456 by %c2_i32_115 dim 1 : vector<1x128xf32>, i32 -> vector<1x128xf32>
    %458 = vector.extract_strided_slice %411 {offsets = [23, 0], sizes = [1, 128], strides = [1, 1]} : vector<49x128xf32> to vector<1x128xf32>
    %c1_i32_116 = arith.constant 1 : i32
    %459 = tpu.dynamic_rotate %458 by %c1_i32_116 dim 1 : vector<1x128xf32>, i32 -> vector<1x128xf32>
    %460 = vector.extract_strided_slice %411 {offsets = [24, 0], sizes = [1, 128], strides = [1, 1]} : vector<49x128xf32> to vector<1x128xf32>
    %461 = vector.extract_strided_slice %411 {offsets = [25, 0], sizes = [1, 128], strides = [1, 1]} : vector<49x128xf32> to vector<1x128xf32>
    %c127_i32 = arith.constant 127 : i32
    %462 = tpu.dynamic_rotate %461 by %c127_i32 dim 1 : vector<1x128xf32>, i32 -> vector<1x128xf32>
    %463 = vector.extract_strided_slice %411 {offsets = [26, 0], sizes = [1, 128], strides = [1, 1]} : vector<49x128xf32> to vector<1x128xf32>
    %c126_i32 = arith.constant 126 : i32
    %464 = tpu.dynamic_rotate %463 by %c126_i32 dim 1 : vector<1x128xf32>, i32 -> vector<1x128xf32>
    %465 = vector.extract_strided_slice %411 {offsets = [27, 0], sizes = [1, 128], strides = [1, 1]} : vector<49x128xf32> to vector<1x128xf32>
    %c125_i32 = arith.constant 125 : i32
    %466 = tpu.dynamic_rotate %465 by %c125_i32 dim 1 : vector<1x128xf32>, i32 -> vector<1x128xf32>
    %467 = vector.extract_strided_slice %411 {offsets = [28, 0], sizes = [1, 128], strides = [1, 1]} : vector<49x128xf32> to vector<1x128xf32>
    %c121_i32 = arith.constant 121 : i32
    %468 = tpu.dynamic_rotate %467 by %c121_i32 dim 1 : vector<1x128xf32>, i32 -> vector<1x128xf32>
    %469 = vector.extract_strided_slice %411 {offsets = [29, 0], sizes = [1, 128], strides = [1, 1]} : vector<49x128xf32> to vector<1x128xf32>
    %c120_i32 = arith.constant 120 : i32
    %470 = tpu.dynamic_rotate %469 by %c120_i32 dim 1 : vector<1x128xf32>, i32 -> vector<1x128xf32>
    %471 = vector.extract_strided_slice %411 {offsets = [30, 0], sizes = [1, 128], strides = [1, 1]} : vector<49x128xf32> to vector<1x128xf32>
    %c119_i32 = arith.constant 119 : i32
    %472 = tpu.dynamic_rotate %471 by %c119_i32 dim 1 : vector<1x128xf32>, i32 -> vector<1x128xf32>
    %473 = vector.extract_strided_slice %411 {offsets = [31, 0], sizes = [1, 128], strides = [1, 1]} : vector<49x128xf32> to vector<1x128xf32>
    %c118_i32 = arith.constant 118 : i32
    %474 = tpu.dynamic_rotate %473 by %c118_i32 dim 1 : vector<1x128xf32>, i32 -> vector<1x128xf32>
    %475 = vector.extract_strided_slice %411 {offsets = [32, 0], sizes = [1, 128], strides = [1, 1]} : vector<49x128xf32> to vector<1x128xf32>
    %c117_i32 = arith.constant 117 : i32
    %476 = tpu.dynamic_rotate %475 by %c117_i32 dim 1 : vector<1x128xf32>, i32 -> vector<1x128xf32>
    %477 = vector.extract_strided_slice %411 {offsets = [33, 0], sizes = [1, 128], strides = [1, 1]} : vector<49x128xf32> to vector<1x128xf32>
    %c116_i32 = arith.constant 116 : i32
    %478 = tpu.dynamic_rotate %477 by %c116_i32 dim 1 : vector<1x128xf32>, i32 -> vector<1x128xf32>
    %479 = vector.extract_strided_slice %411 {offsets = [34, 0], sizes = [1, 128], strides = [1, 1]} : vector<49x128xf32> to vector<1x128xf32>
    %c115_i32 = arith.constant 115 : i32
    %480 = tpu.dynamic_rotate %479 by %c115_i32 dim 1 : vector<1x128xf32>, i32 -> vector<1x128xf32>
    %481 = vector.extract_strided_slice %411 {offsets = [35, 0], sizes = [1, 128], strides = [1, 1]} : vector<49x128xf32> to vector<1x128xf32>
    %c111_i32 = arith.constant 111 : i32
    %482 = tpu.dynamic_rotate %481 by %c111_i32 dim 1 : vector<1x128xf32>, i32 -> vector<1x128xf32>
    %483 = vector.extract_strided_slice %411 {offsets = [36, 0], sizes = [1, 128], strides = [1, 1]} : vector<49x128xf32> to vector<1x128xf32>
    %c110_i32 = arith.constant 110 : i32
    %484 = tpu.dynamic_rotate %483 by %c110_i32 dim 1 : vector<1x128xf32>, i32 -> vector<1x128xf32>
    %485 = vector.extract_strided_slice %411 {offsets = [37, 0], sizes = [1, 128], strides = [1, 1]} : vector<49x128xf32> to vector<1x128xf32>
    %c109_i32 = arith.constant 109 : i32
    %486 = tpu.dynamic_rotate %485 by %c109_i32 dim 1 : vector<1x128xf32>, i32 -> vector<1x128xf32>
    %487 = vector.extract_strided_slice %411 {offsets = [38, 0], sizes = [1, 128], strides = [1, 1]} : vector<49x128xf32> to vector<1x128xf32>
    %c108_i32 = arith.constant 108 : i32
    %488 = tpu.dynamic_rotate %487 by %c108_i32 dim 1 : vector<1x128xf32>, i32 -> vector<1x128xf32>
    %489 = vector.extract_strided_slice %411 {offsets = [39, 0], sizes = [1, 128], strides = [1, 1]} : vector<49x128xf32> to vector<1x128xf32>
    %c107_i32 = arith.constant 107 : i32
    %490 = tpu.dynamic_rotate %489 by %c107_i32 dim 1 : vector<1x128xf32>, i32 -> vector<1x128xf32>
    %491 = vector.extract_strided_slice %411 {offsets = [40, 0], sizes = [1, 128], strides = [1, 1]} : vector<49x128xf32> to vector<1x128xf32>
    %c106_i32 = arith.constant 106 : i32
    %492 = tpu.dynamic_rotate %491 by %c106_i32 dim 1 : vector<1x128xf32>, i32 -> vector<1x128xf32>
    %493 = vector.extract_strided_slice %411 {offsets = [41, 0], sizes = [1, 128], strides = [1, 1]} : vector<49x128xf32> to vector<1x128xf32>
    %c105_i32 = arith.constant 105 : i32
    %494 = tpu.dynamic_rotate %493 by %c105_i32 dim 1 : vector<1x128xf32>, i32 -> vector<1x128xf32>
    %495 = vector.extract_strided_slice %411 {offsets = [42, 0], sizes = [1, 128], strides = [1, 1]} : vector<49x128xf32> to vector<1x128xf32>
    %c101_i32 = arith.constant 101 : i32
    %496 = tpu.dynamic_rotate %495 by %c101_i32 dim 1 : vector<1x128xf32>, i32 -> vector<1x128xf32>
    %497 = vector.extract_strided_slice %411 {offsets = [43, 0], sizes = [1, 128], strides = [1, 1]} : vector<49x128xf32> to vector<1x128xf32>
    %c100_i32 = arith.constant 100 : i32
    %498 = tpu.dynamic_rotate %497 by %c100_i32 dim 1 : vector<1x128xf32>, i32 -> vector<1x128xf32>
    %499 = vector.extract_strided_slice %411 {offsets = [44, 0], sizes = [1, 128], strides = [1, 1]} : vector<49x128xf32> to vector<1x128xf32>
    %c99_i32 = arith.constant 99 : i32
    %500 = tpu.dynamic_rotate %499 by %c99_i32 dim 1 : vector<1x128xf32>, i32 -> vector<1x128xf32>
    %501 = vector.extract_strided_slice %411 {offsets = [45, 0], sizes = [1, 128], strides = [1, 1]} : vector<49x128xf32> to vector<1x128xf32>
    %c98_i32 = arith.constant 98 : i32
    %502 = tpu.dynamic_rotate %501 by %c98_i32 dim 1 : vector<1x128xf32>, i32 -> vector<1x128xf32>
    %503 = vector.extract_strided_slice %411 {offsets = [46, 0], sizes = [1, 128], strides = [1, 1]} : vector<49x128xf32> to vector<1x128xf32>
    %c97_i32 = arith.constant 97 : i32
    %504 = tpu.dynamic_rotate %503 by %c97_i32 dim 1 : vector<1x128xf32>, i32 -> vector<1x128xf32>
    %505 = vector.extract_strided_slice %411 {offsets = [47, 0], sizes = [1, 128], strides = [1, 1]} : vector<49x128xf32> to vector<1x128xf32>
    %c96_i32 = arith.constant 96 : i32
    %506 = tpu.dynamic_rotate %505 by %c96_i32 dim 1 : vector<1x128xf32>, i32 -> vector<1x128xf32>
    %507 = vector.extract_strided_slice %411 {offsets = [48, 0], sizes = [1, 128], strides = [1, 1]} : vector<49x128xf32> to vector<1x128xf32>
    %c95_i32 = arith.constant 95 : i32
    %508 = tpu.dynamic_rotate %507 by %c95_i32 dim 1 : vector<1x128xf32>, i32 -> vector<1x128xf32>
    %509 = arith.addf %413, %415 : vector<1x128xf32>
    %510 = arith.addf %417, %419 : vector<1x128xf32>
    %511 = arith.addf %421, %423 : vector<1x128xf32>
    %512 = arith.addf %425, %427 : vector<1x128xf32>
    %513 = arith.addf %429, %431 : vector<1x128xf32>
    %514 = arith.addf %433, %435 : vector<1x128xf32>
    %515 = arith.addf %437, %439 : vector<1x128xf32>
    %516 = arith.addf %441, %443 : vector<1x128xf32>
    %517 = arith.addf %445, %447 : vector<1x128xf32>
    %518 = arith.addf %449, %451 : vector<1x128xf32>
    %519 = arith.addf %453, %455 : vector<1x128xf32>
    %520 = arith.addf %457, %459 : vector<1x128xf32>
    %521 = arith.addf %460, %462 : vector<1x128xf32>
    %522 = arith.addf %464, %466 : vector<1x128xf32>
    %523 = arith.addf %468, %470 : vector<1x128xf32>
    %524 = arith.addf %472, %474 : vector<1x128xf32>
    %525 = arith.addf %476, %478 : vector<1x128xf32>
    %526 = arith.addf %480, %482 : vector<1x128xf32>
    %527 = arith.addf %484, %486 : vector<1x128xf32>
    %528 = arith.addf %488, %490 : vector<1x128xf32>
    %529 = arith.addf %492, %494 : vector<1x128xf32>
    %530 = arith.addf %496, %498 : vector<1x128xf32>
    %531 = arith.addf %500, %502 : vector<1x128xf32>
    %532 = arith.addf %504, %506 : vector<1x128xf32>
    %533 = arith.addf %509, %510 : vector<1x128xf32>
    %534 = arith.addf %511, %512 : vector<1x128xf32>
    %535 = arith.addf %513, %514 : vector<1x128xf32>
    %536 = arith.addf %515, %516 : vector<1x128xf32>
    %537 = arith.addf %517, %518 : vector<1x128xf32>
    %538 = arith.addf %519, %520 : vector<1x128xf32>
    %539 = arith.addf %521, %522 : vector<1x128xf32>
    %540 = arith.addf %523, %524 : vector<1x128xf32>
    %541 = arith.addf %525, %526 : vector<1x128xf32>
    %542 = arith.addf %527, %528 : vector<1x128xf32>
    %543 = arith.addf %529, %530 : vector<1x128xf32>
    %544 = arith.addf %531, %532 : vector<1x128xf32>
    %545 = arith.addf %533, %534 : vector<1x128xf32>
    %546 = arith.addf %535, %536 : vector<1x128xf32>
    %547 = arith.addf %537, %538 : vector<1x128xf32>
    %548 = arith.addf %539, %540 : vector<1x128xf32>
    %549 = arith.addf %541, %542 : vector<1x128xf32>
    %550 = arith.addf %543, %544 : vector<1x128xf32>
    %551 = arith.addf %545, %546 : vector<1x128xf32>
    %552 = arith.addf %547, %548 : vector<1x128xf32>
    %553 = arith.addf %549, %550 : vector<1x128xf32>
    %554 = arith.addf %551, %552 : vector<1x128xf32>
    %555 = arith.addf %553, %508 : vector<1x128xf32>
    %556 = arith.addf %554, %555 : vector<1x128xf32>
    %c0_117 = arith.constant 0 : index
    %c2_118 = arith.constant 2 : index
    %557 = vector.load %arg10[%c0_117, %c2_118] : memref<1x3xf32, #tpu.memory_space<vmem>>, vector<1x1xf32>
    %558 = vector.broadcast %557 : vector<1x1xf32> to vector<1x128xf32>
    %559 = arith.addf %556, %558 : vector<1x128xf32>
    %560 = arith.negf %559 : vector<1x128xf32>
    %561 = math.exp %560 : vector<1x128xf32>
    %cst_119 = arith.constant 1.000000e+00 : f32
    %562 = vector.broadcast %cst_119 : f32 to vector<1x128xf32>
    %563 = arith.addf %562, %561 : vector<1x128xf32>
    %564 = arith.divf %562, %563 : vector<1x128xf32>
    %565 = vector.broadcast %564 : vector<1x128xf32> to vector<16x128xf32>
    %566 = arith.mulf %408, %565 : vector<16x128xf32>
    %c2_120 = arith.constant 2 : index
    %c0_121 = arith.constant 0 : index
    %c0_122 = arith.constant 0 : index
    %567 = vector.load %arg9[%c2_120, %c0_121, %c0_122] : memref<3x16x16xf32, #tpu.memory_space<vmem>>, vector<1x16x16xf32>
    %568 = vector.shape_cast %567 : vector<1x16x16xf32> to vector<16x16xf32>
    %cst_123 = arith.constant dense<0.000000e+00> : vector<16x128xf32>
    %569 = tpu.matmul %568, %566, %cst_123 {dimension_numbers = #tpu.dot_dimension_numbers<[1], [0], [0], [1], [0, 0, 1, 1], [], []>} : vector<16x16xf32>, vector<16x128xf32>, vector<16x128xf32> -> vector<16x128xf32>
    %c0_124 = arith.constant 0 : index
    %c0_125 = arith.constant 0 : index
    %c0_126 = arith.constant 0 : index
    %570 = vector.load %arg13[%c0_124, %c0_125, %c0_126] : memref<1x16x128xf32, #tpu.memory_space<vmem>>, vector<1x16x128xf32>
    %571 = vector.shape_cast %570 : vector<1x16x128xf32> to vector<16x128xf32>
    %572 = vector.shape_cast %569 : vector<16x128xf32> to vector<1x16x128xf32>
    tpu.vector_store %arg13[%c0_124, %c0_125, %c0_126], %572 {strides = array<i32>} : memref<1x16x128xf32, #tpu.memory_space<vmem>>, vector<1x16x128xf32>,
    return
  }
  func.func @transform_0(%arg0: i32) -> (i32, i32, i32) {
    %c0_i32 = arith.constant 0 : i32
    %c0_i32_0 = arith.constant 0 : i32
    %c0_i32_1 = arith.constant 0 : i32
    return %arg0, %c0_i32, %c0_i32_0 : i32, i32, i32
  }
  func.func @transform_1(%arg0: i32) -> (i32, i32, i32) {
    %c0_i32 = arith.constant 0 : i32
    %c0_i32_0 = arith.constant 0 : i32
    %c0_i32_1 = arith.constant 0 : i32
    return %arg0, %c0_i32, %c0_i32_0 : i32, i32, i32
  }
  func.func @transform_2(%arg0: i32) -> (i32, i32, i32) {
    %c0_i32 = arith.constant 0 : i32
    %c0_i32_0 = arith.constant 0 : i32
    %c0_i32_1 = arith.constant 0 : i32
    return %arg0, %c0_i32, %c0_i32_0 : i32, i32, i32
  }
  func.func @transform_3(%arg0: i32) -> (i32, i32, i32) {
    %c0_i32 = arith.constant 0 : i32
    %c0_i32_0 = arith.constant 0 : i32
    %c0_i32_1 = arith.constant 0 : i32
    %c0_i32_2 = arith.constant 0 : i32
    return %c0_i32, %c0_i32_0, %c0_i32_1 : i32, i32, i32
  }
  func.func @transform_4(%arg0: i32) -> (i32, i32, i32) {
    %c0_i32 = arith.constant 0 : i32
    %c0_i32_0 = arith.constant 0 : i32
    %c0_i32_1 = arith.constant 0 : i32
    %c0_i32_2 = arith.constant 0 : i32
    return %c0_i32, %c0_i32_0, %c0_i32_1 : i32, i32, i32
  }
  func.func @transform_5(%arg0: i32) -> (i32, i32, i32) {
    %c0_i32 = arith.constant 0 : i32
    %c0_i32_0 = arith.constant 0 : i32
    %c0_i32_1 = arith.constant 0 : i32
    %c0_i32_2 = arith.constant 0 : i32
    return %c0_i32, %c0_i32_0, %c0_i32_1 : i32, i32, i32
  }
  func.func @transform_6(%arg0: i32) -> (i32, i32, i32) {
    %c0_i32 = arith.constant 0 : i32
    %c0_i32_0 = arith.constant 0 : i32
    %c0_i32_1 = arith.constant 0 : i32
    %c0_i32_2 = arith.constant 0 : i32
    return %c0_i32, %c0_i32_0, %c0_i32_1 : i32, i32, i32
  }
  func.func @transform_7(%arg0: i32) -> (i32, i32, i32) {
    %c0_i32 = arith.constant 0 : i32
    %c0_i32_0 = arith.constant 0 : i32
    %c0_i32_1 = arith.constant 0 : i32
    %c0_i32_2 = arith.constant 0 : i32
    return %c0_i32, %c0_i32_0, %c0_i32_1 : i32, i32, i32
  }
  func.func @transform_8(%arg0: i32) -> (i32, i32, i32) {
    %c0_i32 = arith.constant 0 : i32
    %c0_i32_0 = arith.constant 0 : i32
    %c0_i32_1 = arith.constant 0 : i32
    %c0_i32_2 = arith.constant 0 : i32
    return %c0_i32, %c0_i32_0, %c0_i32_1 : i32, i32, i32
  }
  func.func @transform_9(%arg0: i32) -> (i32, i32) {
    %c0_i32 = arith.constant 0 : i32
    %c0_i32_0 = arith.constant 0 : i32
    %c0_i32_1 = arith.constant 0 : i32
    return %c0_i32, %c0_i32_0 : i32, i32
  }
  func.func @transform_10(%arg0: i32) -> (i32, i32, i32) {
    %c0_i32 = arith.constant 0 : i32
    %c0_i32_0 = arith.constant 0 : i32
    %c0_i32_1 = arith.constant 0 : i32
    return %arg0, %c0_i32, %c0_i32_0 : i32, i32, i32
  }
  func.func @transform_11(%arg0: i32) -> (i32, i32, i32) {
    %c0_i32 = arith.constant 0 : i32
    %c0_i32_0 = arith.constant 0 : i32
    %c0_i32_1 = arith.constant 0 : i32
    return %arg0, %c0_i32, %c0_i32_0 : i32, i32, i32
  }
  func.func @transform_12(%arg0: i32) -> (i32, i32, i32) {
    %c0_i32 = arith.constant 0 : i32
    %c0_i32_0 = arith.constant 0 : i32
    %c0_i32_1 = arith.constant 0 : i32
    return %arg0, %c0_i32, %c0_i32_0 : i32, i32, i32
  }
}

</mosaic_0001>

<bundles_post_ra>
// kernel: tpu_custom_call.1
= control target key start
LH: loop header
LB: loop body
LE: loop exit
PB: predicated region body
PF: predicated region fallthrough
CT: control target
= control target key end

     0   :  { %s7903_s0 = inlined_call_operand.vmem [shape: f32[2,16,512], index: 0, kind: input, shape index: {}]   ;;  %s7904_s1 = inlined_call_operand.vmem [shape: f32[2,16,256], index: 1, kind: input, shape index: {}]   ;;  %s7905_s2 = inlined_call_operand.vmem [shape: f32[2,16,128], index: 2, kind: input, shape index: {}]   ;;  %s7906_s3 = inlined_call_operand.vmem [shape: f32[3,2,16], index: 3, kind: input, shape index: {}]   ;;  %s7907_s4 = inlined_call_operand.vmem [shape: f32[3,2,1], index: 4, kind: input, shape index: {}]   ;;  %s7908_s5 = inlined_call_operand.vmem [shape: f32[3,16,2], index: 5, kind: input, shape index: {}]   ;;  %s7909_s6 = inlined_call_operand.vmem [shape: f32[3,16,1], index: 6, kind: input, shape index: {}]   ;;  %s7910_s7 = inlined_call_operand.vmem [shape: f32[3,49,16], index: 7, kind: input, shape index: {}]   ;;  %s7911_s8 = inlined_call_operand.vmem [shape: f32[3,16,16], index: 8, kind: input, shape index: {}]   ;;  %s7912_s9 = inlined_call_operand.vmem [shape: f32[1,3], index: 9, kind: input, shape index: {}]   ;;  %s7913_s10 = inlined_call_operand.hbm [shape: f32[2,16,512], index: 10, kind: output, shape index: {0}]   ;;  %s7914_s11 = inlined_call_operand.hbm [shape: f32[2,16,256], index: 11, kind: output, shape index: {1}]   ;;  %s7915_s12 = inlined_call_operand.hbm [shape: f32[2,16,128], index: 12, kind: output, shape index: {2}]  }
   0x1   :  { %8192 = sst [smem:[#allocation134_spill]] %s7903_s0 }
   0x2   :  { %8193 = sst [smem:[#allocation135_spill]] %s7904_s1 }
   0x3   :  { %8194 = sst [smem:[#allocation136_spill]] %s7913_s10 }
   0x4   :  { %8195 = sst [smem:[#allocation137_spill]] %s7914_s11 }
   0x5   :  { %8196 = sst [smem:[#allocation138_spill]] %s7915_s12 }
   0x6   :  { %18 = vsyncpa [#allocation3], 0 }
   0x7   :  { %20 = vsyncpa [#allocation3 + $0x1], 0 }
   0x8   :  { %21 = vsyncpa [#allocation5], 0 }
   0x9   :  { %23 = vsyncpa [#allocation5 + $0x1], 0  ;;  %s4984_s21 = smov 0   ;;  %s4986_s22 = smov 0  }
   0xa   :  { %s4988_s23 = smov 0   ;;  %s4990_s24 = smov 0  }
   0xb LB: > { %8197 = sst [smem:[#allocation9_spill]] %s4805_s21  ;;  %s5005_s25 = sadd.s32 4294967295, %s4817_s24   ;;  %s4817_s24 = sphi %s4990_s24, %s8648_s24   ;;  %s4813_s23 = sphi %s4988_s23, %s8650_s23   ;;  %s4809_s22 = sphi %s4986_s22, %s8652_s22   ;;  %s4805_s21 = sphi %s4984_s21, %s8651_s21  }
   0xc   : > { %8198 = sst [smem:[#allocation10_spill]] %s4813_s23  ;;  %s7916_s26 = sadd.s32 4294967294, %s4817_s24  }
   0xd   : > { %8199 = sst [smem:[#allocation11_spill]] %s4817_s24  ;;  %s5009_s27 = sadd.s32 1, %s4817_s24  }
   0xe   : > { %8200 = sst [smem:[#allocation12_spill]] %s5005_s25  ;;  %s261_s28 = sadd.s32 1, %s4813_s23 }
   0xf   : > { %8201 = sst [smem:[#allocation13_spill]] %s5009_s27  ;;  %s258_s29 = ssub.s32 %s4817_s24, %s5009_s27 }
  0x10   : > { %p271_p0 = scmp.ne.s32.totalorder %s4813_s23, %s4809_s22  ;;  %p259_p1 = scmp.eq.s32.totalorder %s258_s29, 0 }
  0x11   : > { %p272_p2 = scmp.eq.s32.totalorder %s5005_s25, 1  ;;  %p277_p3 = scmp.ne.s32.totalorder %s4809_s22, %s4805_s21 }
  0x12   : > { %p278_p4 = scmp.eq.s32.totalorder %s7916_s26, 1  ;;  %p4276_p7 = scmp.ge.s32.totalorder %s4817_s24, 1 }
  0x13   : > { %s5022_s30 = scalar_select %p259_p1, %s4813_s23, %s261_s28  }
  0x14   : > { %p5024_p5 = por %p272_p2, %p271_p0  ;;  %p5028_p6 = por %p278_p4, %p277_p3 }
  0x15   : > { %8202 = sst [smem:[#allocation14_spill]] %s5022_s30  ;;  %p393_p8 = scmp.lt.s32.totalorder %s4817_s24, 3 }
  0x16   : > { %s8203_s13 = scalar_select %p5024_p5, 1, 0 }
  0x17   : > { %s8205_s14 = scalar_select %p5028_p6, 1, 0 }
  0x18   : > { %8204 = sst [smem:[#allocation15_spill]] %s8203_s13  ;;  %p394_p9 = pnand %p4276_p7, %p393_p8 }
  0x19   : > { %8206 = sst [smem:[#allocation16_spill]] %s8205_s14 }
  0x1a   : > { %397 = sbr.rel (%p394_p9) target bundleno = 3852 (0xf0c), region = 60 }
  0x1f   : > { %p455_p10 = scmp.lt.s32.totalorder %s5005_s25, 1  ;;  %s8207_s0 = sld [smem:[#allocation134_spill]]  ;;  %v7963_v14 = vmov 0.0   ;;  %vm8126_vm0 = vmmov 0   ;;  %v490_v19 = vld [vmem:[%s7906_s3] sm:$0x3] }
  0x20   : > { %4425 = vmatprep.subr.mxu0 %v7963_v14  ;;  %4429 = vmatprep.mubr.msk.f32.mxu0 %vm8126_vm0, %v7963_v14  ;;  %vm8128_vm1 = vcmask 130048   ;;  %v567_v20 = vld [vmem:[%s7908_s5] sm:$0xff]  ;;  %vm8125_vm2 = vcmask 15360   ;;  %vm8124_vm3 = vcmask 1041408   ;;  %v568_v26 = vld [vmem:[%s7908_s5 + $0x8] sm:$0xff]  ;;  %v7960_v27 = vmov 0  }
  0x21   : > { %s5036_s15 = scalar_select %p455_p10, %s5005_s25, 1  ;;  %4434 = vmatprep.mubr.msk.f32.mxu1 %vm8125_vm2, %v567_v20  ;;  %v491_v21 = vld [vmem:[%s7907_s4] sm:$0x3]  ;;  %4640 = vset.pattern.permute.xlu1 %v7960_v27  ;;  %v570_v28 = vld [vmem:[%s7909_s6 + $0x8] sm:$0xff]  ;;  %v689_v55 = vld [vmem:[%s7910_s7 + $0x10] sm:$0xff] }
  0x22   : > { %4639 = vset.pattern.permute.xlu0 %v7960_v27  ;;  %v569_v30 = vld [vmem:[%s7909_s6] sm:$0xff]  ;;  %v688_v54 = vld [vmem:[%s7910_s7 + $0x8] sm:$0xff]  ;;  %v690_v56 = vld [vmem:[%s7910_s7 + $0x18] sm:$0xff]  ;;  %s4822_s18 = smov 69   ;;  %s4824_s20 = smov 68  }
  0x23   : > { %s4388_s16 = sshll.u32 %s5036_s15, 6  ;;  %v2104_v42 = vld [vmem:[%s7912_s9] sm:$0x1]  ;;  %v692_v58 = vld [vmem:[%s7910_s7 + $0x28] sm:$0xff]  ;;  %s7922_s28 = smov 65  }
  0x24   : > { %v687_v53 = vld [vmem:[%s7910_s7] sm:$0xff]  ;;  %s7919_s29 = smov 63   ;;  %s7917_s17 = smov 64  }
  0x25   : > { %s459_s19 = scalar_lea.vmem %s8207_s0, %s4388_s16  ;;  %v691_v57 = vld [vmem:[%s7910_s7 + $0x20] sm:$0xff]  ;;  %s4827_s16 = smov 66  }
  0x26   : > { %v5042_v0 = vld [vmem:[%s459_s19 + $0x20] sm:$0xff]  ;;  %v5044_v1 = vld [vmem:[%s459_s19 + $0x28] sm:$0xff]  ;;  %v5046_v2 = vld [vmem:[%s459_s19 + $0x30] sm:$0xff]  ;;  %s4829_s26 = smov 47   ;;  %s7966_s0 = smov 106  }
  0x27   : > { %v483_v3 = vadd.f32 %v5044_v1, %v5042_v0  ;;  %v5050_v4 = vld [vmem:[%s459_s19] sm:$0xff]  ;;  %v5052_v5 = vld [vmem:[%s459_s19 + $0x8] sm:$0xff]  ;;  %v5054_v6 = vld [vmem:[%s459_s19 + $0x38] sm:$0xff]  ;;  %s8229_s30 = smov 126   ;;  %s8231_s23 = smov 109  }
  0x28   : > { %v5056_v7 = vld [vmem:[%s459_s19 + $0x10] sm:$0xff]  ;;  %v478_v8 = vadd.f32 %v5052_v5, %v5050_v4  ;;  %v5061_v10 = vld [vmem:[%s459_s19 + $0x18] sm:$0xff]  ;;  %s4823_s19 = smov 67   ;;  %s8235_s27 = smov 106  }
  0x29   : > { %v484_v9 = vadd.f32 %v483_v3, %v5046_v2  ;;  %s8236_s14 = smov 107   ;;  %s7994_s21 = smov 105  }
  0x2a   : > { %v479_v11 = vadd.f32 %v478_v8, %v5056_v7  ;;  %s8005_s24 = smov 103   ;;  %s8020_s12 = smov 85  }
  0x2b   : > { %v485_v12 = vadd.f32 %v484_v9, %v5054_v6  ;;  %s8025_s10 = smov 84   ;;  %s8037_s11 = smov 83  }
  0x2c   : > { %v480_v13 = vadd.f32 %v479_v11, %v5061_v10  ;;  %s8268_s13 = smov 103   ;;  %s8271_s25 = smov 86  }
  0x2d   : > { %486 = vadd.xlane.f32.xlu0 %v485_v12  ;;  %s8338_s1 = sld [smem:[#allocation135_spill]] }
  0x31   : > { %481 = vadd.xlane.f32.xlu0 %v480_v13 }
  0x47   : > { %2107 = vperm.xlu0 %4639, %v2104_v42  }
  0xb6   : > { %v487_v15 = vpop.xlane.xlu0 %486 }
  0xb7   : > { %v489_v16 = vmul.f32 0.00390625, %v487_v15 }
  0xb9   : > { %4426 = vmatpush3.msra.mxu0 %v489_v16 }
  0xba   : > { %v482_v17 = vpop.xlane.xlu0 %481  ;;  %4427 = vmatprep.subr.mxu0 %v7963_v14 }
  0xbb   : > { %v488_v18 = vmul.f32 0.00390625, %v482_v17 }
  0xbd   : > { %4428 = vmatpush3.msra.mxu0 %v488_v18 }
  0xbe   : > { %4430 = vmatmul.mubr.msk.f32.vlgmr.msra.gmra.mxu0 %vm8128_vm1, %v490_v19 }
  0xbf   : > { %886 = vmatprep.mubr.f32.mxu0 %v7963_v14 }
 0x17e   : > { %v562_v22 = vpop.f32.mrf.mxu0 }
 0x17f   : > { %v563_v23 = vadd.f32 %v562_v22, %v491_v21 }
 0x180   : > { %v4431_v24 = vpop.f32.mrf.mxu0 }
 0x181   : > { %v566_v25 = vmax.f32 %v563_v23, 0.0 }
 0x183   : > { %4432 = vmatprep.subr.msk.mxu1 %vm8124_vm3, %v566_v25 }
 0x184   : > { %4433 = vmatpush3.msk.msra.mxu1 %vm8124_vm3, %v566_v25 }
 0x185   : > { %4435 = vmatmul.mubr.msk.f32.vlgmr.msra.gmra.mxu1 %vm8125_vm2, %v568_v26 }
 0x186   : > { %779 = vmatprep.mubr.f32.mxu1 %v7963_v14 }
 0x245   : > { %v4436_v29 = vpop.f32.mrf.mxu1 }
 0x246   : > { %v654_v31 = vadd.f32 %v4436_v29, %v570_v28 }
 0x247   : > { %v648_v32 = vpop.f32.mrf.mxu1 }
 0x248   : > { %v4291_v33 = vmul.f32 -1.442695, %v654_v31  ;;  %v649_v34 = vadd.f32 %v648_v32, %v569_v30 }
 0x24a   : > { %4645 = vpow2.f32 %v4291_v33  ;;  %v4290_v35 = vmul.f32 -1.442695, %v649_v34  ;;  %v693_v33 = vld [vmem:[%s7910_s7 + $0x30] sm:$0x1] }
 0x24c   : > { %4647 = vpow2.f32 %v4290_v35 }
 0x257   : > { %v4646_v36 = vpop.eup %4645 }
 0x258   : > { %v664_v37 = vadd.f32 1.0, %v4646_v36 }
 0x259   : > { %v4648_v38 = vpop.eup %4647 }
 0x25a   : > { %4649 = vrcp.f32 %v664_v37  ;;  %v663_v39 = vadd.f32 1.0, %v4648_v38 }
 0x25c   : > { %4651 = vrcp.f32 %v663_v39 }
 0x267   : > { %v4650_v40 = vpop.eup %4649 }
 0x268   : > { %676 = vperm.xlu1 %4640, %v4650_v40  }
 0x269   : > { %v4652_v41 = vpop.eup %4651 }
 0x26c   : > { %671 = vperm.xlu1 %4640, %v4652_v41  }
 0x2e3   : > { %v677_v43 = vpop.permute.xlu1 %676 }
 0x2e4   : > { %v5101_v44 = vmul.f32 %v677_v43, %v5044_v1  ;;  %v5104_v45 = vmul.f32 %v677_v43, %v5054_v6  ;;  %v5107_v46 = vmul.f32 %v677_v43, %v5042_v0  ;;  %v5110_v47 = vmul.f32 %v677_v43, %v5046_v2 }
 0x2e6   : > { %8208 = vst [vmem:[#allocation17_spill] sm:$0xff] %v5101_v44  ;;  %8209 = vst [vmem:[#allocation18_spill] sm:$0xff] %v5104_v45  ;;  %743 = vmatprep.subr.mxu1 %v5101_v44  ;;  %850 = vmatprep.subr.mxu0 %v5104_v45 }
 0x2e7   : > { %8210 = vst [vmem:[#allocation19_spill] sm:$0xff] %v5107_v46  ;;  %8211 = vst [vmem:[#allocation20_spill] sm:$0xff] %v5110_v47  ;;  %744 = vmatpush1.msra.mxu1 %v5107_v46  ;;  %851 = vmatpush1.msra.mxu0 %v5110_v47  ;;  %v672_v48 = vpop.permute.xlu1 %671 }
 0x2e8   : > { %v5117_v49 = vmul.f32 %v672_v48, %v5052_v5  ;;  %v5120_v50 = vmul.f32 %v672_v48, %v5061_v10  ;;  %v5123_v51 = vmul.f32 %v672_v48, %v5050_v4  ;;  %v5126_v52 = vmul.f32 %v672_v48, %v5056_v7 }
 0x2ea   : > { %8212 = vst [vmem:[#allocation21_spill] sm:$0xff] %v5117_v49  ;;  %8213 = vst [vmem:[#allocation22_spill] sm:$0xff] %v5120_v50  ;;  %745 = vmatprep.subr.mxu1 %v5117_v49  ;;  %852 = vmatprep.subr.mxu0 %v5120_v50 }
 0x2eb   : > { %8214 = vst [vmem:[#allocation23_spill] sm:$0xff] %v5123_v51  ;;  %8215 = vst [vmem:[#allocation24_spill] sm:$0xff] %v5126_v52  ;;  %746 = vmatpush1.msra.mxu1 %v5123_v51  ;;  %853 = vmatpush1.msra.mxu0 %v5126_v52 }
 0x2ec   : > { %4292 = vmatmul.mubr.msk.f32.vlgmr.msra.gmra.mxu1 %vm8128_vm1, %v687_v53  ;;  %4299 = vmatmul.mubr.msk.f32.vlgmr.msra.gmra.mxu0 %vm8128_vm1, %v687_v53 }
 0x2ed   : > { %892 = vmatprep.mubr.f32.mxu0 %v7963_v14  ;;  %785 = vmatprep.mubr.f32.mxu1 %v7963_v14 }
 0x2f0   : > { %4300 = vmatmul.mubr.msk.f32.gmra.mxu0 %vm8128_vm1, %v688_v54  ;;  %4293 = vmatmul.mubr.msk.f32.gmra.mxu1 %vm8128_vm1, %v688_v54 }
 0x2f1   : > { %898 = vmatprep.mubr.f32.mxu0 %v7963_v14  ;;  %791 = vmatprep.mubr.f32.mxu1 %v7963_v14 }
 0x2f4   : > { %4301 = vmatmul.mubr.msk.f32.gmra.mxu0 %vm8128_vm1, %v689_v55  ;;  %4294 = vmatmul.mubr.msk.f32.gmra.mxu1 %vm8128_vm1, %v689_v55 }
 0x2f5   : > { %904 = vmatprep.mubr.f32.mxu0 %v7963_v14  ;;  %797 = vmatprep.mubr.f32.mxu1 %v7963_v14 }
 0x2f8   : > { %4302 = vmatmul.mubr.msk.f32.gmra.mxu0 %vm8128_vm1, %v690_v56  ;;  %4295 = vmatmul.mubr.msk.f32.gmra.mxu1 %vm8128_vm1, %v690_v56 }
 0x2f9   : > { %910 = vmatprep.mubr.f32.mxu0 %v7963_v14  ;;  %803 = vmatprep.mubr.f32.mxu1 %v7963_v14 }
 0x2fc   : > { %4303 = vmatmul.mubr.msk.f32.gmra.mxu0 %vm8128_vm1, %v691_v57  ;;  %4296 = vmatmul.mubr.msk.f32.gmra.mxu1 %vm8128_vm1, %v691_v57 }
 0x2fd   : > { %916 = vmatprep.mubr.f32.mxu0 %v7963_v14  ;;  %809 = vmatprep.mubr.f32.mxu1 %v7963_v14 }
 0x300   : > { %4304 = vmatmul.mubr.msk.f32.gmra.mxu0 %vm8128_vm1, %v692_v58  ;;  %4297 = vmatmul.mubr.msk.f32.gmra.mxu1 %vm8128_vm1, %v692_v58 }
 0x301   : > { %815 = vmatprep.mubr.f32.mxu1 %v7963_v14  ;;  %922 = vmatprep.mubr.f32.mxu0 %v7963_v14 }
 0x304   : > { %4298 = vmatmul.mubr.msk.f32.gmra.mxu1 %vm8128_vm1, %v693_v33  ;;  %4305 = vmatmul.mubr.msk.f32.gmra.mxu0 %vm8128_vm1, %v693_v33 }
 0x305   : > { %2238 = vmatprep.mubr.f32.mxu1 %v7963_v14 }
 0x3ac   : > { %v781_v59 = vpop.f32.mrf.mxu1  ;;  %v888_v60 = vpop.f32.mrf.mxu0 }
 0x3ad   : > { %929 = vrot.lane.b32.xlu0 %v781_v59, %s4822_s18  ;;  %933 = vrot.lane.b32.xlu1 %v888_v60, %s4822_s18  ;;  %v971_v61 = vrot.slane %v888_v60, 2  ;;  %v948_v63 = vrot.slane %v781_v59, 1  ;;  %v1013_v0 = vrot.slane %v888_v60, 4  ;;  %v969_v1 = vrot.slane %v781_v59, 2 }
 0x3ae   : > { %v5176_v62 = vpop.f32.mrf.mxu1  ;;  %v1055_v2 = vrot.slane %v888_v60, 6  ;;  %v990_v3 = vrot.slane %v781_v59, 3  ;;  %v1011_v5 = vrot.slane %v781_v59, 4  ;;  %v1032_v7 = vrot.slane %v781_v59, 5  ;;  %v890_v13 = vpop.f32.mrf.mxu0 }
 0x3af   : > { %v991_v4 = vrot.slane %v5176_v62, 3  ;;  %v1012_v6 = vrot.slane %v5176_v62, 4  ;;  %v1033_v8 = vrot.slane %v5176_v62, 5  ;;  %v1053_v9 = vrot.slane %v781_v59, 6 }
 0x3b0   : > { %v1054_v10 = vrot.slane %v5176_v62, 6  ;;  %v1074_v11 = vrot.slane %v781_v59, 7  ;;  %v1075_v12 = vrot.slane %v5176_v62, 7  ;;  %v951_v15 = vrot.slane %v890_v13, 1  ;;  %v5205_v22 = vpop.f32.mrf.mxu0  ;;  %v5207_v23 = vpop.f32.mrf.mxu1 }
 0x3b1   : > { %931 = vrot.lane.b32.xlu1 %v5176_v62, %s4822_s18  ;;  %981 = vrot.lane.b32.xlu0 %v971_v61, %s4823_s19  ;;  %v950_v16 = vrot.slane %v888_v60, 1  ;;  %v993_v17 = vrot.slane %v890_v13, 3  ;;  %v992_v18 = vrot.slane %v888_v60, 3  ;;  %v1035_v19 = vrot.slane %v890_v13, 5 }
 0x3b2   : > { %v1034_v20 = vrot.slane %v888_v60, 5  ;;  %v1077_v21 = vrot.slane %v890_v13, 7  ;;  %v1076_v24 = vrot.slane %v888_v60, 7  ;;  %v789_v25 = vpop.f32.mrf.mxu1  ;;  %v949_v26 = vrot.slane %v5176_v62, 1  ;;  %v5248_v56 = vpop.f32.mrf.mxu0 }
 0x3b3   : > { %v1135_v28 = vrot.slane %v5205_v22, 2  ;;  %v970_v29 = vrot.slane %v5176_v62, 2  ;;  %v1177_v30 = vrot.slane %v5205_v22, 4  ;;  %v1219_v31 = vrot.slane %v5205_v22, 6  ;;  %v5264_v62 = vpop.permute.xlu0 %2107 }
 0x3b4   : > { %v972_v32 = vrot.slane %v890_v13, 2  ;;  %v1014_v34 = vrot.slane %v890_v13, 4  ;;  %v1113_v35 = vrot.slane %v789_v25, 1  ;;  %v1056_v36 = vrot.slane %v890_v13, 6 }
 0x3b5   : > { %956 = vrot.lane.b32.xlu1 %v948_v63, %s4824_s20  ;;  %1023 = vrot.lane.b32.xlu0 %v1013_v0, %s7922_s28  ;;  %v1134_v37 = vrot.slane %v789_v25, 2  ;;  %v1112_v38 = vrot.slane %v5207_v23, 1  ;;  %v1155_v39 = vrot.slane %v789_v25, 3  ;;  %v1133_v40 = vrot.slane %v5207_v23, 2 }
 0x3b6   : > { %v1176_v41 = vrot.slane %v789_v25, 4  ;;  %v1154_v42 = vrot.slane %v5207_v23, 3  ;;  %v1197_v43 = vrot.slane %v789_v25, 5  ;;  %v1175_v48 = vrot.slane %v5207_v23, 4 }
 0x3b7   : > { %v1218_v53 = vrot.slane %v789_v25, 6  ;;  %v1196_v54 = vrot.slane %v5207_v23, 5  ;;  %v1239_v55 = vrot.slane %v789_v25, 7  ;;  %v1217_v57 = vrot.slane %v5207_v23, 6 }
 0x3b8   : > { %v1115_v58 = vrot.slane %v5248_v56, 1  ;;  %v1238_v59 = vrot.slane %v5207_v23, 7  ;;  %v1157_v60 = vrot.slane %v5248_v56, 3  ;;  %v1199_v61 = vrot.slane %v5248_v56, 5 }
 0x3b9   : > { %977 = vrot.lane.b32.xlu1 %v969_v1, %s4823_s19  ;;  %1065 = vrot.lane.b32.xlu0 %v1055_v2, %s7919_s29  ;;  %v1114_v63 = vrot.slane %v5205_v22, 1  ;;  %v1241_v0 = vrot.slane %v5248_v56, 7  ;;  %v5270_v1 = vpop.f32.mrf.mxu0  ;;  %v5272_v2 = vpop.f32.mrf.mxu1 }
 0x3ba   : > { %v1276_v33 = vrot.slane %v5272_v2, 1 }
 0x3bd   : > { %998 = vrot.lane.b32.xlu1 %v990_v3, %s4827_s16  ;;  %1000 = vrot.lane.b32.xlu0 %v991_v4, %s4827_s16 }
 0x3c1   : > { %1019 = vrot.lane.b32.xlu1 %v1011_v5, %s7922_s28  ;;  %1021 = vrot.lane.b32.xlu0 %v1012_v6, %s7922_s28  ;;  %v1156_v5 = vrot.slane %v5205_v22, 3  ;;  %v5282_v6 = vpop.f32.mrf.mxu1 }
 0x3c5   : > { %1040 = vrot.lane.b32.xlu1 %v1032_v7, %s7917_s17  ;;  %1042 = vrot.lane.b32.xlu0 %v1033_v8, %s7917_s17 }
 0x3c9   : > { %1061 = vrot.lane.b32.xlu1 %v1053_v9, %s7919_s29  ;;  %1063 = vrot.lane.b32.xlu0 %v1054_v10, %s7919_s29  ;;  %s7936_s29 = smov 25   ;;  %v1198_v9 = vrot.slane %v5205_v22, 5  ;;  %v1299_v10 = vrot.slane %v5270_v1, 2 }
 0x3cd   : > { %1082 = vrot.lane.b32.xlu1 %v1074_v11, %s4829_s26  ;;  %1084 = vrot.lane.b32.xlu0 %v1075_v12, %s4829_s26 }
 0x3d1   : > { %935 = vrot.lane.b32.xlu1 %v890_v13, %s4822_s18  ;;  %962 = vrot.lane.b32.xlu0 %v951_v15, %s4824_s20  ;;  %s7921_s18 = smov 46   ;;  %v1240_v13 = vrot.slane %v5205_v22, 7  ;;  %v1341_v15 = vrot.slane %v5270_v1, 4 }
 0x3d5   : > { %960 = vrot.lane.b32.xlu1 %v950_v16, %s4824_s20  ;;  %1004 = vrot.lane.b32.xlu0 %v993_v17, %s4827_s16 }
 0x3d9   : > { %1002 = vrot.lane.b32.xlu1 %v992_v18, %s4827_s16  ;;  %1046 = vrot.lane.b32.xlu0 %v1035_v19, %s7917_s17  ;;  %s7934_s16 = smov 44   ;;  %v1383_v18 = vrot.slane %v5270_v1, 6 }
 0x3dd   : > { %1044 = vrot.lane.b32.xlu1 %v1034_v20, %s7917_s17  ;;  %1088 = vrot.lane.b32.xlu0 %v1077_v21, %s4829_s26  ;;  %s8216_s17 = smov 63   ;;  %v1136_v21 = vrot.slane %v5248_v56, 2 }
 0x3e1   : > { %1086 = vrot.lane.b32.xlu1 %v1076_v24, %s4829_s26  ;;  %1099 = vrot.lane.b32.xlu0 %v5205_v22, %s7921_s18  ;;  %s7924_s26 = smov 42   ;;  %v1178_v24 = vrot.slane %v5248_v56, 4 }
 0x3e5   : > { %958 = vrot.lane.b32.xlu1 %v949_v26, %s4824_s20  ;;  %1097 = vrot.lane.b32.xlu0 %v789_v25, %s7921_s18  ;;  %s7928_s20 = smov 41   ;;  %v1277_v25 = vrot.slane %v5282_v6, 1 }
 0x3e9   : > { %979 = vrot.lane.b32.xlu1 %v970_v29, %s4823_s19  ;;  %1145 = vrot.lane.b32.xlu0 %v1135_v28, %s7934_s16  ;;  %v1220_v29 = vrot.slane %v5248_v56, 6 }
 0x3ed   : > { %1095 = vrot.lane.b32.xlu1 %v5207_v23, %s7921_s18  ;;  %1187 = vrot.lane.b32.xlu0 %v1177_v30, %s7924_s26  ;;  %s7930_s18 = smov 45   ;;  %v1298_v30 = vrot.slane %v5282_v6, 2 }
 0x3f1   : > { %983 = vrot.lane.b32.xlu1 %v972_v32, %s4823_s19  ;;  %1229 = vrot.lane.b32.xlu0 %v1219_v31, %s7936_s29  ;;  %s7926_s19 = smov 43  }
 0x3f5   : > { %1025 = vrot.lane.b32.xlu1 %v1014_v34, %s7922_s28  ;;  %1122 = vrot.lane.b32.xlu0 %v1113_v35, %s7930_s18  ;;  %s4837_s28 = smov 24   ;;  %v1319_v34 = vrot.slane %v5282_v6, 3 }
 0x3f9   : > { %1067 = vrot.lane.b32.xlu1 %v1056_v36, %s8216_s17  ;;  %1143 = vrot.lane.b32.xlu0 %v1134_v37, %s7934_s16  ;;  %v1297_v37 = vrot.slane %v5272_v2, 2 }
 0x3fd   : > { %1120 = vrot.lane.b32.xlu1 %v1112_v38, %s7930_s18  ;;  %1164 = vrot.lane.b32.xlu0 %v1155_v39, %s7926_s19  ;;  %v1340_v38 = vrot.slane %v5282_v6, 4 }
 0x401   : > { %1141 = vrot.lane.b32.xlu1 %v1133_v40, %s7934_s16  ;;  %1185 = vrot.lane.b32.xlu0 %v1176_v41, %s7924_s26  ;;  %v1318_v41 = vrot.slane %v5272_v2, 3 }
 0x405   : > { %1162 = vrot.lane.b32.xlu1 %v1154_v42, %s7926_s19  ;;  %1206 = vrot.lane.b32.xlu0 %v1197_v43, %s7928_s20  ;;  %v1361_v42 = vrot.slane %v5282_v6, 5 }
 0x409   : > { %1183 = vrot.lane.b32.xlu1 %v1175_v48, %s7924_s26  ;;  %1227 = vrot.lane.b32.xlu0 %v1218_v53, %s7936_s29  ;;  %s8217_s26 = smov 46   ;;  %v1339_v53 = vrot.slane %v5272_v2, 4 }
 0x40d   : > { %1204 = vrot.lane.b32.xlu1 %v1196_v54, %s7928_s20  ;;  %1248 = vrot.lane.b32.xlu0 %v1239_v55, %s4837_s28  ;;  %v1382_v54 = vrot.slane %v5282_v6, 6 }
 0x411   : > { %1225 = vrot.lane.b32.xlu1 %v1217_v57, %s7936_s29  ;;  %1126 = vrot.lane.b32.xlu0 %v1115_v58, %s7930_s18  ;;  %v1360_v57 = vrot.slane %v5272_v2, 5  ;;  %v1403_v58 = vrot.slane %v5282_v6, 7 }
 0x415   : > { %1246 = vrot.lane.b32.xlu1 %v1238_v59, %s4837_s28  ;;  %1168 = vrot.lane.b32.xlu0 %v1157_v60, %s7926_s19  ;;  %v5370_v59 = vpop.f32.mrf.mxu0 }
 0x419   : > { %1101 = vrot.lane.b32.xlu1 %v5248_v56, %s8217_s26  ;;  %1210 = vrot.lane.b32.xlu0 %v1199_v61, %s7928_s20  ;;  %s7932_s26 = smov 23  }
 0x41d   : > { %1124 = vrot.lane.b32.xlu1 %v1114_v63, %s7930_s18  ;;  %1252 = vrot.lane.b32.xlu0 %v1241_v0, %s4837_s28  ;;  %s8218_s18 = smov 42   ;;  %v1381_v63 = vrot.slane %v5272_v2, 6  ;;  %v1279_v0 = vrot.slane %v5370_v59, 1 }
 0x41f   : > { %v5274_v3 = vpop.permute.xlu1 %933  ;;  %v5276_v4 = vpop.permute.xlu0 %929 }
 0x421   : > { %1166 = vrot.lane.b32.xlu1 %v1156_v5, %s7926_s19  ;;  %1263 = vrot.lane.b32.xlu0 %v5270_v1, %s7932_s26  ;;  %s7938_s19 = smov 21  }
 0x423   : > { %v5284_v7 = vpop.permute.xlu1 %931  ;;  %v5286_v8 = vpop.permute.xlu0 %981 }
 0x425   : > { %1208 = vrot.lane.b32.xlu1 %v1198_v9, %s7928_s20  ;;  %1261 = vrot.lane.b32.xlu0 %v5282_v6, %s7932_s26  ;;  %s7942_s20 = smov 19   ;;  %v1402_v9 = vrot.slane %v5272_v2, 7 }
 0x427   : > { %v5293_v11 = vpop.permute.xlu1 %956  ;;  %v5295_v12 = vpop.permute.xlu0 %1023 }
 0x429   : > { %1250 = vrot.lane.b32.xlu1 %v1240_v13, %s4837_s28  ;;  %1309 = vrot.lane.b32.xlu0 %v1299_v10, %s7938_s19  ;;  %s7940_s28 = smov 2   ;;  %v1321_v10 = vrot.slane %v5370_v59, 3 }
 0x42b   : > { %v5301_v16 = vpop.permute.xlu1 %977  ;;  %v5303_v17 = vpop.permute.xlu0 %1065 }
 0x42d   : > { %1259 = vrot.lane.b32.xlu1 %v5272_v2, %s7932_s26  ;;  %1351 = vrot.lane.b32.xlu0 %v1341_v15, %s7942_s20  ;;  %s7944_s26 = smov 22  }
 0x42f   : > { %v5309_v19 = vpop.permute.xlu1 %998  ;;  %v5311_v20 = vpop.permute.xlu0 %1000 }
 0x431   : > { %1147 = vrot.lane.b32.xlu1 %v1136_v21, %s7934_s16  ;;  %1393 = vrot.lane.b32.xlu0 %v1383_v18, %s7940_s28  ;;  %s7945_s16 = smov 20   ;;  %v1363_v18 = vrot.slane %v5370_v59, 5  ;;  %v5398_v21 = vpop.f32.mrf.mxu0 }
 0x432   : > { %8220 = vst [vmem:[#allocation25_spill] sm:$0xff] %v5398_v21 }
 0x433   : > { %v5316_v22 = vpop.permute.xlu1 %1019  ;;  %v5318_v23 = vpop.permute.xlu0 %1021 }
 0x434   : > { %v5490_v51 = vpop.f32.mrf.mxu0 }
 0x435   : > { %1189 = vrot.lane.b32.xlu1 %v1178_v24, %s8218_s18  ;;  %1286 = vrot.lane.b32.xlu0 %v1277_v25, %s7944_s26  ;;  %v1278_v25 = vrot.slane %v5270_v1, 1  ;;  %8234 = vst [vmem:[#allocation31_spill] sm:$0xff] %v5490_v51 }
 0x436   : > { %v5494_v49 = vpop.f32.mrf.mxu0 }
 0x437   : > { %v5324_v26 = vpop.permute.xlu1 %1040  ;;  %v5326_v28 = vpop.permute.xlu0 %1042 }
 0x439   : > { %1231 = vrot.lane.b32.xlu1 %v1220_v29, %s7936_s29  ;;  %1307 = vrot.lane.b32.xlu0 %v1298_v30, %s7938_s19  ;;  %s7946_s29 = smov 3   ;;  %v1405_v29 = vrot.slane %v5370_v59, 7  ;;  %v1429_v30 = vrot.slane %v5398_v21, 1 }
 0x43b   : > { %v5332_v31 = vpop.permute.xlu1 %1061  ;;  %v5334_v32 = vpop.permute.xlu0 %1063 }
 0x43d   : > { %1284 = vrot.lane.b32.xlu1 %v1276_v33, %s7944_s26  ;;  %1328 = vrot.lane.b32.xlu0 %v1319_v34, %s7945_s16 }
 0x43f   : > { %v5340_v35 = vpop.permute.xlu1 %1082  ;;  %v5342_v36 = vpop.permute.xlu0 %1084 }
 0x441   : > { %1305 = vrot.lane.b32.xlu1 %v1297_v37, %s7938_s19  ;;  %1349 = vrot.lane.b32.xlu0 %v1340_v38, %s7942_s20  ;;  %s7950_s19 = smov 1   ;;  %v1320_v37 = vrot.slane %v5270_v1, 3  ;;  %v1450_v38 = vrot.slane %v5398_v21, 2 }
 0x443   : > { %v5348_v39 = vpop.permute.xlu1 %935  ;;  %v5350_v40 = vpop.permute.xlu0 %962 }
 0x445   : > { %1326 = vrot.lane.b32.xlu1 %v1318_v41, %s7945_s16  ;;  %1370 = vrot.lane.b32.xlu0 %v1361_v42, %s7946_s29 }
 0x447   : > { %v5356_v43 = vpop.permute.xlu1 %960  ;;  %v5358_v48 = vpop.permute.xlu0 %1004 }
 0x449   : > { %1347 = vrot.lane.b32.xlu1 %v1339_v53, %s7942_s20  ;;  %1391 = vrot.lane.b32.xlu0 %v1382_v54, %s7940_s28  ;;  %s7956_s20 = smov 127   ;;  %v1362_v53 = vrot.slane %v5270_v1, 5  ;;  %v1471_v54 = vrot.slane %v5398_v21, 3 }
 0x44b   : > { %v5364_v55 = vpop.permute.xlu1 %1002  ;;  %v5366_v56 = vpop.permute.xlu0 %1046 }
 0x44d   : > { %1368 = vrot.lane.b32.xlu1 %v1360_v57, %s7946_s29  ;;  %1412 = vrot.lane.b32.xlu0 %v1403_v58, %s7950_s19 }
 0x44f   : > { %v5374_v60 = vpop.permute.xlu1 %1044  ;;  %v5376_v61 = vpop.permute.xlu0 %1088 }
 0x451   : > { %1389 = vrot.lane.b32.xlu1 %v1381_v63, %s7940_s28  ;;  %1290 = vrot.lane.b32.xlu0 %v1279_v0, %s7944_s26  ;;  %s8219_s28 = smov 23   ;;  %v1404_v63 = vrot.slane %v5270_v1, 7  ;;  %v1492_v0 = vrot.slane %v5398_v21, 4  ;;  %v1513_v1 = vrot.slane %v5398_v21, 5 }
 0x453   : > { %v5382_v5 = vpop.permute.xlu1 %1086  ;;  %v5384_v6 = vpop.permute.xlu0 %1099 }
 0x455   : > { %1410 = vrot.lane.b32.xlu1 %v1402_v9, %s7950_s19  ;;  %1332 = vrot.lane.b32.xlu0 %v1321_v10, %s7945_s16 }
 0x457   : > { %v5390_v13 = vpop.permute.xlu1 %958  ;;  %v5392_v15 = vpop.permute.xlu0 %1097 }
 0x459   : > { %1265 = vrot.lane.b32.xlu1 %v5370_v59, %s8219_s28  ;;  %1374 = vrot.lane.b32.xlu0 %v1363_v18, %s7946_s29  ;;  %v1300_v18 = vrot.slane %v5370_v59, 2 }
 0x45b   : > { %v5400_v2 = vpop.permute.xlu1 %979  ;;  %v5402_v24 = vpop.permute.xlu0 %1145 }
 0x45d   : > { %1288 = vrot.lane.b32.xlu1 %v1278_v25, %s7944_s26  ;;  %1416 = vrot.lane.b32.xlu0 %v1405_v29, %s7950_s19  ;;  %s7948_s26 = smov 126  }
 0x45f   : > { %v5409_v33 = vpop.permute.xlu1 %1095  ;;  %v5411_v34 = vpop.permute.xlu0 %1187 }
 0x460   : > { %8221 = vst [vmem:[#allocation26_spill] sm:$0xff] %v5411_v34 }
 0x461   : > { %1330 = vrot.lane.b32.xlu1 %v1320_v37, %s7945_s16  ;;  %1439 = vrot.lane.b32.xlu0 %v1429_v30, %s7956_s20  ;;  %s7952_s16 = smov 125   ;;  %v1342_v30 = vrot.slane %v5370_v59, 4  ;;  %v1534_v37 = vrot.slane %v5398_v21, 6  ;;  %s7961_s20 = smov 107  }
 0x463   : > { %v5417_v41 = vpop.permute.xlu1 %983  ;;  %v5419_v42 = vpop.permute.xlu0 %1229 }
 0x464   : > { %8222 = vst [vmem:[#allocation27_spill] sm:$0xff] %v5419_v42  ;;  %v1472_v42 = vrot.slane %v5490_v51, 3 }
 0x465   : > { %1372 = vrot.lane.b32.xlu1 %v1362_v53, %s7946_s29  ;;  %1460 = vrot.lane.b32.xlu0 %v1450_v38, %s7948_s26  ;;  %s8223_s29 = smov 21   ;;  %s7954_s26 = smov 109  }
 0x467   : > { %v5425_v57 = vpop.permute.xlu1 %1025  ;;  %v5427_v58 = vpop.permute.xlu0 %1122 }
 0x469   : > { %1414 = vrot.lane.b32.xlu1 %v1404_v63, %s7950_s19  ;;  %1481 = vrot.lane.b32.xlu0 %v1471_v54, %s7952_s16  ;;  %s8224_s19 = smov 19   ;;  %s7958_s16 = smov 108   ;;  %v1384_v54 = vrot.slane %v5370_v59, 6  ;;  %v5454_v63 = vpop.f32.mrf.mxu1 }
 0x46a   : > { %8225 = vst [vmem:[#allocation28_spill] sm:$0xff] %v5454_v63 }
 0x46b   : > { %v5433_v9 = vpop.permute.xlu1 %1067  ;;  %v5435_v10 = vpop.permute.xlu0 %1143 }
 0x46c   : > { %v5488_v45 = vpop.f32.mrf.mxu1 }
 0x46d   : > { %1311 = vrot.lane.b32.xlu1 %v1300_v18, %s8223_s29  ;;  %1502 = vrot.lane.b32.xlu0 %v1492_v0, %s7954_s26  ;;  %s8226_s26 = smov 2   ;;  %v1427_v0 = vrot.slane %v5454_v63, 1  ;;  %v1555_v18 = vrot.slane %v5398_v21, 7  ;;  %8233 = vst [vmem:[#allocation30_spill] sm:$0xff] %v5488_v45  ;;  %v1428_v46 = vrot.slane %v5488_v45, 1  ;;  %s8313_s29 = smov 61  }
 0x46e   : > { %v5504_v44 = vpop.f32.mrf.mxu1 }
 0x46f   : > { %v5441_v25 = vpop.permute.xlu1 %1120  ;;  %v5443_v29 = vpop.permute.xlu0 %1164 }
 0x471   : > { %1353 = vrot.lane.b32.xlu1 %v1342_v30, %s8224_s19  ;;  %1523 = vrot.lane.b32.xlu0 %v1513_v1, %s7958_s16  ;;  %s8227_s16 = smov 127   ;;  %s8076_s19 = smov 61  }
 0x473   : > { %v5449_v38 = vpop.permute.xlu1 %1141  ;;  %v5451_v53 = vpop.permute.xlu0 %1185 }
 0x475   : > { %1395 = vrot.lane.b32.xlu1 %v1384_v54, %s8226_s26  ;;  %1544 = vrot.lane.b32.xlu0 %v1534_v37, %s7961_s20  ;;  %v1469_v54 = vrot.slane %v5454_v63, 3  ;;  %v1448_v37 = vrot.slane %v5454_v63, 2  ;;  %s8228_s20 = smov 125  }
 0x477   : > { %v5460_v1 = vpop.permute.xlu1 %1162  ;;  %v5462_v30 = vpop.permute.xlu0 %1206 }
 0x479   : > { %1435 = vrot.lane.b32.xlu1 %v1427_v0, %s8227_s16  ;;  %1565 = vrot.lane.b32.xlu0 %v1555_v18, %s7966_s0  ;;  %v1511_v0 = vrot.slane %v5454_v63, 5  ;;  %v1490_v18 = vrot.slane %v5454_v63, 4  ;;  %s8230_s0 = smov 108  }
 0x47b   : > { %v5466_v59 = vpop.permute.xlu1 %1183  ;;  %v5468_v27 = vpop.permute.xlu0 %1227 }
 0x47d   : > { %1477 = vrot.lane.b32.xlu1 %v1469_v54, %s8228_s20  ;;  %1456 = vrot.lane.b32.xlu0 %v1448_v37, %s8229_s30  ;;  %v1553_v54 = vrot.slane %v5454_v63, 7  ;;  %v1532_v37 = vrot.slane %v5454_v63, 6 }
 0x47f   : > { %v5474_v14 = vpop.permute.xlu1 %1204  ;;  %v5476_v52 = vpop.permute.xlu0 %1248 }
 0x481   : > { %1519 = vrot.lane.b32.xlu1 %v1511_v0, %s8230_s0  ;;  %1498 = vrot.lane.b32.xlu0 %v1490_v18, %s8231_s23 }
 0x483   : > { %v5482_v50 = vpop.permute.xlu1 %1225  ;;  %v5484_v47 = vpop.permute.xlu0 %1126 }
 0x484   : > { %8232 = vst [vmem:[#allocation29_spill] sm:$0xff] %v5484_v47  ;;  %v1430_v47 = vrot.slane %v5490_v51, 1 }
 0x485   : > { %1561 = vrot.lane.b32.xlu1 %v1553_v54, %s8235_s27  ;;  %1540 = vrot.lane.b32.xlu0 %v1532_v37, %s8236_s14  ;;  %v1449_v37 = vrot.slane %v5488_v45, 2 }
 0x487   : > { %v5496_v0 = vpop.permute.xlu1 %1246  ;;  %v5498_v18 = vpop.permute.xlu0 %1168 }
 0x488   : > { %8237 = vst [vmem:[#allocation32_spill] sm:$0xff] %v5498_v18  ;;  %v1470_v18 = vrot.slane %v5488_v45, 3 }
 0x489   : > { %1437 = vrot.lane.b32.xlu1 %v1428_v46, %s8227_s16  ;;  %1578 = vrot.lane.b32.xlu0 %v5494_v49, %s7994_s21 }
 0x48b   : > { %v5506_v21 = vpop.permute.xlu1 %1101  ;;  %v5508_v54 = vpop.permute.xlu0 %1210 }
 0x48c   : > { %8238 = vst [vmem:[#allocation33_spill] sm:$0xff] %v5506_v21  ;;  %8239 = vst [vmem:[#allocation34_spill] sm:$0xff] %v5508_v54 }
 0x48d   : > { %1458 = vrot.lane.b32.xlu1 %v1449_v37, %s8229_s30  ;;  %1574 = vrot.lane.b32.xlu0 %v5504_v44, %s7994_s21  ;;  %v1491_v37 = vrot.slane %v5488_v45, 4  ;;  %s8001_s21 = smov 104  }
 0x48f   : > { %v5514_v63 = vpop.permute.xlu1 %1124  ;;  %v5516_v46 = vpop.permute.xlu0 %1252 }
 0x490   : > { %8240 = vst [vmem:[#allocation35_spill] sm:$0xff] %v5514_v63  ;;  %8241 = vst [vmem:[#allocation36_spill] sm:$0xff] %v5516_v46 }
 0x491   : > { %1479 = vrot.lane.b32.xlu1 %v1470_v18, %s8228_s20  ;;  %1441 = vrot.lane.b32.xlu0 %v1430_v47, %s8227_s16  ;;  %v1512_v18 = vrot.slane %v5488_v45, 5  ;;  %v1514_v47 = vrot.slane %v5490_v51, 5 }
 0x493   : > { %v5522_v54 = vpop.permute.xlu1 %1166  ;;  %v5524_v21 = vpop.permute.xlu0 %1263 }
 0x494   : > { %8242 = vst [vmem:[#allocation37_spill] sm:$0xff] %v5522_v54  ;;  %8243 = vst [vmem:[#allocation38_spill] sm:$0xff] %v5524_v21 }
 0x495   : > { %1500 = vrot.lane.b32.xlu1 %v1491_v37, %s8231_s23  ;;  %1483 = vrot.lane.b32.xlu0 %v1472_v42, %s8228_s20  ;;  %v1533_v37 = vrot.slane %v5488_v45, 6  ;;  %v1556_v42 = vrot.slane %v5490_v51, 7 }
 0x497   : > { %v5530_v63 = vpop.permute.xlu1 %1208  ;;  %v5532_v46 = vpop.permute.xlu0 %1261 }
 0x498   : > { %8244 = vst [vmem:[#allocation39_spill] sm:$0xff] %v5530_v63  ;;  %8245 = vst [vmem:[#allocation40_spill] sm:$0xff] %v5532_v46  ;;  %v1593_v46 = vrot.slane %v5494_v49, 1 }
 0x499   : > { %1521 = vrot.lane.b32.xlu1 %v1512_v18, %s8230_s0  ;;  %1525 = vrot.lane.b32.xlu0 %v1514_v47, %s8230_s0  ;;  %v1554_v18 = vrot.slane %v5488_v45, 7  ;;  %v1614_v47 = vrot.slane %v5494_v49, 2  ;;  %v1635_v45 = vrot.slane %v5494_v49, 3  ;;  %s8072_s0 = smov 62  }
 0x49b   : > { %v5538_v21 = vpop.permute.xlu1 %1250  ;;  %v5540_v54 = vpop.permute.xlu0 %1309 }
 0x49c   : > { %8246 = vst [vmem:[#allocation41_spill] sm:$0xff] %v5538_v21  ;;  %8247 = vst [vmem:[#allocation42_spill] sm:$0xff] %v5540_v54 }
 0x49d   : > { %1542 = vrot.lane.b32.xlu1 %v1533_v37, %s8236_s14  ;;  %1567 = vrot.lane.b32.xlu0 %v1556_v42, %s8235_s27  ;;  %v1451_v42 = vrot.slane %v5490_v51, 2 }
 0x49f   : > { %v5547_v63 = vpop.permute.xlu1 %1259  ;;  %v5549_v34 = vpop.permute.xlu0 %1351 }
 0x4a0   : > { %8248 = vst [vmem:[#allocation43_spill] sm:$0xff] %v5547_v63  ;;  %8249 = vst [vmem:[#allocation44_spill] sm:$0xff] %v5549_v34 }
 0x4a1   : > { %1563 = vrot.lane.b32.xlu1 %v1554_v18, %s8235_s27  ;;  %1603 = vrot.lane.b32.xlu0 %v1593_v46, %s8001_s21  ;;  %v1493_v46 = vrot.slane %v5490_v51, 4  ;;  %s8009_s21 = smov 87   ;;  %s8274_s27 = smov 84  }
 0x4a3   : > { %v5555_v54 = vpop.permute.xlu1 %1147  ;;  %v5557_v37 = vpop.permute.xlu0 %1393 }
 0x4a4   : > { %8250 = vst [vmem:[#allocation45_spill] sm:$0xff] %v5555_v54  ;;  %8251 = vst [vmem:[#allocation46_spill] sm:$0xff] %v5557_v37 }
 0x4a5   : > { %1462 = vrot.lane.b32.xlu1 %v1451_v42, %s8229_s30  ;;  %1624 = vrot.lane.b32.xlu0 %v1614_v47, %s8005_s24  ;;  %v1535_v42 = vrot.slane %v5490_v51, 6  ;;  %v1656_v47 = vrot.slane %v5494_v49, 4  ;;  %s8014_s24 = smov 86  }
 0x4a7   : > { %v5563_v34 = vpop.permute.xlu1 %1189  ;;  %v5565_v18 = vpop.permute.xlu0 %1286 }
 0x4a8   : > { %8252 = vst [vmem:[#allocation47_spill] sm:$0xff] %v5563_v34  ;;  %8253 = vst [vmem:[#allocation48_spill] sm:$0xff] %v5565_v18  ;;  %v1633_v34 = vrot.slane %v5504_v44, 3 }
 0x4a9   : > { %1504 = vrot.lane.b32.xlu1 %v1493_v46, %s8231_s23  ;;  %1645 = vrot.lane.b32.xlu0 %v1635_v45, %s8009_s21  ;;  %v1677_v46 = vrot.slane %v5494_v49, 5  ;;  %v5583_v45 = vpop.f32.mrf.mxu1  ;;  %s8258_s21 = smov 105   ;;  %s8303_s23 = smov 81  }
 0x4ab   : > { %v5570_v37 = vpop.permute.xlu1 %1231  ;;  %v5572_v63 = vpop.permute.xlu0 %1307 }
 0x4ac   : > { %8254 = vst [vmem:[#allocation49_spill] sm:$0xff] %v5570_v37  ;;  %8255 = vst [vmem:[#allocation50_spill] sm:$0xff] %v5572_v63  ;;  %v1698_v63 = vrot.slane %v5494_v49, 6 }
 0x4ad   : > { %1546 = vrot.lane.b32.xlu1 %v1535_v42, %s8236_s14  ;;  %1666 = vrot.lane.b32.xlu0 %v1656_v47, %s8014_s24  ;;  %v1591_v47 = vrot.slane %v5504_v44, 1  ;;  %s8261_s24 = smov 104   ;;  %s8300_s14 = smov 82  }
 0x4af   : > { %v5578_v18 = vpop.permute.xlu1 %1284  ;;  %v5580_v21 = vpop.permute.xlu0 %1328 }
 0x4b0   : > { %8256 = vst [vmem:[#allocation51_spill] sm:$0xff] %v5578_v18  ;;  %8257 = vst [vmem:[#allocation52_spill] sm:$0xff] %v5580_v21 }
 0x4b1   : > { %1576 = vrot.lane.b32.xlu1 %v5583_v45, %s8258_s21  ;;  %1687 = vrot.lane.b32.xlu0 %v1677_v46, %s8020_s12  ;;  %v1719_v46 = vrot.slane %v5494_v49, 7  ;;  %s8264_s12 = smov 87  }
 0x4b3   : > { %v5588_v51 = vpop.permute.xlu1 %1305  ;;  %v5590_v42 = vpop.permute.xlu0 %1349 }
 0x4b4   : > { %8259 = vst [vmem:[#allocation53_spill] sm:$0xff] %v5588_v51  ;;  %8260 = vst [vmem:[#allocation54_spill] sm:$0xff] %v5590_v42 }
 0x4b5   : > { %1599 = vrot.lane.b32.xlu1 %v1591_v47, %s8261_s24  ;;  %1708 = vrot.lane.b32.xlu0 %v1698_v63, %s8025_s10  ;;  %v1675_v47 = vrot.slane %v5504_v44, 5  ;;  %v1612_v63 = vrot.slane %v5504_v44, 2  ;;  %s8267_s10 = smov 85  }
 0x4b7   : > { %v5596_v18 = vpop.permute.xlu1 %1326  ;;  %v5598_v21 = vpop.permute.xlu0 %1370 }
 0x4b8   : > { %8262 = vst [vmem:[#allocation55_spill] sm:$0xff] %v5596_v18  ;;  %8263 = vst [vmem:[#allocation56_spill] sm:$0xff] %v5598_v21  ;;  %v5625_v18 = vpop.f32.mrf.mxu0 }
 0x4b9   : > { %1641 = vrot.lane.b32.xlu1 %v1633_v34, %s8264_s12  ;;  %1729 = vrot.lane.b32.xlu0 %v1719_v46, %s8037_s11  ;;  %v1717_v34 = vrot.slane %v5504_v44, 7  ;;  %v1654_v46 = vrot.slane %v5504_v44, 4  ;;  %v1636_v54 = vrot.slane %v5625_v18, 3 }
 0x4bb   : > { %v5604_v42 = vpop.permute.xlu1 %1347  ;;  %v5606_v51 = vpop.permute.xlu0 %1391 }
 0x4bc   : > { %8265 = vst [vmem:[#allocation57_spill] sm:$0xff] %v5604_v42  ;;  %8266 = vst [vmem:[#allocation58_spill] sm:$0xff] %v5606_v51 }
 0x4bd   : > { %1683 = vrot.lane.b32.xlu1 %v1675_v47, %s8267_s10  ;;  %1620 = vrot.lane.b32.xlu0 %v1612_v63, %s8268_s13  ;;  %v1696_v47 = vrot.slane %v5504_v44, 6  ;;  %v5630_v63 = vpop.f32.mrf.mxu0  ;;  %v5640_v44 = vpop.f32.mrf.mxu1 }
 0x4bf   : > { %v5612_v21 = vpop.permute.xlu1 %1368  ;;  %v5614_v49 = vpop.permute.xlu0 %1412 }
 0x4c0   : > { %8269 = vst [vmem:[#allocation59_spill] sm:$0xff] %v5612_v21  ;;  %8270 = vst [vmem:[#allocation60_spill] sm:$0xff] %v5614_v49  ;;  %v1594_v49 = vrot.slane %v5625_v18, 1 }
 0x4c1   : > { %1725 = vrot.lane.b32.xlu1 %v1717_v34, %s8037_s11  ;;  %1662 = vrot.lane.b32.xlu0 %v1654_v46, %s8271_s25  ;;  %v1592_v46 = vrot.slane %v5583_v45, 1  ;;  %s8054_s11 = smov 82  }
 0x4c3   : > { %v5620_v42 = vpop.permute.xlu1 %1389  ;;  %v5622_v51 = vpop.permute.xlu0 %1290 }
 0x4c4   : > { %8272 = vst [vmem:[#allocation61_spill] sm:$0xff] %v5620_v42  ;;  %8273 = vst [vmem:[#allocation62_spill] sm:$0xff] %v5622_v51 }
 0x4c5   : > { %1580 = vrot.lane.b32.xlu1 %v5625_v18, %s8258_s21  ;;  %1704 = vrot.lane.b32.xlu0 %v1696_v47, %s8274_s27  ;;  %v1613_v47 = vrot.slane %v5583_v45, 2  ;;  %s8292_s21 = smov 65  }
 0x4c7   : > { %v5632_v21 = vpop.permute.xlu1 %1410  ;;  %v5634_v34 = vpop.permute.xlu0 %1332 }
 0x4c8   : > { %8275 = vst [vmem:[#allocation63_spill] sm:$0xff] %v5632_v21  ;;  %8276 = vst [vmem:[#allocation64_spill] sm:$0xff] %v5634_v34  ;;  %v1634_v21 = vrot.slane %v5583_v45, 3 }
 0x4c9   : > { %1601 = vrot.lane.b32.xlu1 %v1592_v46, %s8261_s24  ;;  %1742 = vrot.lane.b32.xlu0 %v5630_v63, %s8054_s11 }
 0x4cb   : > { %v5642_v51 = vpop.permute.xlu1 %1265  ;;  %v5644_v42 = vpop.permute.xlu0 %1374 }
 0x4cc   : > { %8277 = vst [vmem:[#allocation65_spill] sm:$0xff] %v5642_v51  ;;  %8278 = vst [vmem:[#allocation66_spill] sm:$0xff] %v5644_v42 }
 0x4cd   : > { %1622 = vrot.lane.b32.xlu1 %v1613_v47, %s8268_s13  ;;  %1738 = vrot.lane.b32.xlu0 %v5640_v44, %s8054_s11  ;;  %v1655_v47 = vrot.slane %v5583_v45, 4  ;;  %s8059_s11 = smov 81  }
 0x4cf   : > { %v5650_v34 = vpop.permute.xlu1 %1288  ;;  %v5652_v46 = vpop.permute.xlu0 %1416 }
 0x4d0   : > { %8279 = vst [vmem:[#allocation67_spill] sm:$0xff] %v5650_v34  ;;  %8280 = vst [vmem:[#allocation68_spill] sm:$0xff] %v5652_v46 }
 0x4d1   : > { %1643 = vrot.lane.b32.xlu1 %v1634_v21, %s8264_s12  ;;  %1605 = vrot.lane.b32.xlu0 %v1594_v49, %s8261_s24  ;;  %v1676_v21 = vrot.slane %v5583_v45, 5  ;;  %v1678_v49 = vrot.slane %v5625_v18, 5  ;;  %s8287_s24 = smov 83  }
 0x4d3   : > { %v5658_v42 = vpop.permute.xlu1 %1330  ;;  %v5660_v51 = vpop.permute.xlu0 %1439 }
 0x4d4   : > { %8281 = vst [vmem:[#allocation69_spill] sm:$0xff] %v5658_v42  ;;  %8282 = vst [vmem:[#allocation70_spill] sm:$0xff] %v5660_v51 }
 0x4d5   : > { %1664 = vrot.lane.b32.xlu1 %v1655_v47, %s8271_s25  ;;  %1647 = vrot.lane.b32.xlu0 %v1636_v54, %s8264_s12  ;;  %v1697_v47 = vrot.slane %v5583_v45, 6  ;;  %v1720_v54 = vrot.slane %v5625_v18, 7 }
 0x4d7   : > { %v5666_v46 = vpop.permute.xlu1 %1372  ;;  %v5668_v34 = vpop.permute.xlu0 %1460 }
 0x4d8   : > { %8283 = vst [vmem:[#allocation71_spill] sm:$0xff] %v5666_v46  ;;  %8284 = vst [vmem:[#allocation72_spill] sm:$0xff] %v5668_v34  ;;  %v1757_v34 = vrot.slane %v5630_v63, 1 }
 0x4d9   : > { %1685 = vrot.lane.b32.xlu1 %v1676_v21, %s8267_s10  ;;  %1689 = vrot.lane.b32.xlu0 %v1678_v49, %s8267_s10  ;;  %v1718_v21 = vrot.slane %v5583_v45, 7  ;;  %v1778_v49 = vrot.slane %v5630_v63, 2 }
 0x4db   : > { %v5674_v51 = vpop.permute.xlu1 %1414  ;;  %v5676_v42 = vpop.permute.xlu0 %1481 }
 0x4dc   : > { %8285 = vst [vmem:[#allocation73_spill] sm:$0xff] %v5674_v51  ;;  %8286 = vst [vmem:[#allocation74_spill] sm:$0xff] %v5676_v42 }
 0x4dd   : > { %1706 = vrot.lane.b32.xlu1 %v1697_v47, %s8274_s27  ;;  %1731 = vrot.lane.b32.xlu0 %v1720_v54, %s8287_s24  ;;  %v1615_v54 = vrot.slane %v5625_v18, 2 }
 0x4df   : > { %v5683_v46 = vpop.permute.xlu1 %1311  ;;  %v5685_v37 = vpop.permute.xlu0 %1502 }
 0x4e0   : > { %8288 = vst [vmem:[#allocation75_spill] sm:$0xff] %v5683_v46  ;;  %8289 = vst [vmem:[#allocation76_spill] sm:$0xff] %v5685_v37  ;;  %v1798_v37 = vrot.slane %v5630_v63, 3  ;;  %v5719_v46 = vpop.f32.mrf.mxu1 }
 0x4e1   : > { %1727 = vrot.lane.b32.xlu1 %v1718_v21, %s8287_s24  ;;  %1767 = vrot.lane.b32.xlu0 %v1757_v34, %s8059_s11  ;;  %v1657_v34 = vrot.slane %v5625_v18, 4  ;;  %s8295_s11 = smov 64  }
 0x4e3   : > { %v5691_v42 = vpop.permute.xlu1 %1353  ;;  %v5693_v47 = vpop.permute.xlu0 %1523 }
 0x4e4   : > { %8290 = vst [vmem:[#allocation77_spill] sm:$0xff] %v5691_v42  ;;  %8291 = vst [vmem:[#allocation78_spill] sm:$0xff] %v5693_v47 }
 0x4e5   : > { %1626 = vrot.lane.b32.xlu1 %v1615_v54, %s8268_s13  ;;  %1788 = vrot.lane.b32.xlu0 %v1778_v49, %s8292_s21  ;;  %v1699_v54 = vrot.slane %v5625_v18, 6  ;;  %v1818_v49 = vrot.slane %v5630_v63, 4 }
 0x4e7   : > { %v5699_v45 = vpop.permute.xlu1 %1395  ;;  %v5701_v21 = vpop.permute.xlu0 %1544 }
 0x4e8   : > { %8293 = vst [vmem:[#allocation79_spill] sm:$0xff] %v5699_v45  ;;  %8294 = vst [vmem:[#allocation80_spill] sm:$0xff] %v5701_v21 }
 0x4e9   : > { %1668 = vrot.lane.b32.xlu1 %v1657_v34, %s8271_s25  ;;  %1808 = vrot.lane.b32.xlu0 %v1798_v37, %s8295_s11  ;;  %v1838_v34 = vrot.slane %v5630_v63, 5 }
 0x4eb   : > { %v5706_v42 = vpop.permute.xlu1 %1435  ;;  %v5708_v47 = vpop.permute.xlu0 %1565 }
 0x4ec   : > { %8296 = vst [vmem:[#allocation81_spill] sm:$0xff] %v5706_v42  ;;  %8297 = vst [vmem:[#allocation82_spill] sm:$0xff] %v5708_v47  ;;  %v1796_v42 = vrot.slane %v5640_v44, 3 }
 0x4ed   : > { %1710 = vrot.lane.b32.xlu1 %v1699_v54, %s8274_s27  ;;  %1828 = vrot.lane.b32.xlu0 %v1818_v49, %s8216_s17  ;;  %v1755_v54 = vrot.slane %v5640_v44, 1  ;;  %v1859_v49 = vrot.slane %v5630_v63, 6 }
 0x4ef   : > { %v5714_v45 = vpop.permute.xlu1 %1477  ;;  %v5716_v21 = vpop.permute.xlu0 %1456 }
 0x4f0   : > { %8298 = vst [vmem:[#allocation83_spill] sm:$0xff] %v5714_v45  ;;  %8299 = vst [vmem:[#allocation84_spill] sm:$0xff] %v5716_v21 }
 0x4f1   : > { %1740 = vrot.lane.b32.xlu1 %v5719_v46, %s8300_s14  ;;  %1848 = vrot.lane.b32.xlu0 %v1838_v34, %s8072_s0  ;;  %v1880_v34 = vrot.slane %v5630_v63, 7  ;;  %s4865_s0 = smov 60  }
 0x4f3   : > { %v5724_v37 = vpop.permute.xlu1 %1519  ;;  %v5726_v18 = vpop.permute.xlu0 %1498 }
 0x4f4   : > { %8301 = vst [vmem:[#allocation85_spill] sm:$0xff] %v5724_v37  ;;  %8302 = vst [vmem:[#allocation86_spill] sm:$0xff] %v5726_v18 }
 0x4f5   : > { %1763 = vrot.lane.b32.xlu1 %v1755_v54, %s8303_s23  ;;  %1869 = vrot.lane.b32.xlu0 %v1859_v49, %s8076_s19  ;;  %v1836_v54 = vrot.slane %v5640_v44, 5  ;;  %v1776_v49 = vrot.slane %v5640_v44, 2  ;;  %s8308_s19 = smov 62  }
 0x4f7   : > { %v5732_v45 = vpop.permute.xlu1 %1561  ;;  %v5734_v21 = vpop.permute.xlu0 %1540 }
 0x4f8   : > { %8304 = vst [vmem:[#allocation87_spill] sm:$0xff] %v5732_v45  ;;  %8305 = vst [vmem:[#allocation88_spill] sm:$0xff] %v5734_v21 }
 0x4f9   : > { %1804 = vrot.lane.b32.xlu1 %v1796_v42, %s8295_s11  ;;  %1890 = vrot.lane.b32.xlu0 %v1880_v34, %s4865_s0  ;;  %v1878_v42 = vrot.slane %v5640_v44, 7  ;;  %v1816_v34 = vrot.slane %v5640_v44, 4 }
 0x4fb   : > { %v5740_v18 = vpop.permute.xlu1 %1437  ;;  %v5742_v37 = vpop.permute.xlu0 %1578 }
 0x4fc   : > { %8306 = vst [vmem:[#allocation89_spill] sm:$0xff] %v5740_v18  ;;  %8307 = vst [vmem:[#allocation90_spill] sm:$0xff] %v5742_v37  ;;  %v920_v18 = vpop.f32.mrf.mxu0 }
 0x4fd   : > { %1844 = vrot.lane.b32.xlu1 %v1836_v54, %s8308_s19  ;;  %1784 = vrot.lane.b32.xlu0 %v1776_v49, %s8292_s21  ;;  %v1857_v54 = vrot.slane %v5640_v44, 6  ;;  %v1777_v44 = vrot.slane %v5719_v46, 2 }
 0x4ff   : > { %v5748_v21 = vpop.permute.xlu1 %1458  ;;  %v5750_v63 = vpop.permute.xlu0 %1574 }
 0x500   : > { %8309 = vst [vmem:[#allocation91_spill] sm:$0xff] %v5748_v21  ;;  %8310 = vst [vmem:[#allocation92_spill] sm:$0xff] %v5750_v63  ;;  %v1756_v21 = vrot.slane %v5719_v46, 1 }
 0x501   : > { %1886 = vrot.lane.b32.xlu1 %v1878_v42, %s4865_s0  ;;  %1824 = vrot.lane.b32.xlu0 %v1816_v34, %s8216_s17  ;;  %v1758_v42 = vrot.slane %v920_v18, 1 }
 0x503   : > { %v5756_v37 = vpop.permute.xlu1 %1479  ;;  %v5758_v45 = vpop.permute.xlu0 %1441 }
 0x504   : > { %8311 = vst [vmem:[#allocation93_spill] sm:$0xff] %v5756_v37  ;;  %8312 = vst [vmem:[#allocation94_spill] sm:$0xff] %v5758_v45  ;;  %v1799_v37 = vrot.slane %v920_v18, 3 }
 0x505   : > { %1744 = vrot.lane.b32.xlu1 %v920_v18, %s8300_s14  ;;  %1865 = vrot.lane.b32.xlu0 %v1857_v54, %s8313_s29 }
 0x507   : > { %v5763_v49 = vpop.permute.xlu1 %1500  ;;  %v5765_v63 = vpop.permute.xlu0 %1483 }
 0x508   : > { %8314 = vst [vmem:[#allocation95_spill] sm:$0xff] %v5763_v49  ;;  %8315 = vst [vmem:[#allocation96_spill] sm:$0xff] %v5765_v63  ;;  %v1797_v49 = vrot.slane %v5719_v46, 3 }
 0x509   : > { %1765 = vrot.lane.b32.xlu1 %v1756_v21, %s8303_s23  ;;  %1769 = vrot.lane.b32.xlu0 %v1758_v42, %s8303_s23  ;;  %v1839_v21 = vrot.slane %v920_v18, 5  ;;  %s8525_s23 = smov 44  }
 0x50b   : > { %v5770_v34 = vpop.permute.xlu1 %1521  ;;  %v5772_v45 = vpop.permute.xlu0 %1525 }
 0x50c   : > { %8316 = vst [vmem:[#allocation97_spill] sm:$0xff] %v5770_v34  ;;  %8317 = vst [vmem:[#allocation98_spill] sm:$0xff] %v5772_v45  ;;  %v1817_v34 = vrot.slane %v5719_v46, 4 }
 0x50d   : > { %1786 = vrot.lane.b32.xlu1 %v1777_v44, %s8292_s21  ;;  %1810 = vrot.lane.b32.xlu0 %v1799_v37, %s8295_s11  ;;  %v1881_v44 = vrot.slane %v920_v18, 7  ;;  %v924_v37 = vpop.f32.mrf.mxu0 }
 0x50f   : > { %v5777_v54 = vpop.permute.xlu1 %1542  ;;  %v5779_v63 = vpop.permute.xlu0 %1567 }
 0x510   : > { %8318 = vst [vmem:[#allocation99_spill] sm:$0xff] %v5777_v54  ;;  %8319 = vst [vmem:[#allocation100_spill] sm:$0xff] %v5779_v63 }
 0x511   : > { %1806 = vrot.lane.b32.xlu1 %v1797_v49, %s8295_s11  ;;  %1850 = vrot.lane.b32.xlu0 %v1839_v21, %s8308_s19  ;;  %v1837_v49 = vrot.slane %v5719_v46, 5  ;;  %s4866_s11 = smov 59   ;;  %v926_v21 = vpop.f32.mrf.mxu0 }
 0x513   : > { %v5784_v42 = vpop.permute.xlu1 %1563  ;;  %v5786_v45 = vpop.permute.xlu0 %1603 }
 0x514   : > { %8320 = vst [vmem:[#allocation101_spill] sm:$0xff] %v5784_v42  ;;  %8321 = vst [vmem:[#allocation102_spill] sm:$0xff] %v5786_v45 }
 0x515   : > { %1826 = vrot.lane.b32.xlu1 %v1817_v34, %s8216_s17  ;;  %1892 = vrot.lane.b32.xlu0 %v1881_v44, %s4865_s0  ;;  %v1858_v34 = vrot.slane %v5719_v46, 6 }
 0x517   : > { %v5791_v63 = vpop.permute.xlu1 %1462  ;;  %v5793_v54 = vpop.permute.xlu0 %1624 }
 0x518   : > { %8322 = vst [vmem:[#allocation103_spill] sm:$0xff] %v5791_v63  ;;  %8323 = vst [vmem:[#allocation104_spill] sm:$0xff] %v5793_v54 }
 0x519   : > { %1846 = vrot.lane.b32.xlu1 %v1837_v49, %s8308_s19  ;;  %1903 = vrot.lane.b32.xlu0 %v924_v37, %s4866_s11  ;;  %v1879_v49 = vrot.slane %v5719_v46, 7 }
 0x51b   : > { %v5798_v45 = vpop.permute.xlu1 %1504  ;;  %v5800_v42 = vpop.permute.xlu0 %1645 }
 0x51c   : > { %8324 = vst [vmem:[#allocation105_spill] sm:$0xff] %v5798_v45  ;;  %8325 = vst [vmem:[#allocation106_spill] sm:$0xff] %v5800_v42  ;;  %v1779_v42 = vrot.slane %v920_v18, 2 }
 0x51d   : > { %1867 = vrot.lane.b32.xlu1 %v1858_v34, %s8313_s29  ;;  %1905 = vrot.lane.b32.xlu0 %v926_v21, %s4866_s11  ;;  %v1819_v21 = vrot.slane %v920_v18, 4 }
 0x51f   : > { %v5805_v44 = vpop.permute.xlu1 %1546  ;;  %v5807_v54 = vpop.permute.xlu0 %1666 }
 0x520   : > { %8326 = vst [vmem:[#allocation107_spill] sm:$0xff] %v5805_v44  ;;  %8327 = vst [vmem:[#allocation108_spill] sm:$0xff] %v5807_v54  ;;  %v817_v44 = vpop.f32.mrf.mxu1 }
 0x521   : > { %1888 = vrot.lane.b32.xlu1 %v1879_v49, %s4865_s0  ;;  %v1860_v49 = vrot.slane %v920_v18, 6  ;;  %s4389_s0 = sshll.u32 %s5036_s15, 5 }
 0x522   : > { %s5840_s14 = scalar_lea.vmem %s8338_s1, %s4389_s0  ;;  %s8524_s1 = smov 45  }
 0x523   : > { %v5811_v37 = vpop.permute.xlu1 %1576  ;;  %v5813_v63 = vpop.permute.xlu0 %1687  ;;  %v2336_v18 = vld [vmem:[%s5840_s14] sm:$0xff]  ;;  %s4868_s0 = smov 39  }
 0x524   : > { %8328 = vst [vmem:[#allocation109_spill] sm:$0xff] %v5811_v37  ;;  %8329 = vst [vmem:[#allocation110_spill] sm:$0xff] %v5813_v63 }
 0x525   : > { %1790 = vrot.lane.b32.xlu1 %v1779_v42, %s8292_s21  ;;  %v819_v42 = vpop.f32.mrf.mxu1  ;;  %s4869_s21 = smov 31  }
 0x527   : > { %v5816_v45 = vpop.permute.xlu1 %1599  ;;  %v5818_v34 = vpop.permute.xlu0 %1708 }
 0x528   : > { %8330 = vst [vmem:[#allocation111_spill] sm:$0xff] %v5816_v45  ;;  %8331 = vst [vmem:[#allocation112_spill] sm:$0xff] %v5818_v34 }
 0x529   : > { %1830 = vrot.lane.b32.xlu1 %v1819_v21, %s8216_s17  ;;  %v2337_v21 = vld [vmem:[%s5840_s14 + $0x8] sm:$0xff]  ;;  %s6873_s17 = sand.u32 1, %s4809_s22  }
 0x52a   : > { %s4277_s19 = sshll.u32 %s6873_s17, 6 }
 0x52b   : > { %v5821_v54 = vpop.permute.xlu1 %1641  ;;  %v5823_v46 = vpop.permute.xlu0 %1729 }
 0x52c   : > { %8332 = vst [vmem:[#allocation113_spill] sm:$0xff] %v5821_v54  ;;  %8333 = vst [vmem:[#allocation114_spill] sm:$0xff] %v5823_v46 }
 0x52d   : > { %1871 = vrot.lane.b32.xlu1 %v1860_v49, %s8313_s29  ;;  %s8526_s29 = smov 43  }
 0x52f   : > { %v5826_v63 = vpop.permute.xlu1 %1683  ;;  %v5828_v37 = vpop.permute.xlu0 %1620 }
 0x530   : > { %8334 = vst [vmem:[#allocation115_spill] sm:$0xff] %v5826_v63  ;;  %8335 = vst [vmem:[#allocation116_spill] sm:$0xff] %v5828_v37 }
 0x531   : > { %1901 = vrot.lane.b32.xlu1 %v819_v42, %s4866_s11  ;;  %v2340_v42 = vadd.f32 %v2337_v21, %v2336_v18 }
 0x533   : > { %v5832_v34 = vpop.permute.xlu1 %1725  ;;  %v5834_v45 = vpop.permute.xlu0 %1662 }
 0x534   : > { %8336 = vst [vmem:[#allocation117_spill] sm:$0xff] %v5832_v34  ;;  %8337 = vst [vmem:[#allocation118_spill] sm:$0xff] %v5834_v45  ;;  %v937_v45 = vlaneseq }
 0x535   : > { %1899 = vrot.lane.b32.xlu1 %v817_v44, %s4866_s11  ;;  %s6876_s11 = scalar_lea.vmem [#allocation2], %s4277_s19  ;;  %s4867_s19 = smov 40  }
 0x536   : > { %v5856_v54 = vand.u32 127, %v937_v45  ;;  %v2111_v47 = vshrl.u32 %v937_v45, 7 }
 0x537   : > { %v5844_v49 = vpop.permute.xlu1 %1580  ;;  %v5846_v63 = vpop.permute.xlu0 %1704 }
 0x538   : > { %8339 = vst [vmem:[#allocation119_spill] sm:$0xff] %v5844_v49  ;;  %8340 = vst [vmem:[#allocation120_spill] sm:$0xff] %v5846_v63  ;;  %vm1090_vm4 = vcmp.lt.s32.totalorder %v5856_v54, 47  ;;  %vm1048_vm5 = vcmp.lt.s32.totalorder %v5856_v54, 64  ;;  %vm8129_vm6 = vcmp.lt.s32.totalorder %v5856_v54, 63  ;;  %v5865_v18 = vsub.s32 0, %v2111_v47 }
 0x539   : > { %v1093_v21 = vsel %vm1090_vm4, %v5340_v35, %v5342_v36  ;;  %vm8130_vm7 = vcmp.lt.s32.totalorder %v5856_v54, 65  ;;  %v1051_v45 = vsel %vm1048_vm5, %v5324_v26, %v5326_v28  ;;  %vm964_vm8 = vcmp.lt.s32.totalorder %v5856_v54, 68 }
 0x53a   : > { %8345 = vst [vmem:[#allocation125_spill] sm:$0xff] %v5865_v18  ;;  %vm939_vm9 = vcmp.lt.s32.totalorder %v5856_v54, 69  ;;  %v5888_v63 = vrot.slane %v5264_v62, %v5865_v18  ;;  %vm1006_vm10 = vcmp.lt.s32.totalorder %v5856_v54, 66  ;;  %vm985_vm11 = vcmp.lt.s32.totalorder %v5856_v54, 67 }
 0x53b   : > { %v5848_v37 = vpop.permute.xlu1 %1601  ;;  %v5850_v34 = vpop.permute.xlu0 %1742  ;;  %v968_v62 = vsel %vm964_vm8, %v5350_v40, %v5293_v11  ;;  %vm8134_vm12 = vcmp.lt.s32.totalorder %v5856_v54, 43  ;;  %vm8132_vm13 = vcmp.lt.s32.totalorder %v5856_v54, 41  ;;  %vm1254_vm14 = vcmp.lt.s32.totalorder %v5856_v54, 24 }
 0x53c   : > { %8341 = vst [vmem:[#allocation121_spill] sm:$0xff] %v5850_v34  ;;  %2341 = vadd.xlane.f32.xlu0 %v2340_v42  ;;  %v1072_v42 = vsel %vm8129_vm6, %v5332_v31, %v5334_v32  ;;  %8348 = vst [vmem:[#allocation128_spill] sm:$0xff] %v5888_v63  ;;  %v1009_v63 = vsel %vm1006_vm10, %v5309_v19, %v5311_v20  ;;  %vm8133_vm15 = vcmp.lt.s32.totalorder %v5856_v54, 45  ;;  %vm1103_vm3 = vcmp.lt.s32.totalorder %v5856_v54, 46 }
 0x53d   : > { %v1925_v34 = vadd.f32 %v1093_v21, %v1072_v42  ;;  %v941_v21 = vsel %vm939_vm9, %v5284_v7, %v5274_v3  ;;  %vm8131_vm2 = vcmp.lt.s32.totalorder %v5856_v54, 25  ;;  %vm8136_vm0 = vcmp.lt.s32.totalorder %v5856_v54, 42 }
 0x53e   : > { %vm8148_vm1 = vcmp.lt.s32.totalorder %v5856_v54, 2 }
 0x53f   : > { %v5852_v44 = vpop.permute.xlu1 %1622  ;;  %v5854_v46 = vpop.permute.xlu0 %1738 }
 0x540   : > { %8342 = vst [vmem:[#allocation122_spill] sm:$0xff] %v5852_v44  ;;  %8343 = vst [vmem:[#allocation123_spill] sm:$0xff] %v5854_v46  ;;  %v1030_v44 = vsel %vm8130_vm7, %v5316_v22, %v5318_v23 }
 0x543   : > { %v5859_v51 = vpop.permute.xlu1 %1643  ;;  %v5861_v49 = vpop.permute.xlu0 %1605 }
 0x544   : > { %8344 = vst [vmem:[#allocation124_spill] sm:$0xff] %v5861_v49  ;;  %v1921_v49 = vadd.f32 %v1051_v45, %v1030_v44  ;;  %v942_v44 = vsel %vm939_vm9, %v5276_v4, %v5284_v7  ;;  %v965_v45 = vsel %vm964_vm8, %v5356_v43, %v5350_v40  ;;  %v1071_v7 = vsel %vm8129_vm6, %v5334_v32, %v5303_v17 }
 0x545   : > { %v988_v32 = vsel %vm985_vm11, %v5301_v16, %v5400_v2 }
 0x546   : > { %v5935_v40 = vadd.f32 %v1925_v34, %v1921_v49  ;;  %v1917_v49 = vadd.f32 %v1009_v63, %v988_v32 }
 0x547   : > { %v5881_v47 = vpop.permute.xlu1 %1664  ;;  %v5883_v46 = vpop.permute.xlu0 %1647 }
 0x548   : > { %8346 = vst [vmem:[#allocation126_spill] sm:$0xff] %v5881_v47  ;;  %8347 = vst [vmem:[#allocation127_spill] sm:$0xff] %v5883_v46  ;;  %v943_v46 = vsel %vm939_vm9, %v5348_v39, %v5276_v4  ;;  %v1029_v4 = vsel %vm8130_vm7, %v5318_v23, %v5295_v12  ;;  %v987_v23 = vsel %vm985_vm11, %v5400_v2, %v5286_v8 }
 0x549   : > { %v1912_v47 = vadd.f32 %v968_v62, %v943_v46  ;;  %v1050_v46 = vsel %vm1048_vm5, %v5326_v28, %v5374_v60  ;;  %v1008_v2 = vsel %vm1006_vm10, %v5311_v20, %v5364_v55  ;;  %v967_v28 = vsel %vm964_vm8, %v5293_v11, %v5390_v13 }
 0x54a   : > { %v1073_v11 = vsel %vm8129_vm6, %v5433_v9, %v5332_v31  ;;  %v1094_v62 = vsel %vm1090_vm4, %v5376_v61, %v5340_v35  ;;  %v1913_v63 = vadd.f32 %v967_v28, %v942_v44  ;;  %v986_v31 = vsel %vm985_vm11, %v5286_v8, %v5417_v41 }
 0x54b   : > { %v5919_v42 = vpop.permute.xlu1 %1685  ;;  %v5921_v18 = vpop.permute.xlu0 %1689  ;;  %v1091_v35 = vsel %vm1090_vm4, %v5382_v5, %v5376_v61  ;;  %v1924_v44 = vadd.f32 %v1094_v62, %v1073_v11  ;;  %v1194_v62 = vsel %vm8136_vm0, %v5466_v59, %v5451_v53 }
 0x54c   : > { %8349 = vst [vmem:[#allocation129_spill] sm:$0xff] %v5921_v18  ;;  %v940_v18 = vsel %vm939_vm9, %v5274_v3, %v5348_v39  ;;  %v1010_v3 = vsel %vm1006_vm10, %v5358_v48, %v5309_v19  ;;  %v1007_v39 = vsel %vm1006_vm10, %v5364_v55, %v5358_v48  ;;  %vm8135_vm9 = vcmp.lt.s32.totalorder %v5856_v54, 44 }
 0x54d   : > { %v1915_v34 = vadd.f32 %v965_v45, %v940_v18  ;;  %v1052_v19 = vsel %vm1048_vm5, %v5366_v56, %v5324_v26  ;;  %v966_v48 = vsel %vm964_vm8, %v5390_v13, %v5356_v43  ;;  %v1092_v26 = vsel %vm1090_vm4, %v5342_v36, %v5382_v5 }
 0x54e   : > { %v1918_v43 = vadd.f32 %v1008_v2, %v987_v23  ;;  %v1049_v13 = vsel %vm1048_vm5, %v5374_v60, %v5366_v56  ;;  %v1922_v18 = vadd.f32 %v1050_v46, %v1029_v4  ;;  %v989_v36 = vsel %vm985_vm11, %v5417_v41, %v5301_v16  ;;  %v2338_v60 = vld [vmem:[%s5840_s14 + $0x10] sm:$0xff]  ;;  %v2339_v4 = vld [vmem:[%s5840_s14 + $0x18] sm:$0xff] }
 0x54f   : > { %v5982_v20 = vpop.permute.xlu1 %1706  ;;  %v5984_v55 = vpop.permute.xlu0 %1731  ;;  %v1914_v45 = vadd.f32 %v966_v48, %v941_v21  ;;  %v1031_v56 = vsel %vm8130_vm7, %v5425_v57, %v5316_v22  ;;  %v1926_v16 = vadd.f32 %v1092_v26, %v1071_v7  ;;  %v1070_v21 = vsel %vm8129_vm6, %v5303_v17, %v5433_v9 }
 0x550   : > { %v2009_v23 = vadd.f32 %v1917_v49, %v1913_v63  ;;  %v1916_v32 = vadd.f32 %v1010_v3, %v989_v36  ;;  %v1257_v46 = vsel %vm1254_vm14, %v5496_v0, %v5476_v52  ;;  %v1919_v61 = vadd.f32 %v1007_v39, %v986_v31 }
 0x551   : > { %v2010_v22 = vadd.f32 %v1918_v43, %v1914_v45  ;;  %v1920_v5 = vadd.f32 %v1052_v19, %v1031_v56  ;;  %v1173_v17 = vsel %vm8134_vm12, %v5460_v1, %v5443_v29  ;;  %v2343_v9 = vadd.f32 %v2339_v4, %v2338_v60 }
 0x552   : > { %v1028_v7 = vsel %vm8130_vm7, %v5295_v12, %v5425_v57  ;;  %v1927_v2 = vadd.f32 %v1091_v35, %v1070_v21  ;;  %v1215_v3 = vsel %vm8132_vm13, %v5474_v14, %v5462_v30  ;;  %v1236_v39 = vsel %vm8131_vm2, %v5482_v50, %v5468_v27 }
 0x553   : > { %v6024_v8 = vpop.permute.xlu1 %1727  ;;  %v6026_v41 = vpop.permute.xlu0 %1767  ;;  %v2012_v19 = vadd.f32 %v1924_v44, %v1920_v5  ;;  %v1131_v48 = vsel %vm8133_vm15, %v5441_v25, %v5427_v58  ;;  %v1152_v12 = vsel %vm8135_vm9, %v5449_v38, %v5435_v10  ;;  %v1941_v57 = vadd.f32 %v1257_v46, %v1236_v39  ;;  %v8357_v46 = vld [vmem:[#allocation29_spill] sm:$0xff] }
 0x554   : > { %8350 = vst [vmem:[#allocation130_spill] sm:$0xff] %v6026_v41  ;;  %v2014_v49 = vadd.f32 %v1926_v16, %v1922_v18  ;;  %v1105_v43 = vsel %vm1103_vm3, %v5392_v15, %v5384_v6  ;;  %v1933_v11 = vadd.f32 %v1173_v17, %v1152_v12  ;;  %v1106_v36 = vsel %vm1103_vm3, %v5409_v33, %v5392_v15  ;;  %v8359_v17 = vld [vmem:[#allocation33_spill] sm:$0xff] }
 0x555   : > { %v2008_v63 = vadd.f32 %v1916_v32, %v1912_v47  ;;  %v1923_v45 = vadd.f32 %v1049_v13, %v1028_v7  ;;  %v1937_v31 = vadd.f32 %v1215_v3, %v1194_v62  ;;  %vm1418_vm4 = vcmp.lt.s32.totalorder %v5856_v54, 1  ;;  %v8361_v7 = vld [vmem:[#allocation36_spill] sm:$0xff]  ;;  %v8364_v39 = vld [vmem:[#allocation41_spill] sm:$0xff]  ;;  %v8368_v62 = vld [vmem:[#allocation39_spill] sm:$0xff] }
 0x556   : > { %v6074_v18 = vadd.f32 %v5935_v40, %v2009_v23  ;;  %v6076_v56 = vadd.f32 %v2014_v49, %v2010_v22  ;;  %v6078_v60 = vadd.f32 %v1919_v61, %v1915_v34  ;;  %v1929_v4 = vadd.f32 %v1131_v48, %v1106_v36  ;;  %v8354_v34 = vld [vmem:[#allocation26_spill] sm:$0xff]  ;;  %v8355_v23 = vld [vmem:[#allocation27_spill] sm:$0xff] }
 0x557   : > { %v6056_v28 = vpop.permute.xlu1 %1626  ;;  %v6058_v26 = vpop.permute.xlu0 %1788  ;;  %vm1334_vm8 = vcmp.lt.s32.totalorder %v5856_v54, 20  ;;  %v6081_v35 = vadd.f32 %v1927_v2, %v1923_v45  ;;  %v6083_v16 = vadd.f32 %v2012_v19, %v2008_v63  ;;  %v1151_v15 = vsel %vm8135_vm9, %v5435_v10, %v5402_v24  ;;  %v8356_v10 = vld [vmem:[#allocation49_spill] sm:$0xff] }
 0x558   : > { %8351 = vst [vmem:[#allocation131_spill] sm:$0xff] %v6058_v26  ;;  %8352 = vst [vmem:[#allocation132_spill] sm:$0xff] %v6076_v56  ;;  %v2021_v47 = vadd.f32 %v1941_v57, %v1937_v31  ;;  %vm8149_vm10 = vcmp.lt.s32.totalorder %v5856_v54, 3  ;;  %v1193_v21 = vsel %vm8136_vm0, %v5451_v53, %v8354_v34  ;;  %v2017_v44 = vadd.f32 %v1933_v11, %v1929_v4  ;;  %v8358_v53 = vld [vmem:[#allocation32_spill] sm:$0xff]  ;;  %v8366_v57 = vld [vmem:[#allocation35_spill] sm:$0xff] }
 0x559   : > { %2344 = vadd.xlane.f32.xlu1 %v2343_v9  ;;  %v1235_v22 = vsel %vm8131_vm2, %v5468_v27, %v8355_v23  ;;  %v1237_v32 = vsel %vm8131_vm2, %v8356_v10, %v5482_v50  ;;  %vm1292_vm11 = vcmp.lt.s32.totalorder %v5856_v54, 22  ;;  %v1132_v61 = vsel %vm8133_vm15, %v8357_v46, %v5441_v25  ;;  %v8360_v9 = vld [vmem:[#allocation34_spill] sm:$0xff]  ;;  %v8367_v11 = vld [vmem:[#allocation37_spill] sm:$0xff]  ;;  %v8426_v56 = vld [vmem:[#allocation76_spill] sm:$0xff] }
 0x55a   : > { %v1174_v5 = vsel %vm8134_vm12, %v8358_v53, %v5460_v1  ;;  %v1104_v27 = vsel %vm1103_vm3, %v5384_v6, %v8359_v17  ;;  %v1107_v50 = vsel %vm1103_vm3, %v8359_v17, %v5409_v33  ;;  %v1216_v25 = vsel %vm8132_vm13, %v8360_v9, %v5474_v14  ;;  %v8362_v6 = vld [vmem:[#allocation45_spill] sm:$0xff]  ;;  %v8363_v33 = vld [vmem:[#allocation47_spill] sm:$0xff]  ;;  %v8434_v26 = vld [vmem:[#allocation88_spill] sm:$0xff] }
 0x55b   : > { %v6090_v40 = vpop.permute.xlu1 %1668  ;;  %v6092_v13 = vpop.permute.xlu0 %1808  ;;  %v1258_v1 = vsel %vm1254_vm14, %v8361_v7, %v5496_v0  ;;  %vm1267_vm6 = vcmp.lt.s32.totalorder %v5856_v54, 23  ;;  %v1153_v2 = vsel %vm8135_vm9, %v8362_v6, %v5449_v38  ;;  %v1195_v3 = vsel %vm8136_vm0, %v8363_v33, %v5466_v59 }
 0x55c   : > { %8353 = vst [vmem:[#allocation133_spill] sm:$0xff] %v6092_v13  ;;  %vm1313_vm3 = vcmp.lt.s32.totalorder %v5856_v54, 21  ;;  %v2061_v14 = vadd.f32 %v2021_v47, %v2017_v44  ;;  %v1256_v0 = vsel %vm1254_vm14, %v5476_v52, %v8364_v39  ;;  %v1234_v19 = vsel %vm8131_vm2, %v8355_v23, %v8356_v10 }
 0x55d   : > { %v1940_v48 = vadd.f32 %v1258_v1, %v1237_v32  ;;  %vm1355_vm7 = vcmp.lt.s32.totalorder %v5856_v54, 19  ;;  %v1928_v59 = vadd.f32 %v1132_v61, %v1107_v50  ;;  %v1130_v49 = vsel %vm8133_vm15, %v5427_v58, %v8366_v57  ;;  %v8373_v1 = vld [vmem:[#allocation55_spill] sm:$0xff] }
 0x55e   : > { %v1172_v52 = vsel %vm8134_vm12, %v5443_v29, %v8367_v11  ;;  %v1214_v36 = vsel %vm8132_vm13, %v5462_v30, %v8368_v62  ;;  %v1255_v63 = vsel %vm1254_vm14, %v8364_v39, %v8361_v7  ;;  %v1932_v45 = vadd.f32 %v1174_v5, %v1153_v2  ;;  %v8370_v5 = vld [vmem:[#allocation60_spill] sm:$0xff]  ;;  %v8377_v39 = vld [vmem:[#allocation61_spill] sm:$0xff] }
 0x55f   : > { %v6151_v38 = vpop.permute.xlu1 %1710  ;;  %v6153_v12 = vpop.permute.xlu0 %1828  ;;  %v1192_v58 = vsel %vm8136_vm0, %v8354_v34, %v8363_v33  ;;  %v1936_v31 = vadd.f32 %v1216_v25, %v1195_v3  ;;  %v1129_v29 = vsel %vm8133_vm15, %v8366_v57, %v8357_v46  ;;  %v1942_v4 = vadd.f32 %v1256_v0, %v1235_v22  ;;  %v8372_v7 = vld [vmem:[#allocation52_spill] sm:$0xff]  ;;  %v8375_v3 = vld [vmem:[#allocation59_spill] sm:$0xff]  ;;  %v8380_v57 = vld [vmem:[#allocation50_spill] sm:$0xff] }
 0x560   : > { %8365 = vst [vmem:[#allocation26_spill] sm:$0xff] %v6153_v12  ;;  %v1150_v30 = vsel %vm8135_vm9, %v5402_v24, %v8362_v6  ;;  %v1943_v47 = vadd.f32 %v1255_v63, %v1234_v19  ;;  %v1930_v44 = vadd.f32 %v1130_v49, %v1105_v43  ;;  %v1171_v23 = vsel %vm8134_vm12, %v8367_v11, %v8358_v53  ;;  %v8371_v43 = vld [vmem:[#allocation63_spill] sm:$0xff]  ;;  %v8374_v33 = vld [vmem:[#allocation56_spill] sm:$0xff]  ;;  %v8381_v49 = vld [vmem:[#allocation53_spill] sm:$0xff] }
 0x561   : > { %v1213_v34 = vsel %vm8132_vm13, %v8368_v62, %v8360_v9  ;;  %v2020_v10 = vadd.f32 %v1940_v48, %v1936_v31  ;;  %v1934_v46 = vadd.f32 %v1172_v52, %v1151_v15  ;;  %v1938_v61 = vadd.f32 %v1214_v36, %v1193_v21  ;;  %v8376_v21 = vld [vmem:[#allocation58_spill] sm:$0xff]  ;;  %v8378_v19 = vld [vmem:[#allocation48_spill] sm:$0xff]  ;;  %v8379_v48 = vld [vmem:[#allocation51_spill] sm:$0xff] }
 0x562   : > { %v1939_v24 = vadd.f32 %v1213_v34, %v1192_v58  ;;  %v1421_v17 = vsel %vm1418_vm4, %v8371_v43, %v8370_v5  ;;  %v1931_v50 = vadd.f32 %v1129_v29, %v1104_v27  ;;  %v1935_v53 = vadd.f32 %v1171_v23, %v1150_v30  ;;  %v8384_v58 = vld [vmem:[#allocation54_spill] sm:$0xff]  ;;  %v8385_v31 = vld [vmem:[#allocation57_spill] sm:$0xff]  ;;  %v8387_v30 = vld [vmem:[#allocation43_spill] sm:$0xff] }
 0x563   : > { %v6191_v32 = vpop.permute.xlu1 %1740  ;;  %v6193_v22 = vpop.permute.xlu0 %1848  ;;  %v2016_v25 = vadd.f32 %v1932_v45, %v1928_v59  ;;  %v1337_v9 = vsel %vm1334_vm8, %v8373_v1, %v8372_v7  ;;  %v2022_v6 = vadd.f32 %v1942_v4, %v1938_v61  ;;  %v1379_v15 = vsel %vm8149_vm10, %v8375_v3, %v8374_v33  ;;  %v8386_v4 = vld [vmem:[#allocation40_spill] sm:$0xff]  ;;  %v8391_v61 = vld [vmem:[#allocation42_spill] sm:$0xff] }
 0x564   : > { %8369 = vst [vmem:[#allocation27_spill] sm:$0xff] %v6193_v22  ;;  %v2023_v2 = vadd.f32 %v1943_v47, %v1939_v24  ;;  %v1400_v0 = vsel %vm8148_vm1, %v8377_v39, %v8376_v21  ;;  %v1295_v59 = vsel %vm1292_vm11, %v8379_v48, %v8378_v19  ;;  %v1316_v11 = vsel %vm1313_vm3, %v8381_v49, %v8380_v57  ;;  %v8432_v12 = vld [vmem:[#allocation94_spill] sm:$0xff] }
 0x565   : > { %v2060_v27 = vadd.f32 %v2020_v10, %v2016_v25  ;;  %v1957_v52 = vadd.f32 %v1421_v17, %v1400_v0  ;;  %v6223_v36 = vadd.f32 %v6081_v35, %v6078_v60  ;;  %v2018_v63 = vadd.f32 %v1934_v46, %v1930_v44  ;;  %v8389_v44 = vld [vmem:[#allocation38_spill] sm:$0xff]  ;;  %v8397_v0 = vld [vmem:[#allocation65_spill] sm:$0xff] }
 0x566   : > { %v1949_v45 = vadd.f32 %v1337_v9, %v1316_v11  ;;  %v1358_v29 = vsel %vm1355_vm7, %v8385_v31, %v8384_v58  ;;  %v1270_v47 = vsel %vm1267_vm6, %v8387_v30, %v8386_v4  ;;  %v2019_v23 = vadd.f32 %v1935_v53, %v1931_v50 }
 0x567   : > { %v6219_v62 = vpop.permute.xlu1 %1763  ;;  %8383 = vst [vmem:[#allocation29_spill] sm:$0xff] %v6223_v36  ;;  %v1953_v34 = vadd.f32 %v1379_v15, %v1358_v29  ;;  %vm1443_vm14 = vcmp.lt.s32.totalorder %v5856_v54, 127  ;;  %vm1485_vm2 = vcmp.lt.s32.totalorder %v5856_v54, 125  ;;  %v6235_v60 = vpop.permute.xlu0 %1869  ;;  %v6238_v35 = vadd.f32 %v2061_v14, %v6074_v18  ;;  %v8393_v14 = vld [vmem:[#allocation44_spill] sm:$0xff]  ;;  %v8396_v15 = vld [vmem:[#allocation46_spill] sm:$0xff]  ;;  %v8403_v29 = vld [vmem:[#allocation69_spill] sm:$0xff] }
 0x568   : > { %8382 = vst [vmem:[#allocation49_spill] sm:$0xff] %v6219_v62  ;;  %8388 = vst [vmem:[#allocation32_spill] sm:$0xff] %v6235_v60  ;;  %v1269_v10 = vsel %vm1267_vm6, %v8386_v4, %v8389_v44  ;;  %v6244_v46 = vadd.f32 %v2022_v6, %v2018_v63  ;;  %v1315_v24 = vsel %vm1313_vm3, %v8380_v57, %v8391_v61  ;;  %vm1527_vm13 = vcmp.lt.s32.totalorder %v5856_v54, 108  ;;  %v8398_v57 = vld [vmem:[#allocation73_spill] sm:$0xff]  ;;  %v8401_v63 = vld [vmem:[#allocation67_spill] sm:$0xff] }
 0x569   : > { %v1945_v17 = vadd.f32 %v1295_v59, %v1270_v47  ;;  %vm1548_vm15 = vcmp.lt.s32.totalorder %v5856_v54, 107  ;;  %vm1569_vm12 = vcmp.lt.s32.totalorder %v5856_v54, 106  ;;  %v6253_v18 = vadd.f32 %v2023_v2, %v2019_v23  ;;  %v8436_v62 = vld [vmem:[#allocation103_spill] sm:$0xff]  ;;  %v8437_v60 = vld [vmem:[#allocation105_spill] sm:$0xff] }
 0x56a   : > { %8390 = vst [vmem:[#allocation33_spill] sm:$0xff] %v6244_v46  ;;  %v1357_v50 = vsel %vm1355_vm7, %v8384_v58, %v8393_v14  ;;  %v2029_v53 = vadd.f32 %v1957_v52, %v1953_v34  ;;  %vm1464_vm9 = vcmp.lt.s32.totalorder %v5856_v54, 126  ;;  %v6263_v9 = vadd.f32 %v2060_v27, %v6083_v16  ;;  %v8399_v16 = vld [vmem:[#allocation62_spill] sm:$0xff]  ;;  %v8400_v52 = vld [vmem:[#allocation64_spill] sm:$0xff] }
 0x56b   : > { %8392 = vst [vmem:[#allocation34_spill] sm:$0xff] %v6253_v18  ;;  %v6260_v25 = vpop.permute.xlu1 %1804  ;;  %v2025_v6 = vadd.f32 %v1949_v45, %v1945_v17  ;;  %v1399_v2 = vsel %vm8148_vm1, %v8376_v21, %v8396_v15  ;;  %v1271_v59 = vsel %vm1267_vm6, %v8397_v0, %v8387_v30  ;;  %v1420_v11 = vsel %vm1418_vm4, %v8370_v5, %v8398_v57  ;;  %v8402_v58 = vld [vmem:[#allocation66_spill] sm:$0xff]  ;;  %v8404_v30 = vld [vmem:[#allocation71_spill] sm:$0xff]  ;;  %v8405_v34 = vld [vmem:[#allocation68_spill] sm:$0xff]  ;;  %v6318_v17 = vpop.permute.xlu0 %1890 }
 0x56c   : > { %8394 = vst [vmem:[#allocation36_spill] sm:$0xff] %v6260_v25  ;;  %8395 = vst [vmem:[#allocation45_spill] sm:$0xff] %v6263_v9  ;;  %vm1506_vm0 = vcmp.lt.s32.totalorder %v5856_v54, 109  ;;  %v1296_v27 = vsel %vm1292_vm11, %v8399_v16, %v8379_v48  ;;  %v1338_v21 = vsel %vm1334_vm8, %v8400_v52, %v8373_v1  ;;  %v1293_v45 = vsel %vm1292_vm11, %v8401_v63, %v8399_v16  ;;  %v8425_v18 = vld [vmem:[#allocation30_spill] sm:$0xff]  ;;  %v8427_v9 = vld [vmem:[#allocation95_spill] sm:$0xff] }
 0x56d   : > { %v1294_v5 = vsel %vm1292_vm11, %v8378_v19, %v8401_v63  ;;  %v1268_v48 = vsel %vm1267_vm6, %v8389_v44, %v8397_v0  ;;  %v1380_v1 = vsel %vm8149_vm10, %v8402_v58, %v8375_v3  ;;  %v1336_v4 = vsel %vm1334_vm8, %v8372_v7, %v8403_v29  ;;  %v8433_v25 = vld [vmem:[#allocation85_spill] sm:$0xff] }
 0x56e   : > { %v1378_v19 = vsel %vm8149_vm10, %v8374_v33, %v8404_v30  ;;  %v6310_v47 = vadd.f32 %v2029_v53, %v2025_v6  ;;  %v6312_v23 = vadd.f32 %v1296_v27, %v1271_v59  ;;  %v1422_v44 = vsel %vm1418_vm4, %v8405_v34, %v8371_v43  ;;  %v8407_v53 = vld [vmem:[#allocation75_spill] sm:$0xff]  ;;  %v8408_v59 = vld [vmem:[#allocation77_spill] sm:$0xff] }
 0x56f   : > { %v1958_v3 = vadd.f32 %v1420_v11, %v1399_v2  ;;  %v6320_v0 = vpop.permute.xlu1 %1844  ;;  %v6322_v7 = vadd.f32 %v1294_v5, %v1269_v10  ;;  %v6324_v16 = vadd.f32 %v1293_v45, %v1268_v48  ;;  %v1335_v33 = vsel %vm1334_vm8, %v8403_v29, %v8400_v52  ;;  %v8411_v45 = vld [vmem:[#allocation101_spill] sm:$0xff] }
 0x570   : > { %8406 = vst [vmem:[#allocation47_spill] sm:$0xff] %v6320_v0  ;;  %v1317_v6 = vsel %vm1313_vm3, %v8407_v53, %v8381_v49  ;;  %v6334_v43 = vadd.f32 %v1336_v4, %v1315_v24  ;;  %v1954_v2 = vadd.f32 %v1378_v19, %v1357_v50  ;;  %v1314_v10 = vsel %vm1313_vm3, %v8391_v61, %v8407_v53  ;;  %v8409_v24 = vld [vmem:[#allocation79_spill] sm:$0xff]  ;;  %v8414_v29 = vld [vmem:[#allocation89_spill] sm:$0xff]  ;;  %v8415_v4 = vld [vmem:[#allocation74_spill] sm:$0xff] }
 0x571   : > { %v1359_v11 = vsel %vm1355_vm7, %v8408_v59, %v8385_v31  ;;  %v1377_v27 = vsel %vm8149_vm10, %v8404_v30, %v8402_v58  ;;  %v1419_v49 = vsel %vm1418_vm4, %v8398_v57, %v8405_v34  ;;  %v1356_v61 = vsel %vm1355_vm7, %v8393_v14, %v8408_v59  ;;  %v8410_v57 = vld [vmem:[#allocation82_spill] sm:$0xff]  ;;  %v8416_v30 = vld [vmem:[#allocation93_spill] sm:$0xff]  ;;  %v8429_v0 = vld [vmem:[#allocation84_spill] sm:$0xff] }
 0x572   : > { %v1401_v31 = vsel %vm8148_vm1, %v8409_v24, %v8377_v39  ;;  %v6360_v50 = vadd.f32 %v1958_v3, %v1954_v2  ;;  %v6362_v52 = vadd.f32 %v1338_v21, %v1317_v6  ;;  %v1398_v63 = vsel %vm8148_vm1, %v8396_v15, %v8409_v24  ;;  %v8413_v39 = vld [vmem:[#allocation70_spill] sm:$0xff]  ;;  %v8418_v53 = vld [vmem:[#allocation97_spill] sm:$0xff]  ;;  %v8420_v2 = vld [vmem:[#allocation99_spill] sm:$0xff] }
 0x573   : > { %v1571_v5 = vsel %vm1569_vm12, %v8411_v45, %v8410_v57  ;;  %v6372_v14 = vpop.permute.xlu1 %1886  ;;  %v6374_v48 = vadd.f32 %v1335_v33, %v1314_v10  ;;  %v1952_v58 = vadd.f32 %v1380_v1, %v1359_v11  ;;  %v1445_v21 = vsel %vm1443_vm14, %v8414_v29, %v8413_v39  ;;  %v8417_v3 = vld [vmem:[#allocation78_spill] sm:$0xff]  ;;  %v8419_v33 = vld [vmem:[#allocation80_spill] sm:$0xff]  ;;  %v6392_v10 = vpop.permute.xlu0 %1784  ;;  %v8422_v11 = vld [vmem:[#allocation81_spill] sm:$0xff] }
 0x574   : > { %8412 = vst [vmem:[#allocation41_spill] sm:$0xff] %v6372_v14  ;;  %v1487_v15 = vsel %vm1485_vm2, %v8416_v30, %v8415_v4  ;;  %v1955_v19 = vadd.f32 %v1377_v27, %v1356_v61  ;;  %v1956_v34 = vadd.f32 %v1422_v44, %v1401_v31  ;;  %v1529_v6 = vsel %vm1527_vm13, %v8418_v53, %v8417_v3  ;;  %v8423_v27 = vld [vmem:[#allocation72_spill] sm:$0xff]  ;;  %v8424_v44 = vld [vmem:[#allocation91_spill] sm:$0xff] }
 0x575   : > { %v1550_v1 = vsel %vm1548_vm15, %v8420_v2, %v8419_v33  ;;  %8421 = vst [vmem:[#allocation35_spill] sm:$0xff] %v6392_v10  ;;  %v1959_v59 = vadd.f32 %v1419_v49, %v1398_v63  ;;  %v1446_v24 = vsel %vm1443_vm14, %v8422_v11, %v8414_v29  ;;  %v1466_v61 = vsel %vm1464_vm9, %v8424_v44, %v8423_v27  ;;  %v8428_v49 = vld [vmem:[#allocation87_spill] sm:$0xff] }
 0x576   : > { %v1973_v31 = vadd.f32 %v1571_v5, %v1550_v1  ;;  %v1961_v36 = vadd.f32 %v1445_v21, %v8425_v18  ;;  %v1965_v46 = vadd.f32 %v1487_v15, %v1466_v61  ;;  %v1508_v10 = vsel %vm1506_vm0, %v8427_v9, %v8426_v56  ;;  %v8430_v18 = vld [vmem:[#allocation83_spill] sm:$0xff] }
 0x577   : > { %v1572_v63 = vsel %vm1569_vm12, %v8428_v49, %v8411_v45  ;;  %v6411_v29 = vpop.permute.xlu1 %1744  ;;  %v1467_v5 = vsel %vm1464_vm9, %v8429_v0, %v8424_v44  ;;  %v1488_v21 = vsel %vm1485_vm2, %v8430_v18, %v8416_v30  ;;  %v1969_v15 = vadd.f32 %v1529_v6, %v1508_v10  ;;  %v8431_v1 = vld [vmem:[#allocation107_spill] sm:$0xff]  ;;  %v8435_v6 = vld [vmem:[#allocation100_spill] sm:$0xff] }
 0x578   : > { %v1549_v61 = vsel %vm1548_vm15, %v8419_v33, %v8431_v1  ;;  %v1444_v45 = vsel %vm1443_vm14, %v8413_v39, %v8432_v12  ;;  %v1530_v44 = vsel %vm1527_vm13, %v8433_v25, %v8418_v53  ;;  %v1551_v30 = vsel %vm1548_vm15, %v8434_v26, %v8420_v2  ;;  %v8438_v2 = vld [vmem:[#allocation86_spill] sm:$0xff] }
 0x579   : > { %v1570_v33 = vsel %vm1569_vm12, %v8410_v57, %v8435_v6  ;;  %v1972_v10 = vadd.f32 %v1572_v63, %v1551_v30  ;;  %v2037_v14 = vadd.f32 %v1973_v31, %v1969_v15  ;;  %v1465_v39 = vsel %vm1464_vm9, %v8423_v27, %v8436_v62  ;;  %v6455_v31 = vpop.permute.xlu0 %1824  ;;  %v8439_v63 = vld [vmem:[#allocation96_spill] sm:$0xff] }
 0x57a   : > { %v1507_v53 = vsel %vm1506_vm0, %v8426_v56, %v8437_v60  ;;  %v1964_v22 = vadd.f32 %v1488_v21, %v1467_v5  ;;  %v2033_v13 = vadd.f32 %v1965_v46, %v1961_v36  ;;  %v1509_v41 = vsel %vm1506_vm0, %v8438_v2, %v8427_v9  ;;  %v8440_v46 = vld [vmem:[#allocation98_spill] sm:$0xff]  ;;  %v8441_v21 = vld [vmem:[#allocation28_spill] sm:$0xff] }
 0x57b   : > { %v1974_v57 = vadd.f32 %v1570_v33, %v1549_v61  ;;  %vm1582_vm6 = vcmp.lt.s32.totalorder %v5856_v54, 105  ;;  %vm1607_vm7 = vcmp.lt.s32.totalorder %v5856_v54, 104  ;;  %v6457_v27 = vpop.permute.xlu1 %1765  ;;  %v1486_v56 = vsel %vm1485_vm2, %v8415_v4, %v8439_v63 }
 0x57c   : > { %v1968_v36 = vadd.f32 %v1530_v44, %v1509_v41  ;;  %v1528_v9 = vsel %vm1527_vm13, %v8417_v3, %v8440_v46  ;;  %v1552_v5 = vsel %vm1548_vm15, %v8431_v1, %v8434_v26  ;;  %v1960_v15 = vadd.f32 %v1446_v24, %v8441_v21  ;;  %v8442_v1 = vld [vmem:[#allocation25_spill] sm:$0xff]  ;;  %v8448_v21 = vld [vmem:[#allocation119_spill] sm:$0xff] }
 0x57d   : > { %v1573_v61 = vsel %vm1569_vm12, %v8435_v6, %v8428_v49  ;;  %v1966_v30 = vadd.f32 %v1486_v56, %v1465_v39  ;;  %v1970_v4 = vadd.f32 %v1528_v9, %v1507_v53  ;;  %vm8151_vm8 = vcmp.lt.s32.totalorder %v5856_v54, 87  ;;  %v8447_v9 = vld [vmem:[#allocation92_spill] sm:$0xff] }
 0x57e   : > { %v2036_v41 = vadd.f32 %v1972_v10, %v1968_v36  ;;  %v2069_v44 = vadd.f32 %v2037_v14, %v2033_v13  ;;  %v1468_v3 = vsel %vm1464_vm9, %v8436_v62, %v8429_v0  ;;  %v1510_v26 = vsel %vm1506_vm0, %v8437_v60, %v8438_v2  ;;  %v8443_v2 = vld [vmem:[#allocation31_spill] sm:$0xff] }
 0x57f   : > { %v2028_v24 = vadd.f32 %v1956_v34, %v1952_v58  ;;  %v1962_v33 = vadd.f32 %v1444_v45, %v8442_v1  ;;  %v1975_v49 = vadd.f32 %v1573_v61, %v1552_v5  ;;  %v2038_v6 = vadd.f32 %v1974_v57, %v1970_v4  ;;  %v6487_v39 = vpop.permute.xlu1 %1786  ;;  %v8449_v4 = vld [vmem:[#allocation102_spill] sm:$0xff] }
 0x580   : > { %vm1628_vm12 = vcmp.lt.s32.totalorder %v5856_v54, 103  ;;  %v2032_v13 = vadd.f32 %v1964_v22, %v1960_v15  ;;  %v1447_v62 = vsel %vm1443_vm14, %v8432_v12, %v8422_v11  ;;  %v1489_v60 = vsel %vm1485_vm2, %v8439_v63, %v8430_v18  ;;  %v6501_v22 = vpop.permute.xlu0 %1865  ;;  %v8452_v1 = vld [vmem:[#allocation114_spill] sm:$0xff] }
 0x581   : > { %v1531_v0 = vsel %vm1527_vm13, %v8440_v46, %v8433_v25  ;;  %v2031_v14 = vadd.f32 %v1959_v59, %v1955_v19  ;;  %v1967_v58 = vadd.f32 %v1489_v60, %v1468_v3  ;;  %v2034_v34 = vadd.f32 %v1966_v30, %v1962_v33  ;;  %v8455_v60 = vld [vmem:[#allocation122_spill] sm:$0xff] }
 0x582   : > { %v1971_v45 = vadd.f32 %v1531_v0, %v1510_v26  ;;  %v2026_v10 = vadd.f32 %v6334_v43, %v6322_v7  ;;  %v2024_v12 = vadd.f32 %v6362_v52, %v6312_v23  ;;  %v2068_v11 = vadd.f32 %v2036_v41, %v2032_v13  ;;  %v8445_v43 = vld [vmem:[#allocation109_spill] sm:$0xff] }
 0x583   : > { %v2085_v18 = vadd.f32 %v2069_v44, %v6310_v47  ;;  %v2027_v53 = vadd.f32 %v6374_v48, %v6324_v16  ;;  %v1963_v25 = vadd.f32 %v1447_v62, %v8443_v2  ;;  %v2070_v59 = vadd.f32 %v2038_v6, %v2034_v34  ;;  %v6511_v57 = vpop.permute.xlu1 %1806  ;;  %v8444_v16 = vld [vmem:[#allocation90_spill] sm:$0xff]  ;;  %v8446_v48 = vld [vmem:[#allocation111_spill] sm:$0xff]  ;;  %v8451_v26 = vld [vmem:[#allocation113_spill] sm:$0xff] }
 0x584   : > { %v2039_v19 = vadd.f32 %v1975_v49, %v1971_v45  ;;  %v2064_v63 = vadd.f32 %v2028_v24, %v2024_v12  ;;  %vm8190_vm0 = vcmp.lt.s32.totalorder %v5856_v54, 86  ;;  %vm8152_vm13 = vcmp.lt.s32.totalorder %v5856_v54, 85  ;;  %v6543_v61 = vpop.permute.xlu0 %1769  ;;  %v8450_v44 = vld [vmem:[#allocation106_spill] sm:$0xff]  ;;  %v8453_v6 = vld [vmem:[#allocation124_spill] sm:$0xff] }
 0x585   : > { %vm8191_vm15 = vcmp.lt.s32.totalorder %v5856_v54, 84  ;;  %v2066_v23 = vadd.f32 %v6360_v50, %v2026_v10  ;;  %v6517_v7 = vadd.f32 %v2031_v14, %v2027_v53  ;;  %v2035_v47 = vadd.f32 %v1967_v58, %v1963_v25  ;;  %v8454_v62 = vld [vmem:[#allocation104_spill] sm:$0xff]  ;;  %v8457_v34 = vld [vmem:[#allocation110_spill] sm:$0xff] }
 0x586   : > { %vm8150_vm11 = vcmp.lt.s32.totalorder %v5856_v54, 83  ;;  %v1584_v52 = vsel %vm1582_vm6, %v8445_v43, %v8444_v16  ;;  %v1610_v56 = vsel %vm1607_vm7, %v8446_v48, %v5848_v37  ;;  %v6529_v36 = vadd.f32 %v2085_v18, %v6238_v35  ;;  %v8456_v14 = vld [vmem:[#allocation116_spill] sm:$0xff] }
 0x587   : > { %v6531_v46 = vadd.f32 %v2068_v11, %v2064_v63  ;;  %v6533_v50 = vadd.f32 %v2039_v19, %v2035_v47  ;;  %v1585_v5 = vsel %vm1582_vm6, %v8447_v9, %v8445_v43  ;;  %v1583_v15 = vsel %vm1582_vm6, %v8444_v16, %v8448_v21  ;;  %v6545_v30 = vpop.permute.xlu1 %1826  ;;  %v8458_v10 = vld [vmem:[#allocation112_spill] sm:$0xff]  ;;  %v8461_v16 = vld [vmem:[#allocation117_spill] sm:$0xff] }
 0x588   : > { %v6547_v35 = vadd.f32 %v2070_v59, %v2066_v23  ;;  %v1609_v41 = vsel %vm1607_vm7, %v5848_v37, %v8449_v4  ;;  %v1651_v3 = vsel %vm8151_vm8, %v5859_v51, %v8450_v44  ;;  %v1652_v24 = vsel %vm8151_vm8, %v8451_v26, %v5859_v51  ;;  %v8459_v63 = vld [vmem:[#allocation108_spill] sm:$0xff]  ;;  %v8460_v23 = vld [vmem:[#allocation126_spill] sm:$0xff] }
 0x589   : > { %v1735_v33 = vsel %vm8150_vm11, %v6024_v8, %v8452_v1  ;;  %v1586_v37 = vsel %vm1582_vm6, %v8448_v21, %v8447_v9  ;;  %v1976_v49 = vadd.f32 %v1610_v56, %v1585_v5  ;;  %v1608_v13 = vsel %vm1607_vm7, %v8449_v4, %v8453_v6  ;;  %v8463_v5 = vld [vmem:[#allocation120_spill] sm:$0xff] }
 0x58a   : > { %v1611_v51 = vsel %vm1607_vm7, %v8453_v6, %v8446_v48  ;;  %v1630_v0 = vsel %vm1628_vm12, %v8455_v60, %v8454_v62  ;;  %v1631_v58 = vsel %vm1628_vm12, %v8456_v14, %v8455_v60  ;;  %v1693_v45 = vsel %vm8152_vm13, %v5919_v42, %v8457_v34 }
 0x58b   : > { %v1714_v12 = vsel %vm8191_vm15, %v5982_v20, %v8458_v10  ;;  %vm1746_vm3 = vcmp.lt.s32.totalorder %v5856_v54, 82  ;;  %v1977_v11 = vadd.f32 %v1609_v41, %v1584_v52  ;;  %v1980_v18 = vadd.f32 %v1652_v24, %v1631_v58  ;;  %v6596_v25 = vpop.permute.xlu1 %1846  ;;  %v8462_v52 = vld [vmem:[#allocation118_spill] sm:$0xff] }
 0x58c   : > { %v1981_v53 = vadd.f32 %v1651_v3, %v1630_v0  ;;  %v1989_v2 = vadd.f32 %v1735_v33, %v1714_v12  ;;  %vm1771_vm6 = vcmp.lt.s32.totalorder %v5856_v54, 81  ;;  %vm1894_vm7 = vcmp.lt.s32.totalorder %v5856_v54, 60  ;;  %v8465_v0 = vld [vmem:[#allocation129_spill] sm:$0xff] }
 0x58d   : > { %vm1873_vm1 = vcmp.lt.s32.totalorder %v5856_v54, 61  ;;  %v6599_v19 = vadd.f32 %v1608_v13, %v1583_v15  ;;  %v6601_v59 = vadd.f32 %v1611_v51, %v1586_v37  ;;  %v1672_v47 = vsel %vm8190_vm0, %v8460_v23, %v8459_v63  ;;  %v6623_v15 = vpop.permute.xlu0 %1810 }
 0x58e   : > { %v1736_v43 = vsel %vm8150_vm11, %v8461_v16, %v6024_v8  ;;  %v1673_v48 = vsel %vm8190_vm0, %v8462_v52, %v8460_v23  ;;  %v1985_v56 = vadd.f32 %v1693_v45, %v1672_v47  ;;  %v1713_v9 = vsel %vm8191_vm15, %v8458_v10, %v6151_v38  ;;  %v8464_v8 = vld [vmem:[#allocation115_spill] sm:$0xff] }
 0x58f   : > { %v1716_v21 = vsel %vm8191_vm15, %v6151_v38, %v8463_v5  ;;  %vm1852_vm10 = vcmp.lt.s32.totalorder %v5856_v54, 62  ;;  %v1694_v4 = vsel %vm8152_vm13, %v8464_v8, %v5919_v42  ;;  %v1715_v41 = vsel %vm8191_vm15, %v8463_v5, %v5982_v20  ;;  %v1868_v37 = vpop.permute.xlu1 %1867  ;;  %v8470_v5 = vld [vmem:[#allocation133_spill] sm:$0xff] }
 0x590   : > { %v1734_v3 = vsel %vm8150_vm11, %v8452_v1, %v5984_v55  ;;  %v1737_v38 = vsel %vm8150_vm11, %v5984_v55, %v8461_v16  ;;  %v1988_v24 = vadd.f32 %v1736_v43, %v1715_v41  ;;  %v2045_v33 = vadd.f32 %v1989_v2, %v1985_v56  ;;  %v8468_v16 = vld [vmem:[#allocation123_spill] sm:$0xff]  ;;  %v8469_v56 = vld [vmem:[#allocation130_spill] sm:$0xff] }
 0x591   : > { %v1671_v42 = vsel %vm8190_vm0, %v8459_v63, %v6090_v40  ;;  %v1674_v20 = vsel %vm8190_vm0, %v6090_v40, %v8462_v52  ;;  %v1629_v1 = vsel %vm1628_vm12, %v8454_v62, %v6056_v28  ;;  %v1632_v55 = vsel %vm1628_vm12, %v6056_v28, %v8456_v14  ;;  %v8466_v62 = vld [vmem:[#allocation127_spill] sm:$0xff]  ;;  %v1851_v2 = vpop.permute.xlu0 %1850 }
 0x592   : > { %v1990_v6 = vadd.f32 %v1734_v3, %v1713_v9  ;;  %v1991_v13 = vadd.f32 %v1737_v38, %v1716_v21  ;;  %v2041_v51 = vadd.f32 %v1981_v53, %v1977_v11  ;;  %v1984_v60 = vadd.f32 %v1694_v4, %v1673_v48  ;;  %v8471_v21 = vld [vmem:[#allocation27_spill] sm:$0xff]  ;;  %v8472_v4 = vld [vmem:[#allocation32_spill] sm:$0xff] }
 0x593   : > { %v1692_v40 = vsel %vm8152_vm13, %v8457_v34, %v8465_v0  ;;  %v1695_v58 = vsel %vm8152_vm13, %v8465_v0, %v8464_v8  ;;  %v1650_v45 = vsel %vm8151_vm8, %v8450_v44, %v8466_v62  ;;  %v1653_v28 = vsel %vm8151_vm8, %v8466_v62, %v8451_v26  ;;  %v1889_v63 = vpop.permute.xlu1 %1888 }
 0x594   : > { %v1986_v14 = vadd.f32 %v1692_v40, %v1671_v42  ;;  %v1987_v10 = vadd.f32 %v1695_v58, %v1674_v20  ;;  %v6674_v12 = vadd.f32 %v1980_v18, %v1976_v49  ;;  %v6676_v34 = vadd.f32 %v1988_v24, %v1984_v60  ;;  %v8467_v49 = vld [vmem:[#allocation121_spill] sm:$0xff]  ;;  %v8480_v58 = vld [vmem:[#allocation47_spill] sm:$0xff] }
 0x595   : > { %v6678_v11 = vadd.f32 %v1650_v45, %v1629_v1  ;;  %v6680_v53 = vadd.f32 %v1653_v28, %v1632_v55  ;;  %v1896_v26 = vsel %vm1894_vm7, %v1889_v63, %v6318_v17  ;;  %v6689_v47 = vadd.f32 %v2045_v33, %v2041_v51  ;;  %v8474_v24 = vld [vmem:[#allocation41_spill] sm:$0xff]  ;;  %v8475_v55 = vld [vmem:[#allocation131_spill] sm:$0xff]  ;;  %v8478_v51 = vld [vmem:[#allocation26_spill] sm:$0xff]  ;;  %v1893_v40 = vpop.permute.xlu0 %1892 }
 0x596   : > { %v6682_v23 = vadd.f32 %v1990_v6, %v1986_v14  ;;  %v6684_v44 = vadd.f32 %v1991_v13, %v1987_v10  ;;  %v1748_v18 = vsel %vm1746_vm3, %v6191_v32, %v8467_v49  ;;  %v1749_v43 = vsel %vm1746_vm3, %v8468_v16, %v6191_v32  ;;  %v8477_v6 = vld [vmem:[#allocation36_spill] sm:$0xff]  ;;  %v8481_v14 = vld [vmem:[#allocation35_spill] sm:$0xff] }
 0x597   : > { %v1747_v52 = vsel %vm1746_vm3, %v8467_v49, %v6411_v29  ;;  %v1750_v48 = vsel %vm1746_vm3, %v6411_v29, %v8468_v16  ;;  %v1773_v9 = vsel %vm1771_vm6, %v6457_v27, %v8469_v56  ;;  %v1813_v32 = vsel %vm1048_vm5, %v6511_v57, %v8470_v5  ;;  %v8473_v29 = vld [vmem:[#allocation49_spill] sm:$0xff]  ;;  %v1791_v20 = vpop.permute.xlu1 %1790 }
 0x598   : > { %v1854_v8 = vsel %vm1852_vm10, %v6596_v25, %v8471_v21  ;;  %v1875_v41 = vsel %vm1873_vm1, %v1868_v37, %v8472_v4  ;;  %v1774_v3 = vsel %vm1771_vm6, %v8473_v29, %v6457_v27  ;;  %v1772_v38 = vsel %vm1771_vm6, %v8469_v56, %v6543_v61 }
 0x599   : > { %v1897_v33 = vsel %vm1894_vm7, %v8474_v24, %v1889_v63  ;;  %v2005_v42 = vadd.f32 %v1896_v26, %v1875_v41  ;;  %v1775_v1 = vsel %vm1771_vm6, %v6543_v61, %v8473_v29  ;;  %vm8476_vm3 = vcmp.lt.s32.totalorder %v5856_v54, 65 }
 0x59a   : > { %v1793_v27 = vsel %vm8476_vm3, %v6487_v39, %v8475_v55  ;;  %v1814_v13 = vsel %vm1048_vm5, %v8477_v6, %v6511_v57  ;;  %vm8479_vm11 = vcmp.lt.s32.totalorder %v5856_v54, 63  ;;  %v1855_v61 = vsel %vm1852_vm10, %v8480_v58, %v6596_v25 }
 0x59b   : > { %v1833_v60 = vsel %vm8479_vm11, %v6545_v30, %v8478_v51  ;;  %v1997_v0 = vadd.f32 %v1813_v32, %v1793_v27  ;;  %v1876_v45 = vsel %vm1873_vm1, %v6501_v22, %v1868_v37  ;;  %vm1907_vm6 = vcmp.lt.s32.totalorder %v5856_v54, 59  ;;  %vm8482_vm11 = vmmov %vm8476_vm3  ;;  %v1831_v16 = vpop.permute.xlu1 %1830 }
 0x59c   : > { %v2001_v62 = vadd.f32 %v1854_v8, %v1833_v60  ;;  %v1992_v57 = vadd.f32 %v1774_v3, %v1749_v43  ;;  %v1993_v28 = vadd.f32 %v1773_v9, %v1748_v18  ;;  %v1794_v10 = vsel %vm8482_vm11, %v8481_v14, %v6487_v39  ;;  %vm8484_vm8 = vmmov %vm8482_vm11 }
 0x59d   : > { %v2004_v63 = vadd.f32 %v1897_v33, %v1876_v45  ;;  %v1996_v26 = vadd.f32 %v1814_v13, %v1794_v10  ;;  %vm8483_vm3 = vcmp.lt.s32.totalorder %v5856_v54, 63  ;;  %v1792_v37 = vsel %vm8484_vm8, %v8475_v55, %v1791_v20  ;;  %vm8485_vm13 = vmmov %vm8484_vm8  ;;  %v8490_v10 = vld [vmem:[#allocation33_spill] sm:$0xff] }
 0x59e   : > { %v1834_v25 = vsel %vm8483_vm3, %v6455_v31, %v6545_v30  ;;  %v2053_v49 = vadd.f32 %v2005_v42, %v2001_v62  ;;  %v1994_v43 = vadd.f32 %v1772_v38, %v1747_v52  ;;  %v1995_v18 = vadd.f32 %v1775_v1, %v1750_v48  ;;  %v1904_v48 = vpop.permute.xlu0 %1903  ;;  %vm8486_vm8 = vmmov %vm8483_vm3 }
 0x59f   : > { %v2000_v56 = vadd.f32 %v1855_v61, %v1834_v25  ;;  %v1795_v39 = vsel %vm8485_vm13, %v1791_v20, %v8481_v14  ;;  %v1812_v9 = vsel %vm1048_vm5, %v8470_v5, %v6623_v15  ;;  %v1815_v30 = vsel %vm1048_vm5, %v6623_v15, %v8477_v6  ;;  %vm8487_vm13 = vmmov %vm8483_vm3  ;;  %v1872_v33 = vpop.permute.xlu1 %1871  ;;  %v8489_v14 = vld [vmem:[#allocation132_spill] sm:$0xff]  ;;  %v8492_v25 = vld [vmem:[#allocation34_spill] sm:$0xff] }
 0x5a0   : > { %v2049_v32 = vadd.f32 %v1997_v0, %v1993_v28  ;;  %v1853_v52 = vsel %vm1852_vm10, %v8471_v21, %v1851_v2  ;;  %v1998_v41 = vadd.f32 %v1812_v9, %v1792_v37  ;;  %v1832_v29 = vsel %vm8486_vm8, %v8478_v51, %v1831_v16  ;;  %v8488_v28 = vld [vmem:[#allocation45_spill] sm:$0xff] }
 0x5a1   : > { %v2052_v8 = vadd.f32 %v2004_v63, %v2000_v56  ;;  %v1835_v5 = vsel %vm8487_vm13, %v1831_v16, %v6455_v31  ;;  %v2048_v3 = vadd.f32 %v1996_v26, %v1992_v57  ;;  %v1856_v15 = vsel %vm1852_vm10, %v1851_v2, %v8480_v58  ;;  %v8491_v26 = vld [vmem:[#allocation29_spill] sm:$0xff] }
 0x5a2   : > { %v1999_v38 = vadd.f32 %v1815_v30, %v1795_v39  ;;  %v2077_v42 = vadd.f32 %v2053_v49, %v2049_v32  ;;  %v1895_v21 = vsel %vm1894_vm7, %v6318_v17, %v1893_v40  ;;  %v1898_v20 = vsel %vm1894_vm7, %v1893_v40, %v8474_v24  ;;  %v1906_v61 = vpop.permute.xlu0 %1905 }
 0x5a3   : > { %v1874_v31 = vsel %vm1873_vm1, %v8472_v4, %v1872_v33  ;;  %v1877_v1 = vsel %vm1873_vm1, %v1872_v33, %v6501_v22  ;;  %v2002_v2 = vadd.f32 %v1853_v52, %v1832_v29  ;;  %v2003_v55 = vadd.f32 %v1856_v15, %v1835_v5  ;;  %v1902_v4 = vpop.permute.xlu1 %1901 }
 0x5a4   : > { %v2006_v27 = vadd.f32 %v1895_v21, %v1874_v31  ;;  %v2007_v6 = vadd.f32 %v1898_v20, %v1877_v1  ;;  %v2042_v13 = vadd.f32 %v6678_v11, %v6599_v19  ;;  %v2043_v17 = vadd.f32 %v6680_v53, %v6601_v59 }
 0x5a5   : > { %v2050_v51 = vadd.f32 %v1998_v41, %v1994_v43  ;;  %v2076_v24 = vadd.f32 %v2052_v8, %v2048_v3  ;;  %v2051_v60 = vadd.f32 %v1999_v38, %v1995_v18  ;;  %v2089_v58 = vadd.f32 %v2077_v42, %v6689_v47  ;;  %v8493_v18 = vld [vmem:[#allocation128_spill] sm:$0xff] }
 0x5a6   : > { %v2054_v0 = vadd.f32 %v2006_v27, %v2002_v2  ;;  %v2055_v40 = vadd.f32 %v2007_v6, %v2003_v55  ;;  %v1909_v22 = vsel %vm1907_vm6, %v1902_v4, %v1904_v48  ;;  %v2072_v62 = vadd.f32 %v6676_v34, %v6674_v12  ;;  %v8494_v55 = vld [vmem:[#allocation125_spill] sm:$0xff] }
 0x5a7   : > { %v2074_v19 = vadd.f32 %v6682_v23, %v2042_v13  ;;  %v2087_v59 = vadd.f32 %v6533_v50, %v6517_v7  ;;  %v2097_v11 = vadd.f32 %v2089_v58, %v1909_v22  ;;  %v2075_v53 = vadd.f32 %v6684_v44, %v2043_v17  ;;  %v1900_v7 = vpop.permute.xlu1 %1899  ;;  %v8495_v6 = vld [vmem:[#allocation17_spill] sm:$0xff] }
 0x5a8   : > { %v2078_v45 = vadd.f32 %v2054_v0, %v2050_v51  ;;  %v2079_v57 = vadd.f32 %v2055_v40, %v2051_v60  ;;  %v2092_v47 = vadd.f32 %v6531_v46, %v8488_v28  ;;  %v2082_v63 = vadd.f32 %v8490_v10, %v8489_v14  ;;  %v8496_v0 = vld [vmem:[#allocation19_spill] sm:$0xff]  ;;  %v8502_v28 = vld [vmem:[#allocation22_spill] sm:$0xff]  ;;  %v8504_v10 = vld [vmem:[#allocation24_spill] sm:$0xff] }
 0x5a9   : > { %v2083_v49 = vadd.f32 %v8492_v25, %v8491_v26  ;;  %v1908_v12 = vsel %vm1907_vm6, %v1904_v48, %v1906_v61  ;;  %v2101_v34 = vadd.f32 %v2097_v11, %v6529_v36  ;;  %v2088_v50 = vadd.f32 %v2076_v24, %v2072_v62  ;;  %v8498_v62 = vld [vmem:[#allocation23_spill] sm:$0xff]  ;;  %v8499_v11 = vld [vmem:[#allocation18_spill] sm:$0xff] }
 0x5aa   : > { %v2090_v23 = vadd.f32 %v2078_v45, %v2074_v19  ;;  %v2091_v44 = vadd.f32 %v2079_v57, %v2075_v53  ;;  %v1910_v37 = vsel %vm1907_vm6, %v1900_v7, %v1902_v4  ;;  %v2094_v46 = vadd.f32 %v6547_v35, %v2082_v63  ;;  %v8500_v45 = vld [vmem:[#allocation20_spill] sm:$0xff]  ;;  %v2167_v26 = vld [vmem:[%s7911_s8 + $0x8] sm:$0xff] }
 0x5ab   : > { %v2095_v16 = vadd.f32 %v2087_v59, %v2083_v49  ;;  %v1911_v43 = vsel %vm1907_vm6, %v1906_v61, %v1900_v7  ;;  %v2115_v56 = vadd.f32 %v8493_v18, %v2101_v34  ;;  %v2096_v39 = vadd.f32 %v2088_v50, %v1910_v37  ;;  %v8497_v61 = vld [vmem:[#allocation21_spill] sm:$0xff]  ;;  %v4317_v50 = vld [vmem:[%s7908_s5 + $0x10] sm:$0xff] }
 0x5ac   : > { %v2098_v9 = vadd.f32 %v2090_v23, %v1908_v12  ;;  %v2099_v30 = vadd.f32 %v2091_v44, %v1911_v43  ;;  %v2166_v59 = vld [vmem:[%s7911_s8] sm:$0xff]  ;;  %vm8501_vm1 = vcmask 130048   ;;  %v8503_v14 = vmov 0.0  }
 0x5ad   : > { %v4307_v32 = vmul.f32 -1.442695, %v2115_v56  ;;  %v2100_v36 = vadd.f32 %v2096_v39, %v2092_v47  ;;  %vm8505_vm5 = vmmov %vm8501_vm1  ;;  %vm8508_vm6 = vmmov 0   ;;  %v4314_v7 = vld [vmem:[%s7906_s3 + $0x2] sm:$0x3]  ;;  %vm8510_vm3 = vcmask 15360  }
 0x5ae   : > { %v2102_v52 = vadd.f32 %v2098_v9, %v2094_v46  ;;  %v2103_v48 = vadd.f32 %v2099_v30, %v2095_v16  ;;  %vm8506_vm10 = vmmov %vm8501_vm1  ;;  %4446 = vmatprep.mubr.msk.f32.mxu0 %vm8510_vm3, %v4317_v50  ;;  %v4315_v39 = vld [vmem:[%s7907_s4 + $0x2] sm:$0x3]  ;;  %vm8511_vm8 = vcmask 1041408   ;;  %vm2830_vm0 = vcmp.lt.s32.totalorder %v5856_v54, 17 }
 0x5af   : > { %4653 = vpow2.f32 %v4307_v32  ;;  %v2114_v8 = vadd.f32 %v8493_v18, %v2100_v36  ;;  %vm8507_vm7 = vmmov %vm8501_vm1  ;;  %vm2841_vm15 = vcmp.lt.s32.totalorder %v5856_v54, 16 }
 0x5b0   : > { %v2116_v41 = vadd.f32 %v8493_v18, %v2102_v52  ;;  %v2117_v35 = vadd.f32 %v8493_v18, %v2103_v48  ;;  %vm8509_vm11 = vmmov %vm8501_vm1  ;;  %v4318_v52 = vld [vmem:[%s7908_s5 + $0x18] sm:$0xff] }
 0x5b1   : > { %v4306_v29 = vmul.f32 -1.442695, %v2114_v8  ;;  %vm8512_vm13 = vmmov %vm8511_vm8  ;;  %v4320_v48 = vld [vmem:[%s7909_s6 + $0x18] sm:$0xff] }
 0x5b2   : > { %v4308_v5 = vmul.f32 -1.442695, %v2116_v41  ;;  %v4309_v3 = vmul.f32 -1.442695, %v2117_v35  ;;  %v4319_v41 = vld [vmem:[%s7909_s6 + $0x10] sm:$0xff] }
 0x5b3   : > { %4655 = vpow2.f32 %v4306_v29 }
 0x5b4   : > { %4657 = vpow2.f32 %v4308_v5 }
 0x5b5   : > { %4659 = vpow2.f32 %v4309_v3 }
 0x5bc   : > { %v4654_v15 = vpop.eup %4653 }
 0x5bd   : > { %v2131_v38 = vadd.f32 1.0, %v4654_v15 }
 0x5bf   : > { %4661 = vrcp.f32 %v2131_v38 }
 0x5c0   : > { %v4656_v33 = vpop.eup %4655 }
 0x5c1   : > { %v4658_v42 = vpop.eup %4657  ;;  %v2130_v21 = vadd.f32 1.0, %v4656_v33 }
 0x5c2   : > { %v4660_v20 = vpop.eup %4659  ;;  %v2132_v31 = vadd.f32 1.0, %v4658_v42 }
 0x5c3   : > { %4663 = vrcp.f32 %v2130_v21  ;;  %v2133_v1 = vadd.f32 1.0, %v4660_v20 }
 0x5c4   : > { %4665 = vrcp.f32 %v2132_v31 }
 0x5c5   : > { %4667 = vrcp.f32 %v2133_v1  ;;  %v2342_v25 = vpop.xlane.xlu0 %2341 }
 0x5c6   : > { %v2346_v34 = vmul.f32 0.015625, %v2342_v25 }
 0x5cc   : > { %v4662_v2 = vpop.eup %4661 }
 0x5cd   : > { %v2149_v27 = vrot.slane %v4662_v2, %v8494_v55  ;;  %v4697_v2 = vld [vmem:[%s5840_s14 + $0x10] sm:$0xff] }
 0x5cf   : > { %v2163_v13 = vmul.f32 %v2149_v27, %v8495_v6  ;;  %v2159_v22 = vmul.f32 %v2149_v27, %v8497_v61  ;;  %v4698_v6 = vld [vmem:[%s5840_s14 + $0x18] sm:$0xff]  ;;  %v4329_v61 = vld [vmem:[%s7910_s7 + $0x50] sm:$0xff] }
 0x5d0   : > { %v4664_v17 = vpop.eup %4663 }
 0x5d1   : > { %v4666_v51 = vpop.eup %4665  ;;  %2202 = vmatprep.subr.mxu1 %v2163_v13  ;;  %v2145_v24 = vrot.slane %v4664_v17, %v8494_v55 }
 0x5d2   : > { %v4668_v60 = vpop.eup %4667  ;;  %v2153_v58 = vrot.slane %v4666_v51, %v8494_v55  ;;  %v4699_v51 = vld [vmem:[%s5840_s14] sm:$0xff] }
 0x5d3   : > { %v2162_v40 = vmul.f32 %v2145_v24, %v8496_v0  ;;  %v2157_v4 = vrot.slane %v4668_v60, %v8494_v55  ;;  %v2158_v19 = vmul.f32 %v2145_v24, %v8498_v62  ;;  %v4700_v60 = vld [vmem:[%s5840_s14 + $0x8] sm:$0xff]  ;;  %v4331_v62 = vld [vmem:[%s7910_s7 + $0x60] sm:$0xff]  ;;  %s8527_s14 = smov 41  }
 0x5d4   : > { %v2164_v57 = vmul.f32 %v2153_v58, %v8500_v45  ;;  %v2160_v63 = vmul.f32 %v2153_v58, %v8504_v10  ;;  %v4328_v58 = vld [vmem:[%s7910_s7 + $0x48] sm:$0xff] }
 0x5d5   : > { %2203 = vmatpush1.msra.mxu1 %v2162_v40  ;;  %v2165_v53 = vmul.f32 %v2157_v4, %v8499_v11  ;;  %v2161_v47 = vmul.f32 %v2157_v4, %v8502_v28  ;;  %v4326_v40 = vld [vmem:[%s7910_s7 + $0x38] sm:$0xff]  ;;  %v4327_v4 = vld [vmem:[%s7910_s7 + $0x40] sm:$0xff] }
 0x5d6   : > { %2204 = vmatprep.subr.mxu1 %v2159_v22  ;;  %v4330_v22 = vld [vmem:[%s7910_s7 + $0x58] sm:$0xff] }
 0x5d7   : > { %2205 = vmatpush1.msra.mxu1 %v2158_v19  ;;  %v4332_v19 = vld [vmem:[%s7910_s7 + $0x68] sm:$0x1] }
 0x5d8   : > { %4310 = vmatmul.mubr.msk.f32.vlgmr.msra.gmra.mxu1 %vm8501_vm1, %v2166_v59  ;;  %2279 = vmatprep.subr.mxu1 %v2165_v53  ;;  %vm8513_vm1 = vmmov %vm8510_vm3 }
 0x5d9   : > { %2280 = vmatpush1.msra.mxu1 %v2164_v57  ;;  %2244 = vmatprep.mubr.f32.mxu1 %v8503_v14  ;;  %vm8521_vm3 = vmmov %vm8505_vm5 }
 0x5da   : > { %2281 = vmatprep.subr.mxu1 %v2161_v47 }
 0x5db   : > { %2282 = vmatpush1.msra.mxu1 %v2160_v63 }
 0x5dc   : > { %4311 = vmatmul.mubr.msk.f32.gmra.mxu1 %vm8505_vm5, %v2167_v26  ;;  %4437 = vmatprep.subr.mxu1 %v8503_v14 }
 0x5dd   : > { %2315 = vmatprep.mubr.f32.mxu1 %v8503_v14 }
 0x5e0   : > { %4312 = vmatmul.mubr.msk.f32.vlgmr.msra.gmra.mxu1 %vm8506_vm10, %v2166_v59  ;;  %vm8518_vm10 = vmmov %vm8505_vm5 }
 0x5e1   : > { %2321 = vmatprep.mubr.f32.mxu1 %v8503_v14 }
 0x5e2   : > { %v2345_v49 = vpop.xlane.xlu1 %2344 }
 0x5e3   : > { %v2347_v12 = vmul.f32 0.015625, %v2345_v49 }
 0x5e4   : > { %4313 = vmatmul.mubr.msk.f32.gmra.mxu1 %vm8507_vm7, %v2167_v26  ;;  %vm8519_vm7 = vmmov %vm8505_vm5 }
 0x5e5   : > { %4441 = vmatprep.mubr.msk.f32.mxu1 %vm8508_vm6, %v8503_v14  ;;  %4438 = vmatpush3.msra.mxu1 %v2347_v12 }
 0x5e6   : > { %4439 = vmatprep.subr.mxu1 %v8503_v14 }
 0x5e7   : > { %4440 = vmatpush3.msra.mxu1 %v2346_v34 }
 0x5e8   : > { %4442 = vmatmul.mubr.msk.f32.vlgmr.msra.gmra.mxu1 %vm8509_vm11, %v4314_v7  ;;  %vm8520_vm11 = vmmov %vm8505_vm5 }
 0x5e9   : > { %2635 = vmatprep.mubr.f32.mxu1 %v8503_v14 }
 0x698   : > { %v2240_v23 = vpop.f32.mrf.mxu1 }
 0x699   : > { %2328 = vst [vmem:[%s6876_s11] sm:$0xff] %v2240_v23 }
 0x69a   : > { %v2242_v44 = vpop.f32.mrf.mxu1 }
 0x69b   : > { %2329 = vst [vmem:[%s6876_s11 + $0x8] sm:$0xff] %v2242_v44 }
 0x69c   : > { %v2246_v37 = vpop.f32.mrf.mxu1 }
 0x69d   : > { %2332 = vst [vmem:[%s6876_s11 + $0x20] sm:$0xff] %v2246_v37 }
 0x69e   : > { %v2248_v46 = vpop.f32.mrf.mxu1 }
 0x69f   : > { %2333 = vst [vmem:[%s6876_s11 + $0x28] sm:$0xff] %v2248_v46 }
 0x6a0   : > { %v2317_v16 = vpop.f32.mrf.mxu1 }
 0x6a1   : > { %2330 = vst [vmem:[%s6876_s11 + $0x10] sm:$0xff] %v2317_v16 }
 0x6a2   : > { %v2319_v43 = vpop.f32.mrf.mxu1 }
 0x6a3   : > { %2331 = vst [vmem:[%s6876_s11 + $0x18] sm:$0xff] %v2319_v43 }
 0x6a4   : > { %v2323_v18 = vpop.f32.mrf.mxu1 }
 0x6a5   : > { %2334 = vst [vmem:[%s6876_s11 + $0x30] sm:$0xff] %v2323_v18 }
 0x6a6   : > { %v2325_v56 = vpop.f32.mrf.mxu1 }
 0x6a7   : > { %2335 = vst [vmem:[%s6876_s11 + $0x38] sm:$0xff] %v2325_v56 }
 0x6a8   : > { %v2421_v9 = vpop.f32.mrf.mxu1 }
 0x6a9   : > { %v2422_v30 = vadd.f32 %v4315_v39, %v2421_v9 }
 0x6aa   : > { %v4443_v32 = vpop.f32.mrf.mxu1 }
 0x6ab   : > { %v2425_v36 = vmax.f32 %v2422_v30, 0.0 }
 0x6ad   : > { %4444 = vmatprep.subr.msk.mxu0 %vm8511_vm8, %v2425_v36  ;;  %vm8522_vm8 = vmmov %vm8521_vm3 }
 0x6ae   : > { %4445 = vmatpush3.msk.msra.mxu0 %vm8512_vm13, %v2425_v36  ;;  %vm8523_vm13 = vmmov %vm8521_vm3 }
 0x6af   : > { %4447 = vmatmul.mubr.msk.f32.vlgmr.msra.gmra.mxu0 %vm8513_vm1, %v4318_v52  ;;  %vm2967_vm1 = vcmp.lt.s32.totalorder %v5856_v54, 117 }
 0x6b0   : > { %3381 = vmatprep.mubr.f32.mxu0 %v8503_v14 }
 0x76f   : > { %v4448_v8 = vpop.f32.mrf.mxu0 }
 0x770   : > { %v2513_v35 = vadd.f32 %v4448_v8, %v4320_v48  ;;  %v4876_v8 = vmov 1  }
 0x771   : > { %v2507_v29 = vpop.f32.mrf.mxu0 }
 0x772   : > { %v4325_v5 = vmul.f32 -1.442695, %v2513_v35  ;;  %v2508_v3 = vadd.f32 %v4319_v41, %v2507_v29 }
 0x774   : > { %4669 = vpow2.f32 %v4325_v5  ;;  %v4324_v15 = vmul.f32 -1.442695, %v2508_v3 }
 0x776   : > { %4671 = vpow2.f32 %v4324_v15 }
 0x781   : > { %v4670_v38 = vpop.eup %4669 }
 0x782   : > { %v2523_v33 = vadd.f32 1.0, %v4670_v38 }
 0x783   : > { %v4672_v42 = vpop.eup %4671 }
 0x784   : > { %4673 = vrcp.f32 %v2523_v33  ;;  %v2522_v21 = vadd.f32 1.0, %v4672_v42 }
 0x786   : > { %4675 = vrcp.f32 %v2522_v21 }
 0x791   : > { %v4674_v20 = vpop.eup %4673 }
 0x792   : > { %2535 = vperm.xlu0 %4639, %v4674_v20  }
 0x793   : > { %v4676_v31 = vpop.eup %4675 }
 0x794   : > { %2530 = vperm.xlu1 %4640, %v4676_v31  }
 0x798   : > { %4641 = vset.pattern.permute.xlu1 %v4876_v8 }
 0x80d   : > { %v2536_v1 = vpop.permute.xlu0 %2535 }
 0x80e   : > { %v6903_v27 = vmul.f32 %v4697_v2, %v2536_v1  ;;  %v6906_v13 = vmul.f32 %v4698_v6, %v2536_v1 }
 0x80f   : > { %v2531_v17 = vpop.permute.xlu1 %2530 }
 0x810   : > { %8514 = vst [vmem:[#allocation37_spill] sm:$0xff] %v6903_v27  ;;  %8515 = vst [vmem:[#allocation39_spill] sm:$0xff] %v6906_v13  ;;  %v6909_v24 = vmul.f32 %v4699_v51, %v2531_v17  ;;  %v6912_v0 = vmul.f32 %v4700_v60, %v2531_v17  ;;  %2599 = vmatprep.subr.mxu1 %v6906_v13 }
 0x811   : > { %2600 = vmatpush1.msra.mxu1 %v6903_v27 }
 0x812   : > { %8516 = vst [vmem:[#allocation60_spill] sm:$0xff] %v6909_v24  ;;  %8517 = vst [vmem:[#allocation63_spill] sm:$0xff] %v6912_v0  ;;  %2601 = vmatprep.subr.mxu1 %v6912_v0 }
 0x813   : > { %2602 = vmatpush1.msra.mxu1 %v6909_v24 }
 0x814   : > { %4333 = vmatmul.mubr.msk.f32.vlgmr.msra.gmra.mxu1 %vm8505_vm5, %v4326_v40  ;;  %vm2978_vm5 = vcmp.lt.s32.totalorder %v5856_v54, 116 }
 0x815   : > { %2641 = vmatprep.mubr.f32.mxu1 %v8503_v14 }
 0x818   : > { %4334 = vmatmul.mubr.msk.f32.gmra.mxu1 %vm8518_vm10, %v4327_v4  ;;  %vm3000_vm10 = vcmp.lt.s32.totalorder %v5856_v54, 114 }
 0x819   : > { %2647 = vmatprep.mubr.f32.mxu1 %v8503_v14 }
 0x81c   : > { %4335 = vmatmul.mubr.msk.f32.gmra.mxu1 %vm8519_vm7, %v4328_v58  ;;  %vm2745_vm7 = vcmp.lt.s32.totalorder %v5856_v54, 39 }
 0x81d   : > { %2653 = vmatprep.mubr.f32.mxu1 %v8503_v14 }
 0x820   : > { %4336 = vmatmul.mubr.msk.f32.gmra.mxu1 %vm8520_vm11, %v4329_v61  ;;  %vm2756_vm11 = vcmp.lt.s32.totalorder %v5856_v54, 31 }
 0x821   : > { %2659 = vmatprep.mubr.f32.mxu1 %v8503_v14 }
 0x824   : > { %4337 = vmatmul.mubr.msk.f32.gmra.mxu1 %vm8521_vm3, %v4330_v22  ;;  %vm8550_vm3 = vcmp.lt.s32.totalorder %v5856_v54, 44 }
 0x825   : > { %2665 = vmatprep.mubr.f32.mxu1 %v8503_v14 }
 0x828   : > { %4338 = vmatmul.mubr.msk.f32.gmra.mxu1 %vm8522_vm8, %v4331_v62  ;;  %vm8551_vm8 = vmmov %vm8550_vm3 }
 0x829   : > { %2671 = vmatprep.mubr.f32.mxu1 %v8503_v14 }
 0x82c   : > { %4339 = vmatmul.mubr.msk.f32.gmra.mxu1 %vm8523_vm13, %v4332_v19  ;;  %vm8552_vm13 = vcmp.lt.s32.totalorder %v5856_v54, 43 }
 0x8d4   : > { %v2637_v59 = vpop.f32.mrf.mxu1 }
 0x8d5   : > { %2678 = vrot.lane.b32.xlu1 %v2637_v59, %s8524_s1  ;;  %v2686_v53 = vrot.slane %v2637_v59, 1  ;;  %v2696_v57 = vrot.slane %v2637_v59, 2  ;;  %v2706_v47 = vrot.slane %v2637_v59, 3  ;;  %v2716_v63 = vrot.slane %v2637_v59, 4 }
 0x8d6   : > { %v2639_v11 = vpop.f32.mrf.mxu1  ;;  %v2726_v25 = vrot.slane %v2637_v59, 5  ;;  %v2737_v12 = vrot.slane %v2637_v59, 6  ;;  %v2748_v7 = vrot.slane %v2637_v59, 7 }
 0x8d7   : > { %2680 = vrot.lane.b32.xlu0 %v2639_v11, %s8524_s1  ;;  %v2687_v45 = vrot.slane %v2639_v11, 1  ;;  %v2697_v28 = vrot.slane %v2639_v11, 2  ;;  %v2707_v10 = vrot.slane %v2639_v11, 3  ;;  %v2717_v26 = vrot.slane %v2639_v11, 4  ;;  %s4871_s1 = smov 29  }
 0x8d8   : > { %v2727_v49 = vrot.slane %v2639_v11, 5  ;;  %v2738_v34 = vrot.slane %v2639_v11, 6  ;;  %v2749_v50 = vrot.slane %v2639_v11, 7  ;;  %v2643_v23 = vpop.f32.mrf.mxu1 }
 0x8d9   : > { %2690 = vrot.lane.b32.xlu1 %v2686_v53, %s8525_s23  ;;  %v2768_v37 = vrot.slane %v2643_v23, 1  ;;  %v2779_v16 = vrot.slane %v2643_v23, 2  ;;  %v2790_v18 = vrot.slane %v2643_v23, 3  ;;  %v2801_v39 = vrot.slane %v2643_v23, 4 }
 0x8da   : > { %v2645_v44 = vpop.f32.mrf.mxu1  ;;  %v2812_v30 = vrot.slane %v2643_v23, 5  ;;  %v2822_v36 = vrot.slane %v2643_v23, 6  ;;  %v2833_v48 = vrot.slane %v2643_v23, 7 }
 0x8db   : > { %2692 = vrot.lane.b32.xlu0 %v2687_v45, %s8525_s23  ;;  %v2769_v46 = vrot.slane %v2645_v44, 1  ;;  %s8155_s23 = smov 28   ;;  %v2780_v43 = vrot.slane %v2645_v44, 2  ;;  %v2791_v56 = vrot.slane %v2645_v44, 3  ;;  %v2802_v9 = vrot.slane %v2645_v44, 4 }
 0x8dc   : > { %v2813_v32 = vrot.slane %v2645_v44, 5  ;;  %v2823_v52 = vrot.slane %v2645_v44, 6  ;;  %v2834_v41 = vrot.slane %v2645_v44, 7  ;;  %v2649_v35 = vpop.f32.mrf.mxu1 }
 0x8dd   : > { %2700 = vrot.lane.b32.xlu1 %v2696_v57, %s8526_s29  ;;  %v2853_v5 = vrot.slane %v2649_v35, 1  ;;  %v2864_v15 = vrot.slane %v2649_v35, 2  ;;  %v2875_v33 = vrot.slane %v2649_v35, 3  ;;  %v2886_v21 = vrot.slane %v2649_v35, 4 }
 0x8de   : > { %v2651_v29 = vpop.f32.mrf.mxu1  ;;  %v2897_v31 = vrot.slane %v2649_v35, 5  ;;  %v2907_v2 = vrot.slane %v2649_v35, 6  ;;  %v2917_v51 = vrot.slane %v2649_v35, 7 }
 0x8df   : > { %2702 = vrot.lane.b32.xlu0 %v2697_v28, %s8526_s29  ;;  %s8153_s29 = smov 27   ;;  %v2854_v3 = vrot.slane %v2651_v29, 1  ;;  %v2865_v38 = vrot.slane %v2651_v29, 2  ;;  %v2876_v42 = vrot.slane %v2651_v29, 3  ;;  %v2887_v20 = vrot.slane %v2651_v29, 4 }
 0x8e0   : > { %v2898_v1 = vrot.slane %v2651_v29, 5  ;;  %v2908_v6 = vrot.slane %v2651_v29, 6  ;;  %v6987_v17 = vpop.f32.mrf.mxu1  ;;  %v2918_v60 = vrot.slane %v2651_v29, 7 }
 0x8e1   : > { %2710 = vrot.lane.b32.xlu1 %v2706_v47, %s8218_s18  ;;  %v2929_v40 = vrot.slane %v6987_v17, 1  ;;  %v2939_v61 = vrot.slane %v6987_v17, 2  ;;  %v2949_v62 = vrot.slane %v6987_v17, 3  ;;  %v2959_v59 = vrot.slane %v6987_v17, 4 }
 0x8e2   : > { %v6992_v4 = vpop.f32.mrf.mxu1  ;;  %v2970_v53 = vrot.slane %v6987_v17, 5  ;;  %v2981_v28 = vrot.slane %v6987_v17, 6 }
 0x8e3   : > { %2712 = vrot.lane.b32.xlu0 %v2707_v10, %s8218_s18  ;;  %s4870_s18 = smov 30   ;;  %v2930_v58 = vrot.slane %v6992_v4, 1  ;;  %v2940_v22 = vrot.slane %v6992_v4, 2  ;;  %v2950_v19 = vrot.slane %v6992_v4, 3  ;;  %v2960_v11 = vrot.slane %v6992_v4, 4 }
 0x8e4   : > { %v2971_v45 = vrot.slane %v6992_v4, 5  ;;  %v2982_v10 = vrot.slane %v6992_v4, 6 }
 0x8e5   : > { %2720 = vrot.lane.b32.xlu1 %v2716_v63, %s8527_s14 }
 0x8e7   : > { %2722 = vrot.lane.b32.xlu0 %v2717_v26, %s8527_s14  ;;  %s4874_s14 = smov 26   ;;  %v2992_v26 = vrot.slane %v6987_v17, 7 }
 0x8e9   : > { %2730 = vrot.lane.b32.xlu1 %v2726_v25, %s4867_s19 }
 0x8eb   : > { %2732 = vrot.lane.b32.xlu0 %v2727_v49, %s4867_s19  ;;  %s8528_s19 = smov 25   ;;  %v2993_v49 = vrot.slane %v6992_v4, 7 }
 0x8ed   : > { %2741 = vrot.lane.b32.xlu1 %v2737_v12, %s4868_s0  ;;  %v2661_v12 = vpop.f32.mrf.mxu1 }
 0x8ef   : > { %2743 = vrot.lane.b32.xlu0 %v2738_v34, %s4868_s0  ;;  %s8154_s0 = smov 17  }
 0x8f1   : > { %2752 = vrot.lane.b32.xlu1 %v2748_v7, %s4869_s21 }
 0x8f3   : > { %2754 = vrot.lane.b32.xlu0 %v2749_v50, %s4869_s21  ;;  %v2663_v50 = vpop.f32.mrf.mxu1 }
 0x8f4   : > { %v3045_v8 = vrot.slane %v2663_v50, 4 }
 0x8f5   : > { %2759 = vrot.lane.b32.xlu1 %v2643_v23, %s4870_s18 }
 0x8f7   : > { %2761 = vrot.lane.b32.xlu0 %v2645_v44, %s4870_s18  ;;  %v3012_v44 = vrot.slane %v2661_v12, 1 }
 0x8f9   : > { %2772 = vrot.lane.b32.xlu1 %v2768_v37, %s4871_s1 }
 0x8fb   : > { %2774 = vrot.lane.b32.xlu0 %v2769_v46, %s4871_s1  ;;  %v3013_v46 = vrot.slane %v2663_v50, 1 }
 0x8fd   : > { %2783 = vrot.lane.b32.xlu1 %v2779_v16, %s8155_s23 }
 0x8ff   : > { %2785 = vrot.lane.b32.xlu0 %v2780_v43, %s8155_s23  ;;  %s8158_s23 = smov 12   ;;  %v3023_v43 = vrot.slane %v2661_v12, 2 }
 0x901   : > { %2794 = vrot.lane.b32.xlu1 %v2790_v18, %s8153_s29 }
 0x903   : > { %2796 = vrot.lane.b32.xlu0 %v2791_v56, %s8153_s29  ;;  %s8156_s29 = smov 16   ;;  %v3024_v56 = vrot.slane %v2663_v50, 2 }
 0x905   : > { %2805 = vrot.lane.b32.xlu1 %v2801_v39, %s4874_s14 }
 0x907   : > { %2807 = vrot.lane.b32.xlu0 %v2802_v9, %s4874_s14  ;;  %s4878_s14 = smov 15   ;;  %v3034_v9 = vrot.slane %v2661_v12, 3 }
 0x909   : > { %2816 = vrot.lane.b32.xlu1 %v2812_v30, %s8528_s19 }
 0x90b   : > { %2818 = vrot.lane.b32.xlu0 %v2813_v32, %s8528_s19  ;;  %s4879_s19 = smov 14   ;;  %v3035_v32 = vrot.slane %v2663_v50, 3 }
 0x90d   : > { %2826 = vrot.lane.b32.xlu1 %v2822_v36, %s8154_s0 }
 0x90f   : > { %2828 = vrot.lane.b32.xlu0 %v2823_v52, %s8154_s0  ;;  %s8159_s0 = smov 13   ;;  %v3044_v52 = vrot.slane %v2661_v12, 4 }
 0x911   : > { %2837 = vrot.lane.b32.xlu1 %v2833_v48, %s8156_s29 }
 0x913   : > { %2839 = vrot.lane.b32.xlu0 %v2834_v41, %s8156_s29  ;;  %s8530_s29 = smov 1  }
 0x915   : > { %2844 = vrot.lane.b32.xlu1 %v2649_v35, %s4878_s14  ;;  %v3055_v35 = vrot.slane %v2661_v12, 5 }
 0x917   : > { %2846 = vrot.lane.b32.xlu0 %v2651_v29, %s4878_s14  ;;  %s8157_s14 = smov 11  }
 0x919   : > { %2857 = vrot.lane.b32.xlu1 %v2853_v5, %s4879_s19  ;;  %v3056_v5 = vrot.slane %v2663_v50, 5 }
 0x91b   : > { %2859 = vrot.lane.b32.xlu0 %v2854_v3, %s4879_s19  ;;  %s8529_s19 = smov 3  }
 0x91d   : > { %2868 = vrot.lane.b32.xlu1 %v2864_v15, %s8159_s0  ;;  %v3066_v15 = vrot.slane %v2661_v12, 6 }
 0x91f   : > { %2870 = vrot.lane.b32.xlu0 %v2865_v38, %s8159_s0  ;;  %s8162_s0 = smov 115  }
 0x921   : > { %2879 = vrot.lane.b32.xlu1 %v2875_v33, %s8158_s23  ;;  %v3067_v33 = vrot.slane %v2663_v50, 6 }
 0x923   : > { %2881 = vrot.lane.b32.xlu0 %v2876_v42, %s8158_s23  ;;  %s8161_s23 = smov 116  }
 0x925   : > { %2890 = vrot.lane.b32.xlu1 %v2886_v21, %s8157_s14  ;;  %v3077_v21 = vrot.slane %v2661_v12, 7 }
 0x927   : > { %2892 = vrot.lane.b32.xlu0 %v2887_v20, %s8157_s14  ;;  %s8160_s14 = smov 117  }
 0x929   : > { %2901 = vrot.lane.b32.xlu1 %v2897_v31, %s8529_s19  ;;  %v3078_v31 = vrot.slane %v2663_v50, 7 }
 0x92b   : > { %2903 = vrot.lane.b32.xlu0 %v2898_v1, %s8529_s19  ;;  %v2667_v1 = vpop.f32.mrf.mxu1 }
 0x92d   : > { %2911 = vrot.lane.b32.xlu1 %v2907_v2, %s8226_s26 }
 0x92f   : > { %2913 = vrot.lane.b32.xlu0 %v2908_v6, %s8226_s26 }
 0x931   : > { %2921 = vrot.lane.b32.xlu1 %v2917_v51, %s8530_s29  ;;  %v2669_v51 = vpop.f32.mrf.mxu1 }
 0x933   : > { %2923 = vrot.lane.b32.xlu0 %v2918_v60, %s8530_s29 }
 0x935   : > { %2933 = vrot.lane.b32.xlu1 %v2929_v40, %s8227_s16  ;;  %v3097_v40 = vrot.slane %v2667_v1, 1 }
 0x937   : > { %2935 = vrot.lane.b32.xlu0 %v2930_v58, %s8227_s16 }
 0x939   : > { %2943 = vrot.lane.b32.xlu1 %v2939_v61, %s8229_s30  ;;  %v3098_v61 = vrot.slane %v2669_v51, 1 }
 0x93b   : > { %2945 = vrot.lane.b32.xlu0 %v2940_v22, %s8229_s30 }
 0x93d   : > { %2953 = vrot.lane.b32.xlu1 %v2949_v62, %s8228_s20  ;;  %v3108_v62 = vrot.slane %v2667_v1, 2 }
 0x93f   : > { %2955 = vrot.lane.b32.xlu0 %v2950_v19, %s8228_s20 }
 0x941   : > { %2963 = vrot.lane.b32.xlu1 %v2959_v59, %s8160_s14  ;;  %v3109_v59 = vrot.slane %v2669_v51, 2 }
 0x943   : > { %2965 = vrot.lane.b32.xlu0 %v2960_v11, %s8160_s14  ;;  %s4886_s14 = smov 114  }
 0x945   : > { %2974 = vrot.lane.b32.xlu1 %v2970_v53, %s8161_s23  ;;  %v3119_v53 = vrot.slane %v2667_v1, 3 }
 0x947   : > { %v7013_v57 = vpop.permute.xlu1 %2678  ;;  %2976 = vrot.lane.b32.xlu0 %v2971_v45, %s8161_s23  ;;  %s4887_s23 = smov 113  }
 0x949   : > { %v7017_v47 = vpop.permute.xlu0 %2680  ;;  %2985 = vrot.lane.b32.xlu1 %v2981_v28, %s8162_s0  ;;  %v3120_v28 = vrot.slane %v2669_v51, 3 }
 0x94b   : > { %v7021_v63 = vpop.permute.xlu1 %2690  ;;  %2987 = vrot.lane.b32.xlu0 %v2982_v10, %s8162_s0  ;;  %s4888_s0 = smov 112  }
 0x94d   : > { %v7025_v25 = vpop.permute.xlu0 %2692  ;;  %2996 = vrot.lane.b32.xlu1 %v2992_v26, %s4886_s14  ;;  %v3130_v26 = vrot.slane %v2667_v1, 4 }
 0x94f   : > { %v7028_v34 = vpop.permute.xlu1 %2700  ;;  %2998 = vrot.lane.b32.xlu0 %v2993_v49, %s4886_s14  ;;  %s4889_s14 = smov 111  }
 0x951   : > { %v7030_v7 = vpop.permute.xlu0 %2702  ;;  %3003 = vrot.lane.b32.xlu1 %v2661_v12, %s4887_s23  ;;  %v3131_v12 = vrot.slane %v2669_v51, 4 }
 0x953   : > { %v7032_v23 = vpop.permute.xlu1 %2710  ;;  %3005 = vrot.lane.b32.xlu0 %v2663_v50, %s4887_s23  ;;  %s4890_s23 = smov 102  }
 0x955   : > { %v7034_v37 = vpop.permute.xlu0 %2712  ;;  %3016 = vrot.lane.b32.xlu1 %v3012_v44, %s4888_s0  ;;  %v3140_v44 = vrot.slane %v2667_v1, 5 }
 0x957   : > { %v7036_v16 = vpop.permute.xlu1 %2720  ;;  %3018 = vrot.lane.b32.xlu0 %v3013_v46, %s4888_s0  ;;  %s8163_s0 = smov 101  }
 0x959   : > { %v7038_v18 = vpop.permute.xlu0 %2722  ;;  %3027 = vrot.lane.b32.xlu1 %v3023_v43, %s4889_s14  ;;  %v3141_v43 = vrot.slane %v2669_v51, 5 }
 0x95b   : > { %v7041_v39 = vpop.permute.xlu1 %2730  ;;  %3029 = vrot.lane.b32.xlu0 %v3024_v56, %s4889_s14 }
 0x95d   : > { %v7044_v30 = vpop.permute.xlu0 %2732  ;;  %3038 = vrot.lane.b32.xlu1 %v3034_v9, %s8268_s13  ;;  %v3150_v9 = vrot.slane %v2667_v1, 6 }
 0x95f   : > { %v7047_v36 = vpop.permute.xlu1 %2741  ;;  %3040 = vrot.lane.b32.xlu0 %v3035_v32, %s8268_s13  ;;  %s8164_s13 = smov 100  }
 0x961   : > { %v7050_v48 = vpop.permute.xlu0 %2743  ;;  %3048 = vrot.lane.b32.xlu1 %v3044_v52, %s4890_s23  ;;  %v3151_v52 = vrot.slane %v2669_v51, 6 }
 0x963   : > { %v7052_v41 = vpop.permute.xlu1 %2752  ;;  %3050 = vrot.lane.b32.xlu0 %v3045_v8, %s4890_s23  ;;  %s8165_s23 = smov 99  }
 0x965   : > { %v7054_v29 = vpop.permute.xlu0 %2754  ;;  %3059 = vrot.lane.b32.xlu1 %v3055_v35, %s8163_s0  ;;  %v3160_v35 = vrot.slane %v2667_v1, 7 }
 0x967   : > { %v7057_v3 = vpop.permute.xlu1 %2759  ;;  %3061 = vrot.lane.b32.xlu0 %v3056_v5, %s8163_s0  ;;  %s8166_s0 = smov 98  }
 0x969   : > { %v7060_v38 = vpop.permute.xlu0 %2761  ;;  %3070 = vrot.lane.b32.xlu1 %v3066_v15, %s8164_s13  ;;  %v3161_v15 = vrot.slane %v2669_v51, 7 }
 0x96b   : > { %v7063_v42 = vpop.permute.xlu1 %2772  ;;  %3072 = vrot.lane.b32.xlu0 %v3067_v33, %s8164_s13  ;;  %s4895_s13 = smov 97   ;;  %v3272_v33 = vld [vmem:[%s7912_s9] sm:$0x1] }
 0x96d   : > { %v7066_v20 = vpop.permute.xlu0 %2774  ;;  %3081 = vrot.lane.b32.xlu1 %v3077_v21, %s8165_s23  ;;  %v2673_v21 = vpop.f32.mrf.mxu1 }
 0x96f   : > { %v7069_v2 = vpop.permute.xlu1 %2783  ;;  %3083 = vrot.lane.b32.xlu0 %v3078_v31, %s8165_s23  ;;  %s4896_s23 = smov 89  }
 0x971   : > { %v7072_v6 = vpop.permute.xlu0 %2785  ;;  %3088 = vrot.lane.b32.xlu1 %v2667_v1, %s8166_s0 }
 0x973   : > { %v7075_v60 = vpop.permute.xlu1 %2794  ;;  %3090 = vrot.lane.b32.xlu0 %v2669_v51, %s8166_s0  ;;  %s4897_s0 = smov 88   ;;  %v8539_v51 = vmov 0  }
 0x975   : > { %v7078_v58 = vpop.permute.xlu0 %2796  ;;  %3101 = vrot.lane.b32.xlu1 %v3097_v40, %s4895_s13 }
 0x977   : > { %v7081_v22 = vpop.permute.xlu1 %2805  ;;  %3103 = vrot.lane.b32.xlu0 %v3098_v61, %s4895_s13  ;;  %v2675_v61 = vpop.f32.mrf.mxu1 }
 0x979   : > { %v7084_v19 = vpop.permute.xlu0 %2807  ;;  %3112 = vrot.lane.b32.xlu1 %v3108_v62, %s4896_s23 }
 0x97b   : > { %v7086_v11 = vpop.permute.xlu1 %2816  ;;  %3114 = vrot.lane.b32.xlu0 %v3109_v59, %s4896_s23 }
 0x97d   : > { %v7088_v45 = vpop.permute.xlu0 %2818  ;;  %3123 = vrot.lane.b32.xlu1 %v3119_v53, %s4897_s0 }
 0x97f   : > { %v7090_v10 = vpop.permute.xlu1 %2826  ;;  %3125 = vrot.lane.b32.xlu0 %v3120_v28, %s4897_s0  ;;  %s4899_s0 = smov 33  }
 0x981   : > { %v7092_v49 = vpop.permute.xlu0 %2828  ;;  %3134 = vrot.lane.b32.xlu1 %v3130_v26, %s8264_s12 }
 0x983   : > { %v7095_v50 = vpop.permute.xlu1 %2837  ;;  %3136 = vrot.lane.b32.xlu0 %v3131_v12, %s8264_s12  ;;  %s8621_s12 = smov 13  }
 0x985   : > { %v7098_v46 = vpop.permute.xlu0 %2839  ;;  %3144 = vrot.lane.b32.xlu1 %v3140_v44, %s8271_s25 }
 0x987   : > { %v7101_v56 = vpop.permute.xlu1 %2844  ;;  %3146 = vrot.lane.b32.xlu0 %v3141_v43, %s8271_s25  ;;  %s8614_s25 = smov 28  }
 0x988   : > { %8531 = vst [vmem:[#allocation52_spill] sm:$0xff] %v7101_v56 }
 0x989   : > { %v7104_v32 = vpop.permute.xlu0 %2846  ;;  %3154 = vrot.lane.b32.xlu1 %v3150_v9, %s8267_s10 }
 0x98a   : > { %8532 = vst [vmem:[#allocation55_spill] sm:$0xff] %v7104_v32 }
 0x98b   : > { %v7107_v8 = vpop.permute.xlu1 %2857  ;;  %3156 = vrot.lane.b32.xlu0 %v3151_v52, %s8267_s10  ;;  %s4390_s10 = sshll.u32 %s5036_s15, 4  ;;  %s4278_s15 = sshll.u32 %s6873_s17, 5 }
 0x98c   : > { %8533 = vst [vmem:[#allocation56_spill] sm:$0xff] %v7107_v8  ;;  %s7627_s23 = scalar_lea.vmem [#allocation4], %s4278_s15  ;;  %s8620_s15 = smov 17  }
 0x98d   : > { %v7110_v5 = vpop.permute.xlu0 %2859  ;;  %3164 = vrot.lane.b32.xlu1 %v3160_v35, %s8274_s27 }
 0x98e   : > { %8534 = vst [vmem:[#allocation59_spill] sm:$0xff] %v7110_v5 }
 0x98f   : > { %v7116_v31 = vpop.permute.xlu1 %2868  ;;  %3166 = vrot.lane.b32.xlu0 %v3161_v15, %s8274_s27  ;;  %s8615_s27 = smov 27  }
 0x990   : > { %8535 = vst [vmem:[#allocation58_spill] sm:$0xff] %v7116_v31 }
 0x991   : > { %v7119_v40 = vpop.permute.xlu0 %2870  ;;  %3275 = vperm.xlu1 %4641, %v3272_v33  }
 0x992   : > { %8536 = vst [vmem:[#allocation61_spill] sm:$0xff] %v7119_v40 }
 0x993   : > { %v7121_v1 = vpop.permute.xlu1 %2879  ;;  %3170 = vrot.lane.b32.xlu0 %v2673_v21, %s8287_s24 }
 0x994   : > { %8537 = vst [vmem:[#allocation48_spill] sm:$0xff] %v7121_v1 }
 0x995   : > { %v7124_v62 = vpop.permute.xlu0 %2881  ;;  %3172 = vrot.lane.b32.xlu1 %v2675_v61, %s8287_s24  ;;  %s469_s24 = scalar_lea.vmem %s7905_s2, %s4390_s10  ;;  %s4900_s10 = smov 32  }
 0x996   : > { %8538 = vst [vmem:[#allocation51_spill] sm:$0xff] %v7124_v62  ;;  %4642 = vset.pattern.permute.xlu1 %v8539_v51  ;;  %v7148_v61 = vld [vmem:[%s469_s24 + $0x8] sm:$0xff]  ;;  %v7156_v31 = vld [vmem:[%s469_s24] sm:$0xff]  ;;  %s8619_s24 = smov 19  }
 0x997   : > { %v7128_v59 = vpop.permute.xlu1 %2890  ;;  %8547 = vst [vmem:[#allocation42_spill] sm:$0xff] %v7148_v61  ;;  %8548 = vst [vmem:[#allocation44_spill] sm:$0xff] %v7156_v31 }
 0x998   : > { %8540 = vst [vmem:[#allocation50_spill] sm:$0xff] %v7128_v59 }
 0x999   : > { %v7130_v53 = vpop.permute.xlu0 %2892 }
 0x99a   : > { %8541 = vst [vmem:[#allocation53_spill] sm:$0xff] %v7130_v53 }
 0x99b   : > { %v7132_v28 = vpop.permute.xlu1 %2901 }
 0x99c   : > { %8542 = vst [vmem:[#allocation54_spill] sm:$0xff] %v7132_v28 }
 0x99d   : > { %v7134_v26 = vpop.permute.xlu0 %2903 }
 0x99e   : > { %8543 = vst [vmem:[#allocation57_spill] sm:$0xff] %v7134_v26 }
 0x99f   : > { %v7136_v12 = vpop.permute.xlu1 %2911 }
 0x9a0   : > { %8544 = vst [vmem:[#allocation40_spill] sm:$0xff] %v7136_v12 }
 0x9a1   : > { %v7138_v44 = vpop.permute.xlu0 %2913 }
 0x9a2   : > { %8545 = vst [vmem:[#allocation43_spill] sm:$0xff] %v7138_v44 }
 0x9a3   : > { %v7140_v43 = vpop.permute.xlu1 %2921 }
 0x9a4   : > { %8546 = vst [vmem:[#allocation38_spill] sm:$0xff] %v7140_v43 }
 0x9a5   : > { %v7142_v9 = vpop.permute.xlu0 %2923 }
 0x9a7   : > { %v2934_v52 = vpop.permute.xlu1 %2933 }
 0x9a9   : > { %v2936_v35 = vpop.permute.xlu0 %2935 }
 0x9ab   : > { %v2944_v15 = vpop.permute.xlu1 %2943 }
 0x9ad   : > { %v2946_v33 = vpop.permute.xlu0 %2945 }
 0x9af   : > { %v2954_v21 = vpop.permute.xlu1 %2953 }
 0x9b1   : > { %v2956_v51 = vpop.permute.xlu0 %2955 }
 0x9b2   : > { %v2957_v14 = vsel %vm1485_vm2, %v2954_v21, %v2956_v51  ;;  %v2958_v24 = vsel %vm1485_vm2, %v2956_v51, %v2954_v21  ;;  %3402 = vadd.xlane.f32.xlu0 %v7148_v61  ;;  %vm2989_vm2 = vcmp.lt.s32.totalorder %v5856_v54, 115 }
 0x9b3   : > { %v2964_v0 = vpop.permute.xlu1 %2963 }
 0x9b5   : > { %v2966_v13 = vpop.permute.xlu0 %2965 }
 0x9b6   : > { %v2968_v27 = vsel %vm2967_vm1, %v2964_v0, %v2966_v13  ;;  %v2969_v55 = vsel %vm2967_vm1, %v2966_v13, %v2964_v0  ;;  %v2937_v13 = vsel %vm1443_vm14, %v2934_v52, %v2936_v35  ;;  %v2938_v0 = vsel %vm1443_vm14, %v2936_v35, %v2934_v52 }
 0x9b7   : > { %v2975_v40 = vpop.permute.xlu1 %2974  ;;  %vm2734_vm14 = vcmp.lt.s32.totalorder %v5856_v54, 40  ;;  %vm2763_vm1 = vcmp.lt.s32.totalorder %v5856_v54, 30 }
 0x9b9   : > { %v2977_v59 = vpop.permute.xlu0 %2976  ;;  %3400 = vadd.xlane.f32.xlu1 %v7156_v31  ;;  %v3201_v31 = vadd.f32 %v2938_v0, %v6992_v4 }
 0x9ba   : > { %v2979_v53 = vsel %vm2978_vm5, %v2975_v40, %v2977_v59  ;;  %v2980_v1 = vsel %vm2978_vm5, %v2977_v59, %v2975_v40  ;;  %v2947_v40 = vsel %vm1464_vm9, %v2944_v15, %v2946_v33  ;;  %vm2776_vm5 = vcmp.lt.s32.totalorder %v5856_v54, 29 }
 0x9bb   : > { %v3204_v62 = vadd.f32 %v2979_v53, %v2968_v27  ;;  %v3205_v21 = vadd.f32 %v2980_v1, %v2969_v55  ;;  %v2986_v51 = vpop.permute.xlu1 %2985  ;;  %v2948_v55 = vsel %vm1464_vm9, %v2946_v33, %v2944_v15  ;;  %v3202_v27 = vadd.f32 %v2957_v14, %v2947_v40 }
 0x9bc   : > { %v3203_v1 = vadd.f32 %v2958_v24, %v2948_v55  ;;  %vm8549_vm9 = vcmp.lt.s32.totalorder %v5856_v54, 42  ;;  %v2694_v55 = vsel %vm8550_vm3, %v7021_v63, %v7025_v25  ;;  %vm8553_vm3 = vcmp.lt.s32.totalorder %v5856_v54, 45 }
 0x9bd   : > { %v2988_v61 = vpop.permute.xlu0 %2987  ;;  %v2715_v0 = vsel %vm8549_vm9, %v7034_v37, %v7032_v23  ;;  %vm2809_vm9 = vcmp.lt.s32.totalorder %v5856_v54, 26 }
 0x9be   : > { %v2990_v12 = vsel %vm2989_vm2, %v2986_v51, %v2988_v61  ;;  %v2991_v44 = vsel %vm2989_vm2, %v2988_v61, %v2986_v51  ;;  %v3200_v51 = vadd.f32 %v2937_v13, %v6987_v17  ;;  %v3237_v35 = vadd.f32 %v3203_v1, %v3201_v31 }
 0x9bf   : > { %v2997_v28 = vpop.permute.xlu1 %2996  ;;  %v2705_v1 = vsel %vm8552_vm13, %v7030_v7, %v7028_v34  ;;  %vm2787_vm2 = vcmp.lt.s32.totalorder %v5856_v54, 28  ;;  %vm8555_vm13 = vcmp.lt.s32.totalorder %v5856_v54, 42 }
 0x9c0   : > { %v3236_v52 = vadd.f32 %v3202_v27, %v3200_v51  ;;  %v2695_v27 = vsel %vm8551_vm8, %v7025_v25, %v7021_v63  ;;  %v2682_v63 = vsel %vm8553_vm3, %v7013_v57, %v7017_v47  ;;  %vm8554_vm8 = vmmov %vm8553_vm3  ;;  %vm8556_vm3 = vcmp.lt.s32.totalorder %v5856_v54, 43 }
 0x9c1   : > { %v2999_v59 = vpop.permute.xlu0 %2998  ;;  %v2683_v25 = vsel %vm8554_vm8, %v7017_v47, %v7013_v57  ;;  %v2735_v57 = vsel %vm2734_vm14, %v7041_v39, %v7044_v30  ;;  %v2736_v47 = vsel %vm2734_vm14, %v7044_v30, %v7041_v39  ;;  %vm8557_vm8 = vcmp.lt.s32.totalorder %v5856_v54, 41 }
 0x9c2   : > { %v3001_v53 = vsel %vm3000_vm10, %v2997_v28, %v2999_v59  ;;  %v3002_v61 = vsel %vm3000_vm10, %v2999_v59, %v2997_v28  ;;  %vm2798_vm10 = vcmp.lt.s32.totalorder %v5856_v54, 27  ;;  %v2724_v39 = vsel %vm8557_vm8, %v7036_v16, %v7038_v18  ;;  %vm8558_vm14 = vmmov %vm8557_vm8 }
 0x9c3   : > { %v3206_v26 = vadd.f32 %v3001_v53, %v2990_v12  ;;  %v3207_v8 = vadd.f32 %v3002_v61, %v2991_v44  ;;  %v7172_v5 = vpop.permute.xlu1 %3003  ;;  %v3178_v53 = vadd.f32 %v2715_v0, %v2705_v1  ;;  %v2714_v61 = vsel %vm8555_vm13, %v7032_v23, %v7034_v37 }
 0x9c4   : > { %v2704_v0 = vsel %vm8556_vm3, %v7028_v34, %v7030_v7  ;;  %v2757_v23 = vsel %vm2756_vm11, %v7052_v41, %v7054_v29  ;;  %v2758_v34 = vsel %vm2756_vm11, %v7054_v29, %v7052_v41  ;;  %v2725_v30 = vsel %vm8558_vm14, %v7038_v18, %v7036_v16 }
 0x9c5   : > { %v3238_v56 = vadd.f32 %v3206_v26, %v3204_v62  ;;  %v3239_v32 = vadd.f32 %v3207_v8, %v3205_v21  ;;  %v7174_v43 = vpop.permute.xlu0 %3005  ;;  %v3179_v37 = vadd.f32 %v2714_v61, %v2704_v0  ;;  %vm2848_vm13 = vcmp.lt.s32.totalorder %v5856_v54, 15 }
 0x9c6   : > { %vm2861_vm3 = vcmp.lt.s32.totalorder %v5856_v54, 14  ;;  %v2746_v41 = vsel %vm2745_vm7, %v7047_v36, %v7050_v48  ;;  %v2747_v29 = vsel %vm2745_vm7, %v7050_v48, %v7047_v36  ;;  %v2800_v16 = vsel %vm2798_vm10, %v7078_v58, %v7075_v60 }
 0x9c7   : > { %v7176_v15 = vadd.f32 %v3238_v56, %v3236_v52  ;;  %v7178_v14 = vadd.f32 %v3239_v32, %v3237_v35  ;;  %v7180_v24 = vpop.permute.xlu1 %3016  ;;  %v3176_v52 = vadd.f32 %v2695_v27, %v2683_v25  ;;  %v3177_v35 = vadd.f32 %v2694_v55, %v2682_v63 }
 0x9c8   : > { %v2799_v27 = vsel %vm2798_vm10, %v7075_v60, %v7078_v58  ;;  %v3180_v1 = vadd.f32 %v2736_v47, %v2725_v30  ;;  %v3182_v63 = vadd.f32 %v2758_v34, %v2747_v29  ;;  %v3183_v25 = vadd.f32 %v2757_v23, %v2746_v41 }
 0x9c9   : > { %v7182_v28 = vpop.permute.xlu0 %3018  ;;  %v7276_v55 = vadd.f32 %v3178_v53, %v3176_v52  ;;  %v3181_v53 = vadd.f32 %v2735_v57, %v2724_v39  ;;  %vm2883_vm11 = vcmp.lt.s32.totalorder %v5856_v54, 12  ;;  %v2788_v36 = vsel %vm2787_vm2, %v7069_v2, %v7072_v6 }
 0x9ca   : > { %v2789_v48 = vsel %vm2787_vm2, %v7072_v6, %v7069_v2  ;;  %v2842_v60 = vsel %vm2841_vm15, %v7095_v50, %v7098_v46  ;;  %v2843_v58 = vsel %vm2841_vm15, %v7098_v46, %v7095_v50  ;;  %vm2894_vm7 = vcmp.lt.s32.totalorder %v5856_v54, 11 }
 0x9cb   : > { %v7184_v17 = vpop.permute.xlu1 %3027  ;;  %v2777_v52 = vsel %vm2776_vm5, %v7063_v42, %v7066_v20  ;;  %v2778_v2 = vsel %vm2776_vm5, %v7066_v20, %v7063_v42  ;;  %v3186_v6 = vadd.f32 %v2800_v16, %v2789_v48  ;;  %v3187_v0 = vadd.f32 %v2799_v27, %v2788_v36 }
 0x9cc   : > { %vm2872_vm2 = vcmp.lt.s32.totalorder %v5856_v54, 13  ;;  %vm8559_vm15 = vcmp.lt.s32.totalorder %v5856_v54, 25  ;;  %v2831_v57 = vsel %vm2830_vm0, %v7090_v10, %v7092_v49  ;;  %v2832_v42 = vsel %vm2830_vm0, %v7092_v49, %v7090_v10 }
 0x9cd   : > { %v7186_v4 = vpop.permute.xlu0 %3029  ;;  %v2820_v50 = vsel %vm8559_vm15, %v7086_v11, %v7088_v45  ;;  %vm8560_vm10 = vmmov %vm8559_vm15  ;;  %v2764_v47 = vsel %vm2763_vm1, %v7057_v3, %v7060_v38  ;;  %v3191_v23 = vadd.f32 %v2842_v60, %v2831_v57  ;;  %vm3007_vm5 = vcmp.lt.s32.totalorder %v5856_v54, 113 }
 0x9ce   : > { %v2821_v46 = vsel %vm8560_vm10, %v7088_v45, %v7086_v11  ;;  %v2765_v11 = vsel %vm2763_vm1, %v7060_v38, %v7057_v3  ;;  %v3190_v45 = vadd.f32 %v2843_v58, %v2832_v42  ;;  %v3185_v39 = vadd.f32 %v2777_v52, %v2764_v47  ;;  %v8564_v58 = vld [vmem:[#allocation59_spill] sm:$0xff]  ;;  %v8565_v52 = vld [vmem:[#allocation56_spill] sm:$0xff] }
 0x9cf   : > { %v7188_v12 = vpop.permute.xlu1 %3038  ;;  %v3184_v34 = vadd.f32 %v2778_v2, %v2765_v11  ;;  %v2810_v10 = vsel %vm2809_vm9, %v7081_v22, %v7084_v19  ;;  %v2811_v49 = vsel %vm2809_vm9, %v7084_v19, %v7081_v22  ;;  %vm3031_vm0 = vcmp.lt.s32.totalorder %v5856_v54, 111  ;;  %v8570_v42 = vld [vmem:[#allocation43_spill] sm:$0xff]  ;;  %v8571_v47 = vld [vmem:[#allocation40_spill] sm:$0xff] }
 0x9d0   : > { %v7373_v3 = vadd.f32 %v3179_v37, %v3177_v35  ;;  %v3188_v38 = vadd.f32 %v2821_v46, %v2811_v49  ;;  %v3189_v41 = vadd.f32 %v2820_v50, %v2810_v10  ;;  %vm3020_vm1 = vcmp.lt.s32.totalorder %v5856_v54, 112  ;;  %v8561_v37 = vld [vmem:[#allocation38_spill] sm:$0xff] }
 0x9d1   : > { %v7190_v44 = vpop.permute.xlu0 %3040  ;;  %vm3085_vm8 = vcmp.lt.s32.totalorder %v5856_v54, 99  ;;  %v7377_v29 = vadd.f32 %v3182_v63, %v3180_v1  ;;  %v7379_v27 = vadd.f32 %v3183_v25, %v3181_v53  ;;  %v7381_v16 = vadd.f32 %v3186_v6, %v3184_v34  ;;  %v8562_v63 = vld [vmem:[#allocation55_spill] sm:$0xff]  ;;  %v8563_v25 = vld [vmem:[#allocation52_spill] sm:$0xff]  ;;  %v8567_v50 = vld [vmem:[#allocation54_spill] sm:$0xff] }
 0x9d2   : > { %v7383_v36 = vadd.f32 %v3187_v0, %v3185_v39  ;;  %vm3052_vm9 = vcmp.lt.s32.totalorder %v5856_v54, 102  ;;  %vm3074_vm14 = vcmp.lt.s32.totalorder %v5856_v54, 100  ;;  %v7389_v19 = vadd.f32 %v3190_v45, %v3188_v38  ;;  %v8566_v0 = vld [vmem:[#allocation57_spill] sm:$0xff]  ;;  %v8575_v34 = vld [vmem:[#allocation48_spill] sm:$0xff] }
 0x9d3   : > { %v7192_v31 = vpop.permute.xlu1 %3048  ;;  %v7391_v35 = vadd.f32 %v3191_v23, %v3189_v41  ;;  %v2925_v1 = vsel %vm1418_vm4, %v8561_v37, %v7142_v9  ;;  %v2926_v53 = vsel %vm1418_vm4, %v7142_v9, %v8561_v37  ;;  %v2849_v48 = vsel %vm2848_vm13, %v8563_v25, %v8562_v63  ;;  %v8574_v23 = vld [vmem:[#allocation51_spill] sm:$0xff] }
 0x9d4   : > { %v2850_v60 = vsel %vm2848_vm13, %v8562_v63, %v8563_v25  ;;  %v2862_v2 = vsel %vm2861_vm3, %v8565_v52, %v8564_v58  ;;  %v2863_v9 = vsel %vm2861_vm3, %v8564_v58, %v8565_v52  ;;  %vm3127_vm4 = vcmp.lt.s32.totalorder %v5856_v54, 88  ;;  %v8576_v25 = vld [vmem:[#allocation53_spill] sm:$0xff]  ;;  %v8577_v58 = vld [vmem:[#allocation50_spill] sm:$0xff] }
 0x9d5   : > { %v7194_v8 = vpop.permute.xlu0 %3050  ;;  %vm8568_vm10 = vcmp.lt.s32.totalorder %v5856_v54, 3  ;;  %vm8572_vm15 = vcmp.lt.s32.totalorder %v5856_v54, 2  ;;  %v2884_v39 = vsel %vm2883_vm11, %v8575_v34, %v8574_v23  ;;  %v2885_v10 = vsel %vm2883_vm11, %v8574_v23, %v8575_v34 }
 0x9d6   : > { %v2905_v46 = vsel %vm8568_vm10, %v8567_v50, %v8566_v0  ;;  %vm8569_vm13 = vmmov %vm8568_vm10  ;;  %v2915_v11 = vsel %vm8572_vm15, %v8571_v47, %v8570_v42  ;;  %vm3105_vm10 = vcmp.lt.s32.totalorder %v5856_v54, 97  ;;  %v7444_v37 = vadd.f32 %v2863_v9, %v2850_v60 }
 0x9d7   : > { %v7196_v56 = vpop.permute.xlu1 %3059  ;;  %v2906_v57 = vsel %vm8569_vm13, %v8566_v0, %v8567_v50  ;;  %vm8573_vm3 = vmmov %vm8572_vm15  ;;  %v3199_v38 = vadd.f32 %v2925_v1, %v2915_v11  ;;  %v7446_v63 = vadd.f32 %v2862_v2, %v2849_v48  ;;  %v2895_v52 = vsel %vm2894_vm7, %v8577_v58, %v8576_v25  ;;  %v8578_v1 = vld [vmem:[#allocation61_spill] sm:$0xff] }
 0x9d8   : > { %v2916_v45 = vsel %vm8573_vm3, %v8570_v42, %v8571_v47  ;;  %v2896_v0 = vsel %vm2894_vm7, %v8576_v25, %v8577_v58  ;;  %vm3116_vm11 = vcmp.lt.s32.totalorder %v5856_v54, 89  ;;  %v3197_v9 = vadd.f32 %v2905_v46, %v2895_v52 }
 0x9d9   : > { %v7198_v32 = vpop.permute.xlu0 %3061  ;;  %v3198_v49 = vadd.f32 %v2926_v53, %v2916_v45  ;;  %v8579_v53 = vld [vmem:[#allocation58_spill] sm:$0xff]  ;;  %v3196_v2 = vadd.f32 %v2906_v57, %v2896_v0  ;;  %v3042_v11 = vsel %vm1628_vm12, %v7188_v12, %v7190_v44  ;;  %v3043_v45 = vsel %vm1628_vm12, %v7190_v44, %v7188_v12 }
 0x9da   : > { %v2873_v60 = vsel %vm2872_vm2, %v8579_v53, %v8578_v1  ;;  %v2874_v48 = vsel %vm2872_vm2, %v8578_v1, %v8579_v53  ;;  %vm3092_vm7 = vcmp.lt.s32.totalorder %v5856_v54, 98  ;;  %v3235_v34 = vadd.f32 %v3199_v38, %v3197_v9 }
 0x9db   : > { %v7200_v62 = vpop.permute.xlu1 %3070  ;;  %v3194_v42 = vadd.f32 %v2885_v10, %v2874_v48  ;;  %v3195_v47 = vadd.f32 %v2884_v39, %v2873_v60  ;;  %v3234_v23 = vadd.f32 %v3198_v49, %v3196_v2  ;;  %v3008_v46 = vsel %vm3007_vm5, %v7172_v5, %v7174_v43 }
 0x9dc   : > { %v3009_v57 = vsel %vm3007_vm5, %v7174_v43, %v7172_v5  ;;  %v3032_v12 = vsel %vm3031_vm0, %v7184_v17, %v7186_v4  ;;  %v3033_v44 = vsel %vm3031_vm0, %v7186_v4, %v7184_v17  ;;  %v3021_v43 = vsel %vm3020_vm1, %v7180_v24, %v7182_v28 }
 0x9dd   : > { %v7202_v26 = vpop.permute.xlu0 %3072  ;;  %v3022_v17 = vsel %vm3020_vm1, %v7182_v28, %v7180_v24  ;;  %v3210_v4 = vadd.f32 %v3042_v11, %v3032_v12  ;;  %v3211_v49 = vadd.f32 %v3043_v45, %v3033_v44  ;;  %v3053_v38 = vsel %vm3052_vm9, %v7192_v31, %v7194_v8 }
 0x9de   : > { %v3076_v24 = vsel %vm3074_vm14, %v7202_v26, %v7200_v62  ;;  %vm8580_vm12 = vcmp.lt.s32.totalorder %v5856_v54, 101  ;;  %vm8582_vm5 = vcmp.lt.s32.totalorder %v5856_v54, 84  ;;  %vm8584_vm1 = vcmp.lt.s32.totalorder %v5856_v54, 86 }
 0x9df   : > { %v7204_v33 = vpop.permute.xlu1 %3081  ;;  %v3064_v28 = vsel %vm8580_vm12, %v7196_v56, %v7198_v32  ;;  %vm8581_vm2 = vmmov %vm8580_vm12  ;;  %vm8588_vm15 = vcmp.lt.s32.totalorder %v5856_v54, 87  ;;  %vm8590_vm13 = vcmp.lt.s32.totalorder %v5856_v54, 83  ;;  %vm8601_vm12 = vcmask 15360  }
 0x9e0   : > { %vm8583_vm0 = vmmov %vm8582_vm5 }
 0x9e1   : > { %v7206_v21 = vpop.permute.xlu0 %3083  ;;  %vm8591_vm3 = vmmov %vm8590_vm13 }
 0x9e2   : > { %v3086_v10 = vsel %vm3085_vm8, %v7204_v33, %v7206_v21  ;;  %v3087_v5 = vsel %vm3085_vm8, %v7206_v21, %v7204_v33  ;;  %v3054_v33 = vsel %vm3052_vm9, %v7194_v8, %v7192_v31  ;;  %v3075_v21 = vsel %vm3074_vm14, %v7200_v62, %v7202_v26  ;;  %vm8585_vm8 = vmmov %vm8584_vm1 }
 0x9e3   : > { %v7208_v13 = vpop.permute.xlu1 %3088  ;;  %v3065_v31 = vsel %vm8581_vm2, %v7198_v32, %v7196_v56  ;;  %v3214_v8 = vadd.f32 %v3086_v10, %v3075_v21  ;;  %v3215_v25 = vadd.f32 %v3087_v5, %v3076_v24  ;;  %vm8586_vm9 = vcmp.lt.s32.totalorder %v5856_v54, 85 }
 0x9e4   : > { %vm8587_vm14 = vmmov %vm8586_vm9  ;;  %v3213_v12 = vadd.f32 %v3065_v31, %v3054_v33  ;;  %v3233_v21 = vadd.f32 %v3195_v47, %v7446_v63  ;;  %v3209_v33 = vadd.f32 %v3022_v17, %v3009_v57  ;;  %v3248_v63 = vadd.f32 %v7377_v29, %v7276_v55 }
 0x9e5   : > { %v7214_v40 = vpop.permute.xlu0 %3090  ;;  %v3249_v47 = vadd.f32 %v7379_v27, %v7373_v3  ;;  %vm8602_vm2 = vcmask 1041408  }
 0x9e7   : > { %v7233_v59 = vpop.permute.xlu1 %3101 }
 0x9e9   : > { %v7251_v51 = vpop.permute.xlu0 %3103 }
 0x9eb   : > { %v7274_v7 = vpop.permute.xlu1 %3112 }
 0x9ed   : > { %v7304_v18 = vpop.permute.xlu0 %3114 }
 0x9ef   : > { %v7324_v61 = vpop.permute.xlu1 %3123 }
 0x9f1   : > { %v7351_v20 = vpop.permute.xlu0 %3125 }
 0x9f2   : > { %v3128_v0 = vsel %vm3127_vm4, %v7324_v61, %v7351_v20  ;;  %v3129_v62 = vsel %vm3127_vm4, %v7351_v20, %v7324_v61  ;;  %v3106_v61 = vsel %vm3105_vm10, %v7233_v59, %v7251_v51  ;;  %v3107_v20 = vsel %vm3105_vm10, %v7251_v51, %v7233_v59  ;;  %vm8589_vm4 = vmmov %vm8588_vm15 }
 0x9f3   : > { %v7371_v30 = vpop.permute.xlu1 %3134  ;;  %vm8597_vm10 = vcmask 130048  }
 0x9f5   : > { %v7387_v22 = vpop.permute.xlu0 %3136 }
 0x9f6   : > { %v3138_v9 = vsel %vm8588_vm15, %v7371_v30, %v7387_v22  ;;  %v3139_v59 = vsel %vm8589_vm4, %v7387_v22, %v7371_v30  ;;  %v3232_v22 = vadd.f32 %v3194_v42, %v7444_v37 }
 0x9f7   : > { %v3145_v6 = vpop.permute.xlu1 %3144 }
 0x9f9   : > { %v3147_v41 = vpop.permute.xlu0 %3146 }
 0x9fa   : > { %v3148_v32 = vsel %vm8584_vm1, %v3145_v6, %v3147_v41  ;;  %v3149_v1 = vsel %vm8585_vm8, %v3147_v41, %v3145_v6  ;;  %v3117_v6 = vsel %vm3116_vm11, %v7274_v7, %v7304_v18  ;;  %v3118_v41 = vsel %vm3116_vm11, %v7304_v18, %v7274_v7  ;;  %vm8599_vm11 = vmmov %vm8597_vm10 }
 0x9fb   : > { %v3155_v50 = vpop.permute.xlu1 %3154  ;;  %v3218_v51 = vadd.f32 %v3128_v0, %v3117_v6  ;;  %v3220_v11 = vadd.f32 %v3148_v32, %v3138_v9  ;;  %v3221_v45 = vadd.f32 %v3149_v1, %v3139_v59  ;;  %v3093_v7 = vsel %vm3092_vm7, %v7208_v13, %v7214_v40  ;;  %v8593_v59 = vld [vmem:[#allocation37_spill] sm:$0xff] }
 0x9fc   : > { %v3094_v18 = vsel %vm3092_vm7, %v7214_v40, %v7208_v13  ;;  %v3216_v44 = vadd.f32 %v3106_v61, %v3093_v7  ;;  %v3251_v13 = vadd.f32 %v7391_v35, %v7383_v36  ;;  %v3252_v40 = vadd.f32 %v3234_v23, %v3232_v22  ;;  %v8596_v7 = vld [vmem:[#allocation60_spill] sm:$0xff]  ;;  %vm8600_vm7 = vmmov %vm8597_vm10 }
 0x9fd   : > { %v3157_v39 = vpop.permute.xlu0 %3156  ;;  %v3217_v10 = vadd.f32 %v3107_v20, %v3094_v18  ;;  %v3253_v0 = vadd.f32 %v3235_v34, %v3233_v21  ;;  %vm8607_vm1 = vmmov %vm8600_vm7 }
 0x9fe   : > { %v3158_v53 = vsel %vm8586_vm9, %v3155_v50, %v3157_v39  ;;  %v3159_v60 = vsel %vm8587_vm14, %v3157_v39, %v3155_v50  ;;  %v3219_v50 = vadd.f32 %v3129_v62, %v3118_v41  ;;  %v3212_v39 = vadd.f32 %v3064_v28, %v3053_v38  ;;  %vm8608_vm8 = vmmov %vm8607_vm1 }
 0x9ff   : > { %v3165_v58 = vpop.permute.xlu1 %3164  ;;  %v3208_v38 = vadd.f32 %v3021_v43, %v3008_v46  ;;  %v3243_v28 = vadd.f32 %v3215_v25, %v3213_v12  ;;  %v3244_v31 = vadd.f32 %v3218_v51, %v3216_v44  ;;  %v3261_v23 = vadd.f32 %v3251_v13, %v3249_v47  ;;  %v4342_v44 = vld [vmem:[%s7911_s8 + $0x10] sm:$0xff]  ;;  %vm8609_vm9 = vmmov %vm8607_vm1 }
 0xa00   : > { %v3242_v24 = vadd.f32 %v3214_v8, %v3212_v39  ;;  %v8592_v8 = vld [vmem:[#allocation125_spill] sm:$0xff]  ;;  %v8595_v39 = vld [vmem:[#allocation63_spill] sm:$0xff]  ;;  %vm8610_vm14 = vmmov %vm8607_vm1 }
 0xa01   : > { %v3167_v52 = vpop.permute.xlu0 %3166  ;;  %v3240_v62 = vadd.f32 %v3210_v4, %v3208_v38  ;;  %v4346_v38 = vld [vmem:[%s7906_s3 + $0x4] sm:$0x3]  ;;  %vm8611_vm15 = vmmov %vm8607_vm1 }
 0xa02   : > { %v3168_v26 = vsel %vm8582_vm5, %v3165_v58, %v3167_v52  ;;  %v3169_v56 = vsel %vm8583_vm0, %v3167_v52, %v3165_v58  ;;  %v3245_v58 = vadd.f32 %v3219_v50, %v3217_v10  ;;  %v3250_v52 = vadd.f32 %v7389_v19, %v7381_v16  ;;  %v8594_v50 = vld [vmem:[#allocation39_spill] sm:$0xff]  ;;  %vm8603_vm5 = vmmov %vm8602_vm2 }
 0xa03   : > { %v3222_v48 = vadd.f32 %v3168_v26, %v3158_v53  ;;  %v3223_v2 = vadd.f32 %v3169_v56, %v3159_v60  ;;  %v3241_v26 = vadd.f32 %v3211_v49, %v3209_v33  ;;  %v3256_v46 = vadd.f32 %v3242_v24, %v3240_v62  ;;  %v4349_v33 = vld [vmem:[%s7908_s5 + $0x20] sm:$0xff]  ;;  %vm8604_vm0 = vmmov %vm8601_vm12 }
 0xa04   : > { %v3262_v16 = vadd.f32 %v7176_v15, %v3252_v40  ;;  %v3263_v19 = vadd.f32 %v7178_v14, %v3253_v0  ;;  %v3260_v35 = vadd.f32 %v3250_v52, %v3248_v63  ;;  %v4347_v52 = vld [vmem:[%s7907_s4 + $0x4] sm:$0x3]  ;;  %vm8612_vm4 = vmmov %vm8607_vm1 }
 0xa05   : > { %v3246_v5 = vadd.f32 %v3222_v48, %v3220_v11  ;;  %v3247_v30 = vadd.f32 %v3223_v2, %v3221_v45  ;;  %v3257_v57 = vadd.f32 %v3243_v28, %v3241_v26  ;;  %v3171_v36 = vpop.permute.xlu0 %3170  ;;  %v4350_v26 = vld [vmem:[%s7908_s5 + $0x28] sm:$0xff] }
 0xa06   : > { %v3266_v29 = vadd.f32 %v3262_v16, %v3260_v35  ;;  %v3267_v3 = vadd.f32 %v3263_v19, %v3261_v23 }
 0xa07   : > { %v3258_v37 = vadd.f32 %v3246_v5, %v3244_v31  ;;  %v3259_v42 = vadd.f32 %v3247_v30, %v3245_v58  ;;  %v8598_v5 = vmov 0.0   ;;  %v4343_v30 = vld [vmem:[%s7911_s8 + $0x18] sm:$0xff] }
 0xa09   : > { %v3264_v34 = vadd.f32 %v3258_v37, %v3256_v46  ;;  %v3265_v43 = vadd.f32 %v3259_v42, %v3257_v57  ;;  %v4351_v42 = vld [vmem:[%s7909_s6 + $0x20] sm:$0xff] }
 0xa0c   : > { %v3276_v56 = vpop.permute.xlu1 %3275 }
 0xa0d   : > { %v3281_v15 = vrot.slane %v3276_v56, %v8592_v8  ;;  %v4352_v56 = vld [vmem:[%s7909_s6 + $0x28] sm:$0xff] }
 0xa10   : > { %v3173_v17 = vpop.permute.xlu1 %3172 }
 0xa11   : > { %v3174_v4 = vsel %vm8590_vm13, %v3171_v36, %v3173_v17  ;;  %v3175_v55 = vsel %vm8591_vm3, %v3173_v17, %v3171_v36  ;;  %vm8613_vm13 = vmmov %vm8607_vm1 }
 0xa12   : > { %v3268_v27 = vadd.f32 %v3264_v34, %v3174_v4  ;;  %v3269_v49 = vadd.f32 %v3265_v43, %v3175_v55  ;;  %v8605_v4 = vld [vmem:[#allocation42_spill] sm:$0xff]  ;;  %vm8639_vm3 = vmmov %vm8607_vm1 }
 0xa14   : > { %v3270_v25 = vadd.f32 %v3268_v27, %v3266_v29  ;;  %v3271_v14 = vadd.f32 %v3269_v49, %v3267_v3  ;;  %v8606_v3 = vld [vmem:[#allocation44_spill] sm:$0xff]  ;;  %v4358_v49 = vld [vmem:[%s7910_s7 + $0x70] sm:$0xff] }
 0xa16   : > { %v3282_v32 = vadd.f32 %v3281_v15, %v3270_v25  ;;  %v3283_v1 = vadd.f32 %v3281_v15, %v3271_v14  ;;  %v4359_v15 = vld [vmem:[%s7910_s7 + $0x78] sm:$0xff]  ;;  %v4360_v25 = vld [vmem:[%s7910_s7 + $0x80] sm:$0xff]  ;;  %v4361_v14 = vld [vmem:[%s7910_s7 + $0x88] sm:$0xff] }
 0xa18   : > { %v4340_v53 = vmul.f32 -1.442695, %v3282_v32  ;;  %v4341_v60 = vmul.f32 -1.442695, %v3283_v1  ;;  %v4362_v32 = vld [vmem:[%s7910_s7 + $0x90] sm:$0xff]  ;;  %v4363_v1 = vld [vmem:[%s7910_s7 + $0x98] sm:$0xff] }
 0xa1a   : > { %4677 = vpow2.f32 %v4340_v53  ;;  %v4364_v53 = vld [vmem:[%s7910_s7 + $0xa0] sm:$0x1] }
 0xa1b   : > { %4679 = vpow2.f32 %v4341_v60  ;;  %v4898_v60 = vmov 2  }
 0xa27   : > { %v4678_v61 = vpop.eup %4677 }
 0xa28   : > { %v4680_v20 = vpop.eup %4679  ;;  %v3290_v48 = vadd.f32 1.0, %v4678_v61 }
 0xa29   : > { %v3291_v2 = vadd.f32 1.0, %v4680_v20 }
 0xa2a   : > { %4681 = vrcp.f32 %v3290_v48 }
 0xa2b   : > { %4683 = vrcp.f32 %v3291_v2 }
 0xa37   : > { %v4682_v54 = vpop.eup %4681 }
 0xa38   : > { %v4684_v6 = vpop.eup %4683  ;;  %v3299_v41 = vrot.slane %v4682_v54, %v8592_v8 }
 0xa39   : > { %v3303_v9 = vrot.slane %v4684_v6, %v8592_v8 }
 0xa3a   : > { %v3306_v51 = vmul.f32 %v3299_v41, %v8593_v59  ;;  %v3304_v18 = vmul.f32 %v3299_v41, %v8596_v7 }
 0xa3b   : > { %v3307_v11 = vmul.f32 %v3303_v9, %v8594_v50  ;;  %v3403_v45 = vpop.xlane.xlu0 %3402  ;;  %v3305_v12 = vmul.f32 %v3303_v9, %v8595_v39 }
 0xa3c   : > { %v3405_v10 = vmul.f32 0.0625, %v3403_v45 }
 0xa3d   : > { %3345 = vmatprep.subr.mxu0 %v3307_v11 }
 0xa3e   : > { %3346 = vmatpush1.msra.mxu0 %v3306_v51 }
 0xa3f   : > { %3347 = vmatprep.subr.mxu0 %v3305_v12 }
 0xa40   : > { %3348 = vmatpush1.msra.mxu0 %v3304_v18 }
 0xa41   : > { %4344 = vmatmul.mubr.msk.f32.vlgmr.msra.gmra.mxu0 %vm8597_vm10, %v4342_v44  ;;  %4449 = vmatprep.subr.mxu0 %v8598_v5 }
 0xa42   : > { %3387 = vmatprep.mubr.f32.mxu0 %v8598_v5  ;;  %v3401_v22 = vpop.xlane.xlu1 %3400  ;;  %4450 = vmatpush3.msra.mxu0 %v3405_v10 }
 0xa43   : > { %v3404_v21 = vmul.f32 0.0625, %v3401_v22  ;;  %4451 = vmatprep.subr.mxu0 %v8598_v5 }
 0xa45   : > { %4345 = vmatmul.mubr.msk.f32.gmra.mxu0 %vm8599_vm11, %v4343_v30 }
 0xa46   : > { %4452 = vmatpush3.msra.mxu0 %v3404_v21  ;;  %4453 = vmatprep.mubr.msk.f32.mxu0 %vm8508_vm6, %v8598_v5 }
 0xa49   : > { %4454 = vmatmul.mubr.msk.f32.vlgmr.msra.gmra.mxu0 %vm8600_vm7, %v4346_v38 }
 0xa4a   : > { %4458 = vmatprep.mubr.msk.f32.mxu0 %vm8601_vm12, %v4349_v33 }
 0xb01   : > { %v3383_v24 = vpop.f32.mrf.mxu0 }
 0xb02   : > { %3394 = vst [vmem:[%s7627_s23] sm:$0xff] %v3383_v24 }
 0xb03   : > { %v3385_v28 = vpop.f32.mrf.mxu0 }
 0xb04   : > { %3395 = vst [vmem:[%s7627_s23 + $0x8] sm:$0xff] %v3385_v28 }
 0xb05   : > { %v3389_v31 = vpop.f32.mrf.mxu0 }
 0xb06   : > { %3396 = vst [vmem:[%s7627_s23 + $0x10] sm:$0xff] %v3389_v31 }
 0xb07   : > { %v3391_v58 = vpop.f32.mrf.mxu0 }
 0xb08   : > { %3397 = vst [vmem:[%s7627_s23 + $0x18] sm:$0xff] %v3391_v58 }
 0xb09   : > { %v3479_v13 = vpop.f32.mrf.mxu0 }
 0xb0a   : > { %v3480_v40 = vadd.f32 %v4347_v52, %v3479_v13 }
 0xb0b   : > { %v4455_v0 = vpop.f32.mrf.mxu0 }
 0xb0c   : > { %v3483_v62 = vmax.f32 %v3480_v40, 0.0 }
 0xb0e   : > { %4456 = vmatprep.subr.msk.mxu0 %vm8602_vm2, %v3483_v62 }
 0xb0f   : > { %4457 = vmatpush3.msk.msra.mxu0 %vm8603_vm5, %v3483_v62 }
 0xb10   : > { %4459 = vmatmul.mubr.msk.f32.vlgmr.msra.gmra.mxu0 %vm8604_vm0, %v4350_v26  ;;  %4461 = vmatprep.subr.mxu0 %v8598_v5 }
 0xb11   : > { %4465 = vmatprep.mubr.msk.f32.mxu0 %vm8508_vm6, %v8598_v5 }
 0xbd0   : > { %v4460_v37 = vpop.f32.mrf.mxu0 }
 0xbd1   : > { %v3571_v63 = vadd.f32 %v4460_v37, %v4352_v56 }
 0xbd2   : > { %v3565_v47 = vpop.f32.mrf.mxu0 }
 0xbd3   : > { %v4357_v46 = vmul.f32 -1.442695, %v3571_v63  ;;  %v3566_v57 = vadd.f32 %v4351_v42, %v3565_v47 }
 0xbd5   : > { %4685 = vpow2.f32 %v4357_v46  ;;  %v4356_v16 = vmul.f32 -1.442695, %v3566_v57 }
 0xbd7   : > { %4687 = vpow2.f32 %v4356_v16 }
 0xbe2   : > { %v4686_v19 = vpop.eup %4685 }
 0xbe3   : > { %v3581_v36 = vadd.f32 1.0, %v4686_v19 }
 0xbe4   : > { %v4688_v35 = vpop.eup %4687 }
 0xbe5   : > { %4689 = vrcp.f32 %v3581_v36  ;;  %v3580_v23 = vadd.f32 1.0, %v4688_v35 }
 0xbe7   : > { %4691 = vrcp.f32 %v3580_v23 }
 0xbf2   : > { %v4690_v34 = vpop.eup %4689 }
 0xbf3   : > { %3593 = vperm.xlu0 %4639, %v4690_v34  }
 0xbf4   : > { %v4692_v43 = vpop.eup %4691 }
 0xbf5   : > { %3588 = vperm.xlu1 %4642, %v4692_v43  }
 0xbf7   : > { %4644 = vset.pattern.permute.xlu0 %v4898_v60 }
 0xbf9   : > { %4643 = vset.pattern.permute.xlu1 %v4898_v60 }
 0xc6e   : > { %v3594_v17 = vpop.permute.xlu0 %3593 }
 0xc6f   : > { %v7652_v55 = vmul.f32 %v3594_v17, %v8605_v4 }
 0xc70   : > { %v3589_v29 = vpop.permute.xlu1 %3588 }
 0xc71   : > { %v7655_v27 = vmul.f32 %v3589_v29, %v8606_v3  ;;  %4462 = vmatpush3.msra.mxu0 %v7652_v55 }
 0xc72   : > { %4463 = vmatprep.subr.mxu0 %v8598_v5 }
 0xc73   : > { %4464 = vmatpush3.msra.mxu0 %v7655_v27 }
 0xc74   : > { %4466 = vmatmul.mubr.msk.f32.vlgmr.msra.gmra.mxu0 %vm8607_vm1, %v4358_v49 }
 0xc75   : > { %4468 = vmatprep.mubr.msk.f32.mxu0 %vm8508_vm6, %v8598_v5 }
 0xc78   : > { %4469 = vmatmul.mubr.msk.f32.gmra.mxu0 %vm8608_vm8, %v4359_v15 }
 0xc79   : > { %4471 = vmatprep.mubr.msk.f32.mxu0 %vm8508_vm6, %v8598_v5 }
 0xc7c   : > { %4472 = vmatmul.mubr.msk.f32.gmra.mxu0 %vm8609_vm9, %v4360_v25 }
 0xc7d   : > { %4474 = vmatprep.mubr.msk.f32.mxu0 %vm8508_vm6, %v8598_v5 }
 0xc80   : > { %4475 = vmatmul.mubr.msk.f32.gmra.mxu0 %vm8610_vm14, %v4361_v14  ;;  %v3961_v14 = vld [vmem:[%s7912_s9] sm:$0x1] }
 0xc81   : > { %4477 = vmatprep.mubr.msk.f32.mxu0 %vm8508_vm6, %v8598_v5 }
 0xc84   : > { %4478 = vmatmul.mubr.msk.f32.gmra.mxu0 %vm8611_vm15, %v4362_v32 }
 0xc85   : > { %4480 = vmatprep.mubr.msk.f32.mxu0 %vm8508_vm6, %v8598_v5 }
 0xc88   : > { %4481 = vmatmul.mubr.msk.f32.gmra.mxu0 %vm8612_vm4, %v4363_v1 }
 0xc89   : > { %4483 = vmatprep.mubr.msk.f32.mxu0 %vm8508_vm6, %v8598_v5  ;;  %vm8636_vm6 = vmmov %vm8607_vm1 }
 0xc8c   : > { %4484 = vmatmul.mubr.msk.f32.gmra.mxu0 %vm8613_vm13, %v4364_v53 }
 0xd34   : > { %v3693_v61 = vpop.f32.mrf.mxu0 }
 0xd35   : > { %3727 = vrot.lane.b32.xlu0 %v3693_v61, %s4899_s0  ;;  %v3730_v20 = vrot.slane %v3693_v61, 1  ;;  %v3734_v2 = vrot.slane %v3693_v61, 2  ;;  %v3738_v6 = vrot.slane %v3693_v61, 3  ;;  %v3742_v9 = vrot.slane %v3693_v61, 4  ;;  %s8622_s0 = smov 12  }
 0xd36   : > { %v4467_v48 = vpop.f32.mrf.mxu0  ;;  %v3746_v51 = vrot.slane %v3693_v61, 5  ;;  %v3750_v11 = vrot.slane %v3693_v61, 6  ;;  %v3754_v39 = vrot.slane %v3693_v61, 7 }
 0xd37   : > { %3732 = vrot.lane.b32.xlu1 %v3730_v20, %s4900_s10 }
 0xd38   : > { %v3698_v54 = vpop.f32.mrf.mxu0 }
 0xd39   : > { %3736 = vrot.lane.b32.xlu0 %v3734_v2, %s4869_s21  ;;  %v3761_v7 = vrot.slane %v3698_v54, 1  ;;  %s8616_s21 = smov 22   ;;  %v3765_v10 = vrot.slane %v3698_v54, 2  ;;  %v3769_v30 = vrot.slane %v3698_v54, 3  ;;  %v3773_v21 = vrot.slane %v3698_v54, 4 }
 0xd3a   : > { %v4470_v41 = vpop.f32.mrf.mxu0  ;;  %v3777_v33 = vrot.slane %v3698_v54, 5  ;;  %v3781_v28 = vrot.slane %v3698_v54, 6  ;;  %v3785_v31 = vrot.slane %v3698_v54, 7 }
 0xd3b   : > { %3740 = vrot.lane.b32.xlu1 %v3738_v6, %s4870_s18  ;;  %s8617_s18 = smov 21  }
 0xd3c   : > { %v3703_v59 = vpop.f32.mrf.mxu0 }
 0xd3d   : > { %3744 = vrot.lane.b32.xlu0 %v3742_v9, %s4871_s1  ;;  %s8618_s1 = smov 20   ;;  %v3792_v58 = vrot.slane %v3703_v59, 1  ;;  %v3796_v52 = vrot.slane %v3703_v59, 2  ;;  %v3800_v13 = vrot.slane %v3703_v59, 3  ;;  %v3804_v40 = vrot.slane %v3703_v59, 4 }
 0xd3e   : > { %v4473_v50 = vpop.f32.mrf.mxu0  ;;  %v3808_v0 = vrot.slane %v3703_v59, 5  ;;  %v3812_v62 = vrot.slane %v3703_v59, 6  ;;  %v3816_v26 = vrot.slane %v3703_v59, 7 }
 0xd3f   : > { %3748 = vrot.lane.b32.xlu1 %v3746_v51, %s8614_s25  ;;  %s8623_s25 = smov 11  }
 0xd40   : > { %v7705_v45 = vpop.f32.mrf.mxu0 }
 0xd41   : > { %3752 = vrot.lane.b32.xlu0 %v3750_v11, %s8615_s27  ;;  %s4902_s27 = smov 10   ;;  %v3821_v56 = vrot.slane %v7705_v45, 1  ;;  %v3825_v37 = vrot.slane %v7705_v45, 2  ;;  %v3829_v42 = vrot.slane %v7705_v45, 3  ;;  %v3833_v63 = vrot.slane %v7705_v45, 4 }
 0xd42   : > { %v4476_v12 = vpop.f32.mrf.mxu0  ;;  %v3837_v47 = vrot.slane %v7705_v45, 5  ;;  %v3841_v46 = vrot.slane %v7705_v45, 6  ;;  %v3845_v57 = vrot.slane %v7705_v45, 7 }
 0xd43   : > { %3756 = vrot.lane.b32.xlu1 %v3754_v39, %s8219_s28  ;;  %s4901_s28 = smov 18  }
 0xd44   : > { %v7709_v18 = vpop.f32.mrf.mxu0 }
 0xd45   : > { %3758 = vrot.lane.b32.xlu0 %v3698_v54, %s8616_s21  ;;  %s4903_s21 = smov 9   ;;  %v3852_v16 = vrot.slane %v7709_v18, 1  ;;  %v3856_v19 = vrot.slane %v7709_v18, 2  ;;  %v3860_v36 = vrot.slane %v7709_v18, 3  ;;  %v3864_v35 = vrot.slane %v7709_v18, 4 }
 0xd46   : > { %v4479_v44 = vpop.f32.mrf.mxu0  ;;  %v3868_v23 = vrot.slane %v7709_v18, 5  ;;  %v3872_v34 = vrot.slane %v7709_v18, 6  ;;  %v3876_v43 = vrot.slane %v7709_v18, 7 }
 0xd47   : > { %3763 = vrot.lane.b32.xlu1 %v3761_v7, %s8617_s18  ;;  %s4904_s18 = smov 8   ;;  %v4373_v7 = vld [vmem:[%s7911_s8 + $0x20] sm:$0xff] }
 0xd48   : > { %v7713_v5 = vpop.f32.mrf.mxu0  ;;  %4490 = vmatprep.mubr.msk.f32.mxu1 %vm8636_vm6, %v4373_v7 }
 0xd49   : > { %3767 = vrot.lane.b32.xlu0 %v3765_v10, %s8618_s1  ;;  %s4905_s1 = smov 7   ;;  %v3883_v17 = vrot.slane %v7713_v5, 1  ;;  %v3887_v4 = vrot.slane %v7713_v5, 2  ;;  %v3891_v29 = vrot.slane %v7713_v5, 3  ;;  %v3895_v3 = vrot.slane %v7713_v5, 4 }
 0xd4a   : > { %v4482_v22 = vpop.f32.mrf.mxu0  ;;  %v3899_v49 = vrot.slane %v7713_v5, 5  ;;  %v3903_v15 = vrot.slane %v7713_v5, 6  ;;  %v3907_v25 = vrot.slane %v7713_v5, 7 }
 0xd4b   : > { %3771 = vrot.lane.b32.xlu1 %v3769_v30, %s8619_s24  ;;  %s8626_s24 = smov 115  }
 0xd4c   : > { %v7717_v38 = vpop.f32.mrf.mxu0 }
 0xd4d   : > { %3775 = vrot.lane.b32.xlu0 %v3773_v21, %s4901_s28  ;;  %s4910_s28 = smov 110  }
 0xd4e   : > { %v4485_v24 = vpop.f32.mrf.mxu0 }
 0xd4f   : > { %3779 = vrot.lane.b32.xlu1 %v3777_v33, %s8620_s15  ;;  %s8627_s15 = smov 109  }
 0xd51   : > { %3783 = vrot.lane.b32.xlu0 %v3781_v28, %s8621_s12  ;;  %s8628_s12 = smov 108  }
 0xd53   : > { %3787 = vrot.lane.b32.xlu1 %v3785_v31, %s8622_s0  ;;  %s8629_s0 = smov 107  }
 0xd55   : > { %3789 = vrot.lane.b32.xlu0 %v3703_v59, %s8623_s25  ;;  %s8630_s25 = smov 106  }
 0xd57   : > { %3794 = vrot.lane.b32.xlu1 %v3792_v58, %s4902_s27  ;;  %s8632_s27 = smov 101  }
 0xd59   : > { %3798 = vrot.lane.b32.xlu0 %v3796_v52, %s4903_s21  ;;  %s8633_s21 = smov 100  }
 0xd5b   : > { %3802 = vrot.lane.b32.xlu1 %v3800_v13, %s4904_s18 }
 0xd5d   : > { %3806 = vrot.lane.b32.xlu0 %v3804_v40, %s4905_s1  ;;  %s8634_s1 = smov 99  }
 0xd5f   : > { %3810 = vrot.lane.b32.xlu1 %v3808_v0, %s8529_s19  ;;  %s4906_s19 = smov 121  }
 0xd61   : > { %3814 = vrot.lane.b32.xlu0 %v3812_v62, %s8226_s26  ;;  %s4907_s26 = smov 120  }
 0xd63   : > { %3818 = vrot.lane.b32.xlu1 %v3816_v26, %s8530_s29  ;;  %s4908_s29 = smov 119  }
 0xd65   : > { %3823 = vrot.lane.b32.xlu0 %v3821_v56, %s8227_s16  ;;  %s4909_s16 = smov 118  }
 0xd67   : > { %3827 = vrot.lane.b32.xlu1 %v3825_v37, %s8229_s30  ;;  %s8624_s30 = smov 117  }
 0xd69   : > { %3831 = vrot.lane.b32.xlu0 %v3829_v42, %s8228_s20  ;;  %s8625_s20 = smov 116  }
 0xd6b   : > { %3835 = vrot.lane.b32.xlu1 %v3833_v63, %s4906_s19  ;;  %s8635_s19 = smov 98  }
 0xd6d   : > { %3839 = vrot.lane.b32.xlu0 %v3837_v47, %s4907_s26 }
 0xd6f   : > { %3843 = vrot.lane.b32.xlu1 %v3841_v46, %s4908_s29 }
 0xd71   : > { %3847 = vrot.lane.b32.xlu0 %v3845_v57, %s4909_s16  ;;  %s4911_s16 = smov 96  }
 0xd73   : > { %3849 = vrot.lane.b32.xlu1 %v7709_v18, %s8624_s30  ;;  %s4912_s30 = smov 95  }
 0xd75   : > { %3854 = vrot.lane.b32.xlu0 %v3852_v16, %s8625_s20 }
 0xd77   : > { %3858 = vrot.lane.b32.xlu1 %v3856_v19, %s8626_s24  ;;  %s8637_s24 = sld [smem:[#allocation12_spill]] }
 0xd79   : > { %3862 = vrot.lane.b32.xlu0 %v3860_v36, %s4889_s14  ;;  %s8631_s14 = smov 105  }
 0xd7b   : > { %3866 = vrot.lane.b32.xlu1 %v3864_v35, %s4910_s28 }
 0xd7d   : > { %3870 = vrot.lane.b32.xlu0 %v3868_v23, %s8627_s15  ;;  %s4391_s29 = sshll.u32 %s8637_s24, 10 }
 0xd7f   : > { %3874 = vrot.lane.b32.xlu1 %v3872_v34, %s8628_s12 }
 0xd81   : > { %3878 = vrot.lane.b32.xlu0 %v3876_v43, %s8629_s0  ;;  %s4094_s0 = sshll.u32 %s6876_s11, 4  ;;  %s4913_s11 = smov [#allocation4]   ;;  %s7786_s0 = int_to_ptr.vmem [resolvable:$true] %s4094_s0 }
 0xd83   : > { %3880 = vrot.lane.b32.xlu1 %v7713_v5, %s8630_s25  ;;  %s4110_s25 = sshll.u32 %s7627_s23, 4  ;;  %s4705_s23 = sshll.u32 %s4913_s11, 4  ;;  %s7788_s25 = int_to_ptr.vmem [resolvable:$true] %s4110_s25  ;;  %s4706_s23 = int_to_ptr.vmem [resolvable:$false] %s4705_s23 }
 0xd84   : > { %p4708_p0 = scmp.lt.s32.totalorder %s7788_s25, %s4706_s23 }
 0xd85   : > { %3885 = vrot.lane.b32.xlu0 %v3883_v17, %s8631_s14  ;;  %s4075_s14 = sand.u32 1, %s8637_s24  }
 0xd87   : > { %3889 = vrot.lane.b32.xlu1 %v3887_v4, %s8632_s27  ;;  %s4392_s27 = sshll.u32 %s8637_s24, 9 }
 0xd89   : > { %3893 = vrot.lane.b32.xlu0 %v3891_v29, %s8633_s21 }
 0xd8b   : > { %3897 = vrot.lane.b32.xlu1 %v3895_v3, %s8634_s1 }
 0xd8d   : > { %3901 = vrot.lane.b32.xlu0 %v3899_v49, %s8635_s19  ;;  %s8640_s19 = sld [smem:[#allocation137_spill]] }
 0xd8f   : > { %3905 = vrot.lane.b32.xlu1 %v3903_v15, %s4895_s13  ;;  %s4707_s13 = scalar_lea.vmem %s4706_s23, 1024 }
 0xd91   : > { %3909 = vrot.lane.b32.xlu0 %v3907_v25, %s4911_s16  ;;  %s7798_s16 = scalar_lea.sflag [#allocation5], %s4075_s14 }
 0xd93   : > { %3964 = vperm.xlu1 %4643, %v3961_v14   ;;  %s7795_s26 = scalar_lea.hbm %s8640_s19, %s4392_s27 }
 0xd95   : > { %3911 = vrot.lane.b32.xlu0 %v7717_v38, %s4912_s30  ;;  %s4701_s30 = scalar_lea.vmem %s7788_s25, 512 }
 0xd96   : > { %p4702_p11 = scmp.ne.s32.totalorder %s7788_s25, %s4701_s30  ;;  %p4709_p1 = scmp.lt.s32.totalorder %s4707_s13, %s4701_s30 }
 0xd98   : > { %p4703_p12 = pnand %p4702_p11, %p5024_p5  ;;  %p4710_p2 = por %p4709_p1, %p4708_p0 }
 0xd9a   : > { %p4704_p13 = pneg %p4703_p12 }
 0xd9c   : > { %p4711_p3 = pnand %p4710_p2, %p4704_p13 }
 0xda7   : > { %v3728_v32 = vpop.permute.xlu0 %3727 }
 0xda9   : > { %v3733_v1 = vpop.permute.xlu1 %3732 }
 0xdaa   : > { %v3913_v53 = vadd.f32 %v3733_v1, %v3728_v32 }
 0xdab   : > { %v3737_v60 = vpop.permute.xlu0 %3736 }
 0xdad   : > { %v3741_v61 = vpop.permute.xlu1 %3740 }
 0xdae   : > { %v3914_v20 = vadd.f32 %v3741_v61, %v3737_v60 }
 0xdaf   : > { %v3745_v48 = vpop.permute.xlu0 %3744 }
 0xdb0   : > { %v3937_v2 = vadd.f32 %v3914_v20, %v3913_v53 }
 0xdb1   : > { %v3749_v54 = vpop.permute.xlu1 %3748 }
 0xdb2   : > { %v3915_v6 = vadd.f32 %v3749_v54, %v3745_v48 }
 0xdb3   : > { %v3753_v41 = vpop.permute.xlu0 %3752 }
 0xdb5   : > { %v3757_v9 = vpop.permute.xlu1 %3756 }
 0xdb6   : > { %v3916_v59 = vadd.f32 %v3757_v9, %v3753_v41 }
 0xdb7   : > { %v3759_v51 = vpop.permute.xlu0 %3758 }
 0xdb8   : > { %v3938_v50 = vadd.f32 %v3916_v59, %v3915_v6 }
 0xdb9   : > { %v3764_v11 = vpop.permute.xlu1 %3763 }
 0xdba   : > { %v3949_v39 = vadd.f32 %v3938_v50, %v3937_v2  ;;  %v3917_v12 = vadd.f32 %v3764_v11, %v3759_v51 }
 0xdbb   : > { %v3768_v18 = vpop.permute.xlu0 %3767 }
 0xdbd   : > { %v3772_v44 = vpop.permute.xlu1 %3771 }
 0xdbe   : > { %v3918_v10 = vadd.f32 %v3772_v44, %v3768_v18 }
 0xdbf   : > { %v3776_v5 = vpop.permute.xlu0 %3775 }
 0xdc0   : > { %v3939_v30 = vadd.f32 %v3918_v10, %v3917_v12 }
 0xdc1   : > { %v3780_v22 = vpop.permute.xlu1 %3779 }
 0xdc2   : > { %v3919_v21 = vadd.f32 %v3780_v22, %v3776_v5 }
 0xdc3   : > { %v3784_v38 = vpop.permute.xlu0 %3783 }
 0xdc5   : > { %v3788_v33 = vpop.permute.xlu1 %3787 }
 0xdc6   : > { %v3920_v24 = vadd.f32 %v3788_v33, %v3784_v38 }
 0xdc7   : > { %v3790_v28 = vpop.permute.xlu0 %3789 }
 0xdc8   : > { %v3940_v31 = vadd.f32 %v3920_v24, %v3919_v21 }
 0xdc9   : > { %v3795_v58 = vpop.permute.xlu1 %3794 }
 0xdca   : > { %v3950_v52 = vadd.f32 %v3940_v31, %v3939_v30  ;;  %v3921_v41 = vadd.f32 %v3795_v58, %v3790_v28 }
 0xdcb   : > { %v3799_v13 = vpop.permute.xlu0 %3798 }
 0xdcc   : > { %v3955_v40 = vadd.f32 %v3950_v52, %v3949_v39 }
 0xdcd   : > { %v3803_v0 = vpop.permute.xlu1 %3802 }
 0xdce   : > { %v3922_v61 = vadd.f32 %v3803_v0, %v3799_v13 }
 0xdcf   : > { %v3807_v62 = vpop.permute.xlu0 %3806 }
 0xdd0   : > { %v3941_v39 = vadd.f32 %v3922_v61, %v3921_v41 }
 0xdd1   : > { %v3811_v26 = vpop.permute.xlu1 %3810 }
 0xdd2   : > { %v3923_v54 = vadd.f32 %v3811_v26, %v3807_v62 }
 0xdd3   : > { %v3815_v56 = vpop.permute.xlu0 %3814 }
 0xdd5   : > { %v3819_v37 = vpop.permute.xlu1 %3818 }
 0xdd6   : > { %v3924_v60 = vadd.f32 %v3819_v37, %v3815_v56 }
 0xdd7   : > { %v3824_v42 = vpop.permute.xlu0 %3823 }
 0xdd8   : > { %v3925_v20 = vadd.f32 %v3824_v42, %v7705_v45  ;;  %v3942_v59 = vadd.f32 %v3924_v60, %v3923_v54 }
 0xdd9   : > { %v3828_v63 = vpop.permute.xlu1 %3827 }
 0xdda   : > { %v3951_v45 = vadd.f32 %v3942_v59, %v3941_v39 }
 0xddb   : > { %v3832_v47 = vpop.permute.xlu0 %3831 }
 0xddc   : > { %v3926_v32 = vadd.f32 %v3832_v47, %v3828_v63 }
 0xddd   : > { %v3836_v46 = vpop.permute.xlu1 %3835 }
 0xdde   : > { %v3943_v9 = vadd.f32 %v3926_v32, %v3925_v20 }
 0xddf   : > { %v3840_v57 = vpop.permute.xlu0 %3839 }
 0xde0   : > { %v3927_v1 = vadd.f32 %v3840_v57, %v3836_v46 }
 0xde1   : > { %v3844_v16 = vpop.permute.xlu1 %3843 }
 0xde3   : > { %v3848_v19 = vpop.permute.xlu0 %3847 }
 0xde4   : > { %v3928_v25 = vadd.f32 %v3848_v19, %v3844_v16  ;;  %v4374_v19 = vld [vmem:[%s7911_s8 + $0x28] sm:$0xff] }
 0xde5   : > { %v3850_v36 = vpop.permute.xlu1 %3849 }
 0xde6   : > { %v3944_v48 = vadd.f32 %v3928_v25, %v3927_v1 }
 0xde7   : > { %v3855_v35 = vpop.permute.xlu0 %3854 }
 0xde8   : > { %v3952_v12 = vadd.f32 %v3944_v48, %v3943_v9  ;;  %v3929_v7 = vadd.f32 %v3855_v35, %v3850_v36 }
 0xde9   : > { %v3859_v23 = vpop.permute.xlu1 %3858 }
 0xdea   : > { %v3956_v31 = vadd.f32 %v3952_v12, %v3951_v45 }
 0xdeb   : > { %v3863_v34 = vpop.permute.xlu0 %3862 }
 0xdec   : > { %v3930_v51 = vadd.f32 %v3863_v34, %v3859_v23  ;;  %v3958_v13 = vadd.f32 %v3956_v31, %v3955_v40 }
 0xded   : > { %v3867_v43 = vpop.permute.xlu1 %3866 }
 0xdee   : > { %v3945_v21 = vadd.f32 %v3930_v51, %v3929_v7 }
 0xdef   : > { %v3871_v17 = vpop.permute.xlu0 %3870 }
 0xdf0   : > { %v3931_v50 = vadd.f32 %v3871_v17, %v3867_v43 }
 0xdf1   : > { %v3875_v4 = vpop.permute.xlu1 %3874 }
 0xdf3   : > { %v3879_v29 = vpop.permute.xlu0 %3878 }
 0xdf4   : > { %v3932_v6 = vadd.f32 %v3879_v29, %v3875_v4 }
 0xdf5   : > { %v3881_v3 = vpop.permute.xlu1 %3880 }
 0xdf6   : > { %v3946_v10 = vadd.f32 %v3932_v6, %v3931_v50 }
 0xdf7   : > { %v3886_v49 = vpop.permute.xlu0 %3885 }
 0xdf8   : > { %v3933_v5 = vadd.f32 %v3886_v49, %v3881_v3  ;;  %v3953_v24 = vadd.f32 %v3946_v10, %v3945_v21 }
 0xdf9   : > { %v3890_v15 = vpop.permute.xlu1 %3889 }
 0xdfb   : > { %v3894_v14 = vpop.permute.xlu0 %3893 }
 0xdfc   : > { %v3934_v11 = vadd.f32 %v3894_v14, %v3890_v15 }
 0xdfd   : > { %v3898_v53 = vpop.permute.xlu1 %3897 }
 0xdfe   : > { %v3947_v38 = vadd.f32 %v3934_v11, %v3933_v5 }
 0xdff   : > { %v3902_v2 = vpop.permute.xlu0 %3901 }
 0xe00   : > { %v3935_v30 = vadd.f32 %v3902_v2, %v3898_v53 }
 0xe01   : > { %v3906_v18 = vpop.permute.xlu1 %3905 }
 0xe03   : > { %v3910_v44 = vpop.permute.xlu0 %3909 }
 0xe04   : > { %v3936_v22 = vadd.f32 %v3910_v44, %v3906_v18 }
 0xe06   : > { %v3948_v33 = vadd.f32 %v3936_v22, %v3935_v30 }
 0xe07   : > { %v3912_v58 = vpop.permute.xlu0 %3911 }
 0xe08   : > { %v3954_v28 = vadd.f32 %v3948_v33, %v3947_v38 }
 0xe0a   : > { %v3957_v52 = vadd.f32 %v3954_v28, %v3953_v24 }
 0xe0c   : > { %v3959_v0 = vadd.f32 %v3957_v52, %v3912_v58 }
 0xe0e   : > { %v3960_v62 = vadd.f32 %v3959_v0, %v3958_v13  ;;  %v3965_v26 = vpop.permute.xlu1 %3964 }
 0xe0f   : > { %v3970_v56 = vrot.slane %v3965_v26, %v8592_v8 }
 0xe11   : > { %v3971_v37 = vadd.f32 %v3970_v56, %v3960_v62 }
 0xe13   : > { %v4372_v42 = vmul.f32 -1.442695, %v3971_v37 }
 0xe15   : > { %4693 = vpow2.f32 %v4372_v42 }
 0xe22   : > { %v4694_v63 = vpop.eup %4693 }
 0xe23   : > { %v3975_v47 = vadd.f32 1.0, %v4694_v63 }
 0xe25   : > { %4695 = vrcp.f32 %v3975_v47 }
 0xe32   : > { %v4696_v46 = vpop.eup %4695 }
 0xe33   : > { %v3981_v57 = vrot.slane %v4696_v46, %v8592_v8 }
 0xe35   : > { %v3983_v40 = vmul.f32 %v3981_v57, %v7652_v55  ;;  %v3982_v16 = vmul.f32 %v3981_v57, %v7655_v27 }
 0xe37   : > { %4486 = vmatprep.subr.mxu1 %v3983_v40 }
 0xe38   : > { %4487 = vmatpush3.msra.mxu1 %v3983_v40 }
 0xe39   : > { %4488 = vmatprep.subr.mxu1 %v3982_v16 }
 0xe3a   : > { %4489 = vmatpush3.msra.mxu1 %v3982_v16 }
 0xe3b   : > { %4491 = vmatmul.mubr.msk.f32.vlgmr.msra.gmra.mxu1 %vm8639_vm3, %v4374_v19 }
 0xe3c   : > { %4714 = shalt.err (!%p4711_p3)
}
 0xe3d   : > { %s4715_s20 = scalar_lea.hbm %s7795_s26, 512  ;;  %s4719_s14 = scalar_lea.hbm %s8640_s19, 1024 }
 0xe3e   : > { %p4716_p4 = scmp.ne.s32.totalorder %s7795_s26, %s4715_s20  ;;  %p4720_p9 = scmp.lt.s32.totalorder %s7795_s26, %s8640_s19 }
 0xe3f   : > { %p4721_p10 = scmp.lt.s32.totalorder %s4719_s14, %s4715_s20 }
 0xe40   : > { %p4717_p7 = pnand %p4716_p4, %p5024_p5 }
 0xe41   : > { %p4722_p11 = por %p4721_p10, %p4720_p9 }
 0xe42   : > { %p4718_p8 = pneg %p4717_p7 }
 0xe44   : > { %p4723_p12 = pnand %p4722_p11, %p4718_p8 }
 0xe46   : > { %4726 = shalt.err (!%p4723_p12)
}
 0xe47   : > { %s4914_s1 = smov 256   ;;  %s8641_s30 = smov 16  }
 0xe48   : > { %4494 = dma.vmem_to_hbm [thread:$0]  (%p5024_p5), %s7788_s25, 512, %s7795_s26, %s7798_s16, %s4914_s1, %s4914_s1, %s8641_s30  }
 0xe49   : > { %s8642_s13 = sld [smem:[#allocation136_spill]]  ;;  %s4071_s28 = scalar_lea.sflag [#allocation3], %s6873_s17 }
 0xe4a   : > { %s4727_s15 = scalar_lea.vmem %s7786_s0, 1024  ;;  %s4915_s14 = smov [#allocation2]  }
 0xe4b   : > { %p4728_p13 = scmp.ne.s32.totalorder %s7786_s0, %s4727_s15  ;;  %s4731_s27 = sshll.u32 %s4915_s14, 4  ;;  %s4732_s27 = int_to_ptr.vmem [resolvable:$false] %s4731_s27 }
 0xe4c   : > { %s4733_s21 = scalar_lea.vmem %s4732_s27, 2048  ;;  %p4734_p2 = scmp.lt.s32.totalorder %s7786_s0, %s4732_s27 }
 0xe4d   : > { %p4729_p0 = pnand %p4728_p13, %p5024_p5  ;;  %p4735_p3 = scmp.lt.s32.totalorder %s4733_s21, %s4727_s15 }
 0xe4f   : > { %s7827_s20 = scalar_lea.hbm %s8642_s13, %s4391_s29  ;;  %p4730_p1 = pneg %p4729_p0 }
 0xe50   : > { %p4736_p4 = por %p4735_p3, %p4734_p2 }
 0xe52   : > { %p4737_p7 = pnand %p4736_p4, %p4730_p1 }
 0xe54   : > { %4740 = shalt.err (!%p4737_p7)
}
 0xe55   : > { %s4741_s25 = scalar_lea.hbm %s7827_s20, 1024  ;;  %s4745_s1 = scalar_lea.hbm %s8642_s13, 2048 }
 0xe56   : > { %p4742_p8 = scmp.ne.s32.totalorder %s7827_s20, %s4741_s25  ;;  %p4746_p11 = scmp.lt.s32.totalorder %s7827_s20, %s8642_s13 }
 0xe57   : > { %p4747_p12 = scmp.lt.s32.totalorder %s4745_s1, %s4741_s25 }
 0xe58   : > { %p4743_p9 = pnand %p4742_p8, %p5024_p5 }
 0xe59   : > { %p4748_p13 = por %p4747_p12, %p4746_p11 }
 0xe5a   : > { %p4744_p10 = pneg %p4743_p9 }
 0xe5c   : > { %p4749_p0 = pnand %p4748_p13, %p4744_p10 }
 0xe5e   : > { %4752 = shalt.err (!%p4749_p0)
}
 0xe5f   : > { %s4916_s23 = smov 512   ;;  %s4279_s15 = sshll.u32 %s6873_s17, 4 }
 0xe60   : > { %4493 = dma.vmem_to_hbm [thread:$0]  (%p5024_p5), %s7786_s0, 1024, %s7827_s20, %s4071_s28, %s4916_s23, %s4916_s23, %s4900_s10  }
 0xe61   : > { %s454_s14 = scalar_lea.vmem [#allocation6], %s4279_s15  ;;  %s4393_s21 = sshll.u32 %s8637_s24, 8 }
 0xe62   : > { %s4126_s27 = sshll.u32 %s454_s14, 4  ;;  %s8643_s29 = sld [smem:[#allocation138_spill]]  ;;  %s7855_s27 = int_to_ptr.vmem [resolvable:$true] %s4126_s27 }
 0xe63   : > { %s4753_s30 = scalar_lea.vmem %s7855_s27, 256  ;;  %s4917_s17 = smov [#allocation6]  }
 0xe64   : > { %p4754_p1 = scmp.ne.s32.totalorder %s7855_s27, %s4753_s30  ;;  %s4757_s10 = sshll.u32 %s4917_s17, 4  ;;  %s4758_s10 = int_to_ptr.vmem [resolvable:$false] %s4757_s10 }
 0xe65   : > { %s4759_s24 = scalar_lea.vmem %s4758_s10, 512  ;;  %p4760_p4 = scmp.lt.s32.totalorder %s7855_s27, %s4758_s10 }
 0xe66   : > { %p4755_p2 = pnand %p4754_p1, %p5024_p5  ;;  %p4761_p7 = scmp.lt.s32.totalorder %s4759_s24, %s4753_s30 }
 0xe68   : > { %s7860_s1 = scalar_lea.hbm %s8643_s29, %s4393_s21  ;;  %p4756_p3 = pneg %p4755_p2 }
 0xe69   : > { %p4762_p8 = por %p4761_p7, %p4760_p4 }
 0xe6b   : > { %p4763_p9 = pnand %p4762_p8, %p4756_p3 }
 0xefb   : > { %v4492_v8 = vpop.f32.mrf.mxu1 }
 0xefc   : > { %4069 = vst [vmem:[%s454_s14 + $0x8] sm:$0xff] %v4492_v8 }
 0xefd   : > { %v4059_v55 = vpop.f32.mrf.mxu1 }
 0xefe   : > { %4068 = vst [vmem:[%s454_s14] sm:$0xff] %v4059_v55 }
 0xeff   : > { %4766 = shalt.err (!%p4763_p9)
}
 0xf00   : > { %s4767_s0 = scalar_lea.hbm %s7860_s1, 256  ;;  %s4771_s11 = scalar_lea.hbm %s8643_s29, 512 }
 0xf01   : > { %p4768_p10 = scmp.ne.s32.totalorder %s7860_s1, %s4767_s0  ;;  %p4772_p13 = scmp.lt.s32.totalorder %s7860_s1, %s8643_s29 }
 0xf02   : > { %p4773_p0 = scmp.lt.s32.totalorder %s4771_s11, %s4767_s0 }
 0xf03   : > { %p4769_p11 = pnand %p4768_p10, %p5024_p5 }
 0xf04   : > { %p4774_p1 = por %p4773_p0, %p4772_p13 }
 0xf05   : > { %p4770_p12 = pneg %p4769_p11 }
 0xf07   : > { %p4775_p2 = pnand %p4774_p1, %p4770_p12 }
 0xf09   : > { %4778 = shalt.err (!%p4775_p2)
}
 0xf0a   : > { %s4918_s14 = smov 128  }
 0xf0b   : > { %4495 = dma.vmem_to_hbm [thread:$0]  (%p5024_p5), %s7855_s27, 256, %s7860_s1, %s7798_s16, %s4918_s14, %s4918_s14, %s4904_s18  }
 0xf0c PF: > { %s8644_s21 = sld [smem:[#allocation11_spill]] }
 0xf0d   : > { %s8645_s25 = sld [smem:[#allocation9_spill]] }
 0xf12   : > { %p4509_p3 = scmp.ge.s32.totalorder %s8644_s21, 2 }
 0xf13   : > { %s4141_s30 = sand.u32 1, %s8645_s25  }
 0xf14   : > { %p4500_p4 = pnand %p4509_p3, %p5028_p6  ;;  %s4142_s17 = scalar_lea.sflag [#allocation3], %s4141_s30 }
 0xf16   : > { %p4501_p7 = pneg %p4500_p4 }
 0xf18   : > { %4796 = dma.done.wait (%p4501_p7), %s4142_s17, 1024  }
 0xf19   : > { %4798 = vsyncadd (%p4501_p7), %s4142_s17, 4294966272  ;;  %s8647_s10 = sadd.s32 4294967294, %s8644_s21  }
 0xf1a   : > { %s4150_s12 = sand.u32 1, %s8647_s10  }
 0xf1b   : > { %s4151_s24 = scalar_lea.sflag [#allocation5], %s4150_s12 }
 0xf1c   : > { %4800 = dma.done.wait (%p4501_p7), %s4151_s24, 768  }
 0xf1d   : > { %4802 = vsyncadd (%p4501_p7), %s4151_s24, 4294966528  ;;  %s8648_s24 = sld [smem:[#allocation13_spill]]  ;;  %s8651_s21 = smov %s4809_s22 }
 0xf1e   : > { %s8649_s18 = sld [smem:[#allocation10_spill]] }
 0xf1f   : > { %s8650_s23 = sld [smem:[#allocation14_spill]] }
 0xf23   : > { %p26_p5 = scmp.ge.s32.totalorder %s8648_s24, 4  }
 0xf24   : > { %s8652_s22 = smov %s8649_s18 }
 0xf25   :  { %28 = sbr.rel (!%p26_p5) target bundleno = 11 (0xb), region = 145 }
 0xf2a   :  { %4165 = vsyncpa [#allocation3], 1 }
 0xf2b   :  { %4167 = vsyncpa [#allocation3 + $0x1], 1 }
 0xf2c   :  { %4168 = vsyncpa [#allocation5], 1 }
 0xf2d   :  { %4170 = vsyncpa [#allocation5 + $0x1], 1 }

</bundles_post_ra>
